<compile_context>
chip_gen: v7x
topology: tpu7x:2x2x1
jax: 0.10.0
libtpu: 0.0.40
codegen_flags: <defaults>
</compile_context>

<pallas_src>
import functools

import jax
import jax.numpy as jnp
from jax import lax
from jax.experimental import pallas as pl
from jax.experimental.pallas import tpu as pltpu


def _round_up(x, m):
    return ((x + m - 1) // m) * m


_ARB = pltpu.CompilerParams(dimension_semantics=("arbitrary",))


# ----------------------------------------------------------------------------
# Pallas kernels
# ----------------------------------------------------------------------------
def _gemm_t_kernel(w_ref, p_ref, b_ref, o_ref, *, relu):
    """out = W @ patches + bias_col (+ReLU); f32 MXU accumulation, store o_ref.dtype."""
    acc = jnp.dot(w_ref[...], p_ref[...], preferred_element_type=jnp.float32)
    acc = acc + b_ref[...]                       # (Mp, 1) broadcast along lanes
    if relu:
        acc = jnp.maximum(acc, 0.0)
    o_ref[...] = acc.astype(o_ref.dtype)


def _enc_tail_kernel(h2_ref, w3_ref, b3_ref, wh_ref, bh_ref, wd_ref, bd_ref,
                     mu_ref, lv_ref, d1_ref):
    """Fused enc3 -> (mu, log_var) head -> dec1; all activations stay in VMEM."""
    h3 = jnp.dot(h2_ref[...], w3_ref[...], preferred_element_type=jnp.float32)
    h3 = jnp.maximum(h3 + b3_ref[...], 0.0)
    head = jnp.dot(h3.astype(jnp.bfloat16), wh_ref[...],
                   preferred_element_type=jnp.float32) + bh_ref[...]
    z = mu_ref.shape[-1]
    mu = head[:, :z]
    mu_ref[...] = mu
    lv_ref[...] = head[:, z:]
    d1 = jnp.dot(mu.astype(jnp.bfloat16), wd_ref[...],
                 preferred_element_type=jnp.float32) + bd_ref[...]
    d1_ref[...] = jnp.maximum(d1, 0.0).astype(d1_ref.dtype)


def gemm_t(w_p, patches, bias_p, *, m, relu, out_dtype):
    """out[:m, :N] of relu(W_p @ pad(patches) + bias_col); single whole-block MXU pass.

    w_p / bias_p are pre-padded (Mp, Kp) / (Mp, 1) from prepare_params; only the
    patches operand is padded here (K zero-pad is exact, N pad keeps stores lane-dense)."""
    Mp, Kp = w_p.shape
    K, N = patches.shape
    Np = _round_up(N, 128)
    if patches.dtype != jnp.bfloat16:
        patches = patches.astype(jnp.bfloat16)
    if (K, N) != (Kp, Np):
        patches = jnp.pad(patches, ((0, Kp - K), (0, Np - N)))
    out = pl.pallas_call(
        functools.partial(_gemm_t_kernel, relu=relu),
        out_shape=jax.ShapeDtypeStruct((Mp, Np), out_dtype),
        grid=(1,),
        in_specs=[pl.BlockSpec((Mp, Kp), lambda i: (0, 0)),
                  pl.BlockSpec((Kp, Np), lambda i: (0, 0)),
                  pl.BlockSpec((Mp, 1), lambda i: (0, 0))],
        out_specs=pl.BlockSpec((Mp, Np), lambda i: (0, 0)),
        compiler_params=_ARB,
    )(w_p, patches, bias_p)
    return out[:m, :N]


# ----------------------------------------------------------------------------
# Patch extraction (one fused XLA grouped conv with a one-hot kernel)
# ----------------------------------------------------------------------------
# TODO(synk): patch extraction and the sub-pixel parity interleave still run as XLA
# ops between the Pallas GEMMs; pulling them in-kernel (gather DMA / strided stores)
# would fuse the whole decoder into a single pallas_call.
def extract_patches(x, spec, kh, kw, stride, padding):
    """im2col via one grouped conv with a one-hot kernel.

    x laid out per `spec` ('NCHW' or 'CNHW').  Returns (patches_T, OH, OW) with
    patches_T (C*kh*kw, B*OH*OW); K-order is c*kh*kw + i*kw + j, identical to
    PyTorch weight.reshape(OC, -1) ordering."""
    C = x.shape[spec.index("C")]
    eye = jnp.eye(kh * kw, dtype=x.dtype).reshape(kh * kw, 1, kh, kw)
    rhs = jnp.tile(eye, (C, 1, 1, 1))            # out-channel k = c*kh*kw + (i*kw + j)
    out = lax.conv_general_dilated(
        x, rhs, (stride, stride), padding,
        dimension_numbers=(spec, "OIHW", "CNHW"),
        feature_group_count=C)
    K, B, OH, OW = out.shape
    return out.reshape(K, B * OH * OW), OH, OW


def deconv_s2(x, w_p, bias_p, *, oc, kh, relu, out_dtype):
    """PyTorch ConvTranspose2d(stride=2, padding=0, even kernel) via sub-pixel (parity)
    decomposition: one shared im2col + one fused GEMM with rows = 4*OC, then interleave."""
    B = x.shape[0]
    pad = kh - 1
    patches, ohp, owp = extract_patches(x, "NCHW", kh, kh, 1, [(pad, pad), (pad, pad)])
    out_t = gemm_t(w_p, patches, bias_p, m=4 * oc, relu=relu, out_dtype=out_dtype)
    out_t = out_t.reshape(2, 2, oc, B, ohp, owp)   # (py, px, oc, b, a, c)
    out = out_t.transpose(3, 2, 4, 0, 5, 1)        # (b, oc, a, py, c, px)
    return out.reshape(B, oc, 2 * ohp, 2 * owp)    # y = 2a+py, x = 2c+px


# ----------------------------------------------------------------------------
# Parameters: PyTorch-layout init + one-time conversion to GEMM-ready form
# ----------------------------------------------------------------------------
def init_params(key, channel_in=3, ch=4, z=512, h_dim=512):
    ks = jax.random.split(key, 18)

    def cw(k, oc, ic, kk):   # Conv2d weight (OC, IC, K, K)
        return jax.random.normal(k, (oc, ic, kk, kk), jnp.float32) / jnp.sqrt(ic * kk * kk)

    def tw(k, ic, oc, kk):   # ConvTranspose2d weight (IC, OC, K, K)
        return jax.random.normal(k, (ic, oc, kk, kk), jnp.float32) / jnp.sqrt(ic * kk * kk)

    def bw(k, n):
        return 0.01 * jax.random.normal(k, (n,), jnp.float32)

    return {
        "enc1_w": cw(ks[0], ch, channel_in, 8),       "enc1_b": bw(ks[1], ch),
        "enc2_w": cw(ks[2], ch * 2, ch, 4),           "enc2_b": bw(ks[3], ch * 2),
        "enc3_w": cw(ks[4], ch * 32, ch * 2, 11),     "enc3_b": bw(ks[5], ch * 32),
        "mu_w":   cw(ks[6], z, ch * 32, 1),           "mu_b":   bw(ks[7], z),
        "lv_w":   cw(ks[8], z, ch * 32, 1),           "lv_b":   bw(ks[9], z),
        "dec1_w": tw(ks[10], h_dim, ch * 8, 6),       "dec1_b": bw(ks[11], ch * 8),
        "dec2_w": tw(ks[12], ch * 8, ch * 4, 8),      "dec2_b": bw(ks[13], ch * 4),
        "dec3_w": tw(ks[14], ch * 4, ch * 2, 6),      "dec3_b": bw(ks[15], ch * 2),
        "dec4_w": tw(ks[16], ch * 2, channel_in, 6),  "dec4_b": bw(ks[17], channel_in),
    }


def _convt_s2_subkernels(w):
    """w:(IC,OC,K,K), K even, stride 2 -> (4, OC, IC, K/2, K/2) parity sub-kernels
    (spatially flipped, channel-swapped) turning the transposed conv into a stride-1
    conv (per output parity) on the (K/2-1)-zero-padded input."""
    IC, OC, K, _ = w.shape
    assert K % 2 == 0
    subs = []
    for py in (0, 1):
        for px in (0, 1):
            wp = jnp.flip(w[:, :, py::2, px::2], axis=(2, 3))   # (IC, OC, Kh, Kh)
            subs.append(wp.transpose(1, 0, 2, 3))               # (OC, IC, Kh, Kh)
    return jnp.stack(subs, axis=0)


def prepare_params(p):
    """One-time (outside jit) conversion of PyTorch-layout params into padded bf16
    GEMM-ready matrices plus a static shape config; the jitted forward never pads,
    reshapes or casts a weight."""
    bf, f32 = jnp.bfloat16, jnp.float32

    def pad2(a, rows, cols):
        return jnp.pad(a, ((0, rows - a.shape[0]), (0, cols - a.shape[1])))

    def w_rows(w4):          # (OC, IC, kh, kw) -> padded (Mp, Kp) bf16, transposed-GEMM rows
        m = w4.shape[0]
        k = w4.shape[1] * w4.shape[2] * w4.shape[3]
        return pad2(w4.reshape(m, k), _round_up(m, 16), _round_up(k, 128)).astype(bf)

    def b_col(b, mp):
        return jnp.pad(b.astype(f32), (0, mp - b.shape[0])).reshape(mp, 1)

    gp = {}
    gp["enc1_w"] = w_rows(p["enc1_w"])
    gp["enc1_b"] = b_col(p["enc1_b"], gp["enc1_w"].shape[0])
    gp["enc2_w"] = w_rows(p["enc2_w"])
    gp["enc2_b"] = b_col(p["enc2_b"], gp["enc2_w"].shape[0])

    # Fused enc3 -> head -> dec1 (standard orientation; ch=4 config => all N dims
    # (128, 1024, 1152) are already 128-multiples, only enc3's K needs zero-padding).
    w3 = p["enc3_w"].reshape(p["enc3_w"].shape[0], -1).T                  # (968, 128)
    gp["enc3_w"] = jnp.pad(
        w3, ((0, _round_up(w3.shape[0], 128) - w3.shape[0]), (0, 0))).astype(bf)
    gp["enc3_b"] = p["enc3_b"].astype(f32).reshape(1, -1)
    head_w = jnp.concatenate([p["mu_w"].reshape(p["mu_w"].shape[0], -1),
                              p["lv_w"].reshape(p["lv_w"].shape[0], -1)], axis=0).T
    gp["head_w"] = head_w.astype(bf)                                      # (128, 2*z)
    gp["head_b"] = jnp.concatenate([p["mu_b"], p["lv_b"]]).astype(f32).reshape(1, -1)
    ic1, oc1, k1, _ = p["dec1_w"].shape
    gp["dec1_w"] = p["dec1_w"].reshape(ic1, oc1 * k1 * k1).astype(bf)     # (512, 1152)
    gp["dec1_b"] = jnp.repeat(p["dec1_b"], k1 * k1).astype(f32).reshape(1, -1)

    for name in ("dec2", "dec3", "dec4"):
        sub = _convt_s2_subkernels(p[name + "_w"])                        # (4, OC, IC, Kh, Kh)
        m = sub.shape[0] * sub.shape[1]
        k = sub.shape[2] * sub.shape[3] * sub.shape[4]
        gp[name + "_w"] = pad2(sub.reshape(m, k),
                               _round_up(m, 16), _round_up(k, 128)).astype(bf)
        gp[name + "_b"] = b_col(jnp.tile(p[name + "_b"], 4), _round_up(m, 16))

    cfg = {
        "enc1": (int(p["enc1_w"].shape[0]), int(p["enc1_w"].shape[2]), 4, ((2, 2), (2, 2))),
        "enc2": (int(p["enc2_w"].shape[0]), int(p["enc2_w"].shape[2]), 2, ((1, 2), (1, 2))),
        "z": int(p["mu_w"].shape[0]),
        "dec1": (int(p["dec1_w"].shape[1]), int(p["dec1_w"].shape[2])),
        "dec2": (int(p["dec2_w"].shape[1]), int(p["dec2_w"].shape[2]) // 2),
        "dec3": (int(p["dec3_w"].shape[1]), int(p["dec3_w"].shape[2]) // 2),
        "dec4": (int(p["dec4_w"].shape[1]), int(p["dec4_w"].shape[2]) // 2),
    }
    return gp, cfg


# ----------------------------------------------------------------------------
# Forward pass (Pallas path)
# ----------------------------------------------------------------------------
def vae_forward(cfg, gp, x):
    B = x.shape[0]
    bf = jnp.bfloat16
    xb = x.astype(bf)

    # --- encoder: tiny-OC convs as transposed GEMMs, bf16 intermediates ---
    oc1, k1, s1, pad1 = cfg["enc1"]                          # ZeroPad2d(2,2,2,2)+Conv8/4
    p1, oh1, ow1 = extract_patches(xb, "NCHW", k1, k1, s1, pad1)
    h1 = gemm_t(gp["enc1_w"], p1, gp["enc1_b"], m=oc1, relu=True, out_dtype=bf)
    h1 = h1.reshape(oc1, B, oh1, ow1)                        # CNHW, no transpose needed

    oc2, k2, s2, pad2 = cfg["enc2"]                          # ZeroPad2d(1,2,1,2)+Conv4/2
    p2, oh2, ow2 = extract_patches(h1, "CNHW", k2, k2, s2, pad2)
    h2 = gemm_t(gp["enc2_w"], p2, gp["enc2_b"], m=oc2, relu=True, out_dtype=bf)

    # --- fused enc3 (11x11 on 11x11 map == matmul) -> mu/log_var head -> dec1 ---
    h2 = h2.reshape(oc2, B, oh2, ow2).transpose(1, 0, 2, 3).reshape(B, -1)
    Bp = _round_up(B, 16)
    Kp3 = gp["enc3_w"].shape[0]
    h2p = jnp.pad(h2, ((0, Bp - B), (0, Kp3 - h2.shape[1])))
    z = cfg["z"]
    n_d1 = gp["dec1_w"].shape[1]
    mu_p, lv_p, d1_p = pl.pallas_call(
        _enc_tail_kernel,
        out_shape=(jax.ShapeDtypeStruct((Bp, z), jnp.float32),
                   jax.ShapeDtypeStruct((Bp, z), jnp.float32),
                   jax.ShapeDtypeStruct((Bp, n_d1), bf)),
        grid=(1,),
        in_specs=[pl.BlockSpec((Bp, Kp3), lambda i: (0, 0)),
                  pl.BlockSpec(gp["enc3_w"].shape, lambda i: (0, 0)),
                  pl.BlockSpec(gp["enc3_b"].shape, lambda i: (0, 0)),
                  pl.BlockSpec(gp["head_w"].shape, lambda i: (0, 0)),
                  pl.BlockSpec(gp["head_b"].shape, lambda i: (0, 0)),
                  pl.BlockSpec(gp["dec1_w"].shape, lambda i: (0, 0)),
                  pl.BlockSpec(gp["dec1_b"].shape, lambda i: (0, 0))],
        out_specs=(pl.BlockSpec((Bp, z), lambda i: (0, 0)),
                   pl.BlockSpec((Bp, z), lambda i: (0, 0)),
                   pl.BlockSpec((Bp, n_d1), lambda i: (0, 0))),
        compiler_params=_ARB,
    )(h2p, gp["enc3_w"], gp["enc3_b"], gp["head_w"], gp["head_b"],
      gp["dec1_w"], gp["dec1_b"])
    mu, log_var = mu_p[:B], lv_p[:B]
    # torch forward: encoding = sample(mu, log_var) is immediately overwritten by
    # encoding = mu, so the reparameterization noise is dead code and omitted.

    # --- decoder: dec1 already computed (ConvT on 1x1 input == matmul), then
    #     three sub-pixel-decomposed stride-2 transposed convs ---
    oc_d1, k_d1 = cfg["dec1"]
    d = d1_p[:B].reshape(B, oc_d1, k_d1, k_d1)               # UnFlatten + ConvT(6,2) on 1x1
    oc, kh = cfg["dec2"]
    d = deconv_s2(d, gp["dec2_w"], gp["dec2_b"], oc=oc, kh=kh, relu=True, out_dtype=bf)
    oc, kh = cfg["dec3"]
    d = deconv_s2(d, gp["dec3_w"], gp["dec3_b"], oc=oc, kh=kh, relu=True, out_dtype=bf)
    oc, kh = cfg["dec4"]
    recon = deconv_s2(d, gp["dec4_w"], gp["dec4_b"], oc=oc, kh=kh, relu=False,
                      out_dtype=jnp.float32)
    return recon, mu, log_var


# ----------------------------------------------------------------------------
# Pure-XLA f32 reference (PyTorch Conv2d / ConvTranspose2d semantics)
# ----------------------------------------------------------------------------
def reference_forward(p, x):
    dn = ("NCHW", "OIHW", "NCHW")

    def conv(h, w, b, stride, pad):
        y = lax.conv_general_dilated(h, w, (stride, stride), pad, dimension_numbers=dn)
        return y + b.reshape(1, -1, 1, 1)

    def convT(h, w, b, stride):       # ConvTranspose2d, padding=0, output_padding=0
        k = w.shape[2]
        wf = jnp.flip(w, (2, 3)).transpose(1, 0, 2, 3)
        y = lax.conv_general_dilated(h, wf, (1, 1), [(k - 1, k - 1)] * 2,
                                     lhs_dilation=(stride, stride), dimension_numbers=dn)
        return y + b.reshape(1, -1, 1, 1)

    B = x.shape[0]
    h = jax.nn.relu(conv(x, p["enc1_w"], p["enc1_b"], 4, [(2, 2), (2, 2)]))
    h = jax.nn.relu(conv(h, p["enc2_w"], p["enc2_b"], 2, [(1, 2), (1, 2)]))
    h = jax.nn.relu(conv(h, p["enc3_w"], p["enc3_b"], 1, [(0, 0), (0, 0)]))
    mu = conv(h, p["mu_w"], p["mu_b"], 1, [(0, 0), (0, 0)]).reshape(B, -1)
    lv = conv(h, p["lv_w"], p["lv_b"], 1, [(0, 0), (0, 0)]).reshape(B, -1)
    d = mu.reshape(B, -1, 1, 1)
    d = jax.nn.relu(convT(d, p["dec1_w"], p["dec1_b"], 2))
    d = jax.nn.relu(convT(d, p["dec2_w"], p["dec2_b"], 2))
    d = jax.nn.relu(convT(d, p["dec3_w"], p["dec3_b"], 2))
    recon = convT(d, p["dec4_w"], p["dec4_b"], 2)
    return recon, mu, lv


if __name__ == "__main__":
    key = jax.random.PRNGKey(0)
    # 84x84 / z=h_dim=512 is the only configuration for which this module's
    # encoder -> 1x1 -> UnFlatten(512) chain is self-consistent.
    x = jax.random.normal(key, (2, 3, 84, 84), jnp.float32)
    params = init_params(jax.random.PRNGKey(1), channel_in=3, ch=4, z=512, h_dim=512)
    gp, cfg = prepare_params(params)              # one-time weight prep (outside jit)

    fwd = jax.jit(functools.partial(vae_forward, cfg))
    recon, mu, log_var = fwd(gp, x)
    jax.block_until_ready((recon, mu, log_var))

    assert recon.shape == (2, 3, 84, 84), recon.shape
    assert mu.shape == (2, 512), mu.shape
    assert log_var.shape == (2, 512), log_var.shape
    assert bool(jnp.all(jnp.isfinite(recon))) and bool(jnp.all(jnp.isfinite(mu)))
    assert bool(jnp.all(jnp.isfinite(log_var)))

    # Numerical check of the bf16 Pallas path against the f32 XLA reference.
    r_ref, mu_ref, lv_ref = jax.jit(reference_forward)(params, x)
    for got, ref in ((recon, r_ref), (mu, mu_ref), (log_var, lv_ref)):
        err = float(jnp.max(jnp.abs(got - ref)) / (jnp.max(jnp.abs(ref)) + 1e-6))
        assert err < 0.1, f"mismatch vs reference: rel-to-max err {err:.4f}"

    print("KERNEL_OK")
</pallas_src>

<mosaic_0001>
module attributes {stable_mosaic.version = 11 : i64} {
  func.func @_gemm_t_kernel(%arg0: i32, %arg1: memref<16x256xbf16, #tpu.memory_space<vmem>>, %arg2: memref<256x896xbf16, #tpu.memory_space<vmem>>, %arg3: memref<16x1xf32, #tpu.memory_space<vmem>>, %arg4: memref<16x896xbf16, #tpu.memory_space<vmem>>) attributes {dimension_semantics = [#tpu.dimension_semantics<arbitrary>], iteration_bounds = array<i64: 1>, scalar_prefetch = 0 : i64, scratch_operands = 0 : i64, tpu.core_type = #tpu.core_type<tc>, window_params = [{pipeline_mode = #tpu.pipeline_mode<synchronous>, transform_indices = @transform_0, window_bounds = array<i64: 16, 256>}, {pipeline_mode = #tpu.pipeline_mode<synchronous>, transform_indices = @transform_1, window_bounds = array<i64: 256, 896>}, {pipeline_mode = #tpu.pipeline_mode<synchronous>, transform_indices = @transform_2, window_bounds = array<i64: 16, 1>}, {pipeline_mode = #tpu.pipeline_mode<synchronous>, transform_indices = @transform_3, window_bounds = array<i64: 16, 896>}]} {
    %c0 = arith.constant 0 : index
    %c0_0 = arith.constant 0 : index
    %0 = vector.load %arg1[%c0, %c0_0] : memref<16x256xbf16, #tpu.memory_space<vmem>>, vector<16x256xbf16>
    %c0_1 = arith.constant 0 : index
    %c0_2 = arith.constant 0 : index
    %1 = vector.load %arg2[%c0_1, %c0_2] : memref<256x896xbf16, #tpu.memory_space<vmem>>, vector<256x896xbf16>
    %cst = arith.constant dense<0.000000e+00> : vector<16x896xf32>
    %2 = tpu.matmul %0, %1, %cst {dimension_numbers = #tpu.dot_dimension_numbers<[1], [0], [0], [1], [0, 0, 1, 1], [], []>} : vector<16x256xbf16>, vector<256x896xbf16>, vector<16x896xf32> -> vector<16x896xf32>
    %c0_3 = arith.constant 0 : index
    %c0_4 = arith.constant 0 : index
    %3 = vector.load %arg3[%c0_3, %c0_4] : memref<16x1xf32, #tpu.memory_space<vmem>>, vector<16x1xf32>
    %4 = vector.broadcast %3 : vector<16x1xf32> to vector<16x896xf32>
    %5 = arith.addf %2, %4 : vector<16x896xf32>
    %cst_5 = arith.constant 0.000000e+00 : f32
    %6 = vector.broadcast %cst_5 : f32 to vector<16x896xf32>
    %7 = arith.maximumf %5, %6 : vector<16x896xf32>
    %8 = arith.truncf %7 : vector<16x896xf32> to vector<16x896xbf16>
    %c0_6 = arith.constant 0 : index
    %c0_7 = arith.constant 0 : index
    %9 = vector.load %arg4[%c0_6, %c0_7] : memref<16x896xbf16, #tpu.memory_space<vmem>>, vector<16x896xbf16>
    tpu.vector_store %arg4[%c0_6, %c0_7], %8 {strides = array<i32>} : memref<16x896xbf16, #tpu.memory_space<vmem>>, vector<16x896xbf16>,
    return
  }
  func.func @transform_0(%arg0: i32) -> (i32, i32) {
    %c0_i32 = arith.constant 0 : i32
    %c0_i32_0 = arith.constant 0 : i32
    %c0_i32_1 = arith.constant 0 : i32
    return %c0_i32, %c0_i32_0 : i32, i32
  }
  func.func @transform_1(%arg0: i32) -> (i32, i32) {
    %c0_i32 = arith.constant 0 : i32
    %c0_i32_0 = arith.constant 0 : i32
    %c0_i32_1 = arith.constant 0 : i32
    return %c0_i32, %c0_i32_0 : i32, i32
  }
  func.func @transform_2(%arg0: i32) -> (i32, i32) {
    %c0_i32 = arith.constant 0 : i32
    %c0_i32_0 = arith.constant 0 : i32
    %c0_i32_1 = arith.constant 0 : i32
    return %c0_i32, %c0_i32_0 : i32, i32
  }
  func.func @transform_3(%arg0: i32) -> (i32, i32) {
    %c0_i32 = arith.constant 0 : i32
    %c0_i32_0 = arith.constant 0 : i32
    %c0_i32_1 = arith.constant 0 : i32
    return %c0_i32, %c0_i32_0 : i32, i32
  }
}

module attributes {stable_mosaic.version = 11 : i64} {
  func.func @_gemm_t_kernel(%arg0: i32, %arg1: memref<16x128xbf16, #tpu.memory_space<vmem>>, %arg2: memref<128x256xbf16, #tpu.memory_space<vmem>>, %arg3: memref<16x1xf32, #tpu.memory_space<vmem>>, %arg4: memref<16x256xbf16, #tpu.memory_space<vmem>>) attributes {dimension_semantics = [#tpu.dimension_semantics<arbitrary>], iteration_bounds = array<i64: 1>, scalar_prefetch = 0 : i64, scratch_operands = 0 : i64, tpu.core_type = #tpu.core_type<tc>, window_params = [{pipeline_mode = #tpu.pipeline_mode<synchronous>, transform_indices = @transform_0, window_bounds = array<i64: 16, 128>}, {pipeline_mode = #tpu.pipeline_mode<synchronous>, transform_indices = @transform_1, window_bounds = array<i64: 128, 256>}, {pipeline_mode = #tpu.pipeline_mode<synchronous>, transform_indices = @transform_2, window_bounds = array<i64: 16, 1>}, {pipeline_mode = #tpu.pipeline_mode<synchronous>, transform_indices = @transform_3, window_bounds = array<i64: 16, 256>}]} {
    %c0 = arith.constant 0 : index
    %c0_0 = arith.constant 0 : index
    %0 = vector.load %arg1[%c0, %c0_0] : memref<16x128xbf16, #tpu.memory_space<vmem>>, vector<16x128xbf16>
    %c0_1 = arith.constant 0 : index
    %c0_2 = arith.constant 0 : index
    %1 = vector.load %arg2[%c0_1, %c0_2] : memref<128x256xbf16, #tpu.memory_space<vmem>>, vector<128x256xbf16>
    %cst = arith.constant dense<0.000000e+00> : vector<16x256xf32>
    %2 = tpu.matmul %0, %1, %cst {dimension_numbers = #tpu.dot_dimension_numbers<[1], [0], [0], [1], [0, 0, 1, 1], [], []>} : vector<16x128xbf16>, vector<128x256xbf16>, vector<16x256xf32> -> vector<16x256xf32>
    %c0_3 = arith.constant 0 : index
    %c0_4 = arith.constant 0 : index
    %3 = vector.load %arg3[%c0_3, %c0_4] : memref<16x1xf32, #tpu.memory_space<vmem>>, vector<16x1xf32>
    %4 = vector.broadcast %3 : vector<16x1xf32> to vector<16x256xf32>
    %5 = arith.addf %2, %4 : vector<16x256xf32>
    %cst_5 = arith.constant 0.000000e+00 : f32
    %6 = vector.broadcast %cst_5 : f32 to vector<16x256xf32>
    %7 = arith.maximumf %5, %6 : vector<16x256xf32>
    %8 = arith.truncf %7 : vector<16x256xf32> to vector<16x256xbf16>
    %c0_6 = arith.constant 0 : index
    %c0_7 = arith.constant 0 : index
    %9 = vector.load %arg4[%c0_6, %c0_7] : memref<16x256xbf16, #tpu.memory_space<vmem>>, vector<16x256xbf16>
    tpu.vector_store %arg4[%c0_6, %c0_7], %8 {strides = array<i32>} : memref<16x256xbf16, #tpu.memory_space<vmem>>, vector<16x256xbf16>,
    return
  }
  func.func @transform_0(%arg0: i32) -> (i32, i32) {
    %c0_i32 = arith.constant 0 : i32
    %c0_i32_0 = arith.constant 0 : i32
    %c0_i32_1 = arith.constant 0 : i32
    return %c0_i32, %c0_i32_0 : i32, i32
  }
  func.func @transform_1(%arg0: i32) -> (i32, i32) {
    %c0_i32 = arith.constant 0 : i32
    %c0_i32_0 = arith.constant 0 : i32
    %c0_i32_1 = arith.constant 0 : i32
    return %c0_i32, %c0_i32_0 : i32, i32
  }
  func.func @transform_2(%arg0: i32) -> (i32, i32) {
    %c0_i32 = arith.constant 0 : i32
    %c0_i32_0 = arith.constant 0 : i32
    %c0_i32_1 = arith.constant 0 : i32
    return %c0_i32, %c0_i32_0 : i32, i32
  }
  func.func @transform_3(%arg0: i32) -> (i32, i32) {
    %c0_i32 = arith.constant 0 : i32
    %c0_i32_0 = arith.constant 0 : i32
    %c0_i32_1 = arith.constant 0 : i32
    return %c0_i32, %c0_i32_0 : i32, i32
  }
}

module attributes {stable_mosaic.version = 11 : i64} {
  func.func @_enc_tail_kernel(%arg0: i32, %arg1: memref<16x1024xbf16, #tpu.memory_space<vmem>>, %arg2: memref<1024x128xbf16, #tpu.memory_space<vmem>>, %arg3: memref<1x128xf32, #tpu.memory_space<vmem>>, %arg4: memref<128x1024xbf16, #tpu.memory_space<vmem>>, %arg5: memref<1x1024xf32, #tpu.memory_space<vmem>>, %arg6: memref<512x1152xbf16, #tpu.memory_space<vmem>>, %arg7: memref<1x1152xf32, #tpu.memory_space<vmem>>, %arg8: memref<16x512xf32, #tpu.memory_space<vmem>>, %arg9: memref<16x512xf32, #tpu.memory_space<vmem>>, %arg10: memref<16x1152xbf16, #tpu.memory_space<vmem>>) attributes {dimension_semantics = [#tpu.dimension_semantics<arbitrary>], iteration_bounds = array<i64: 1>, scalar_prefetch = 0 : i64, scratch_operands = 0 : i64, tpu.core_type = #tpu.core_type<tc>, window_params = [{pipeline_mode = #tpu.pipeline_mode<synchronous>, transform_indices = @transform_0, window_bounds = array<i64: 16, 1024>}, {pipeline_mode = #tpu.pipeline_mode<synchronous>, transform_indices = @transform_1, window_bounds = array<i64: 1024, 128>}, {pipeline_mode = #tpu.pipeline_mode<synchronous>, transform_indices = @transform_2, window_bounds = array<i64: 1, 128>}, {pipeline_mode = #tpu.pipeline_mode<synchronous>, transform_indices = @transform_3, window_bounds = array<i64: 128, 1024>}, {pipeline_mode = #tpu.pipeline_mode<synchronous>, transform_indices = @transform_4, window_bounds = array<i64: 1, 1024>}, {pipeline_mode = #tpu.pipeline_mode<synchronous>, transform_indices = @transform_5, window_bounds = array<i64: 512, 1152>}, {pipeline_mode = #tpu.pipeline_mode<synchronous>, transform_indices = @transform_6, window_bounds = array<i64: 1, 1152>}, {pipeline_mode = #tpu.pipeline_mode<synchronous>, transform_indices = @transform_7, window_bounds = array<i64: 16, 512>}, {pipeline_mode = #tpu.pipeline_mode<synchronous>, transform_indices = @transform_8, window_bounds = array<i64: 16, 512>}, {pipeline_mode = #tpu.pipeline_mode<synchronous>, transform_indices = @transform_9, window_bounds = array<i64: 16, 1152>}]} {
    %c0 = arith.constant 0 : index
    %c0_0 = arith.constant 0 : index
    %0 = vector.load %arg1[%c0, %c0_0] : memref<16x1024xbf16, #tpu.memory_space<vmem>>, vector<16x1024xbf16>
    %c0_1 = arith.constant 0 : index
    %c0_2 = arith.constant 0 : index
    %1 = vector.load %arg2[%c0_1, %c0_2] : memref<1024x128xbf16, #tpu.memory_space<vmem>>, vector<1024x128xbf16>
    %cst = arith.constant dense<0.000000e+00> : vector<16x128xf32>
    %2 = tpu.matmul %0, %1, %cst {dimension_numbers = #tpu.dot_dimension_numbers<[1], [0], [0], [1], [0, 0, 1, 1], [], []>} : vector<16x1024xbf16>, vector<1024x128xbf16>, vector<16x128xf32> -> vector<16x128xf32>
    %c0_3 = arith.constant 0 : index
    %c0_4 = arith.constant 0 : index
    %3 = vector.load %arg3[%c0_3, %c0_4] : memref<1x128xf32, #tpu.memory_space<vmem>>, vector<1x128xf32>
    %4 = vector.broadcast %3 : vector<1x128xf32> to vector<16x128xf32>
    %5 = arith.addf %2, %4 : vector<16x128xf32>
    %cst_5 = arith.constant 0.000000e+00 : f32
    %6 = vector.broadcast %cst_5 : f32 to vector<16x128xf32>
    %7 = arith.maximumf %5, %6 : vector<16x128xf32>
    %8 = arith.truncf %7 : vector<16x128xf32> to vector<16x128xbf16>
    %c0_6 = arith.constant 0 : index
    %c0_7 = arith.constant 0 : index
    %9 = vector.load %arg4[%c0_6, %c0_7] : memref<128x1024xbf16, #tpu.memory_space<vmem>>, vector<128x1024xbf16>
    %cst_8 = arith.constant dense<0.000000e+00> : vector<16x1024xf32>
    %10 = tpu.matmul %8, %9, %cst_8 {dimension_numbers = #tpu.dot_dimension_numbers<[1], [0], [0], [1], [0, 0, 1, 1], [], []>} : vector<16x128xbf16>, vector<128x1024xbf16>, vector<16x1024xf32> -> vector<16x1024xf32>
    %c0_9 = arith.constant 0 : index
    %c0_10 = arith.constant 0 : index
    %11 = vector.load %arg5[%c0_9, %c0_10] : memref<1x1024xf32, #tpu.memory_space<vmem>>, vector<1x1024xf32>
    %12 = vector.broadcast %11 : vector<1x1024xf32> to vector<16x1024xf32>
    %13 = arith.addf %10, %12 : vector<16x1024xf32>
    %14 = vector.extract_strided_slice %13 {offsets = [0, 0], sizes = [16, 512], strides = [1, 1]} : vector<16x1024xf32> to vector<16x512xf32>
    %c0_11 = arith.constant 0 : index
    %c0_12 = arith.constant 0 : index
    %15 = vector.load %arg8[%c0_11, %c0_12] : memref<16x512xf32, #tpu.memory_space<vmem>>, vector<16x512xf32>
    tpu.vector_store %arg8[%c0_11, %c0_12], %14 {strides = array<i32>} : memref<16x512xf32, #tpu.memory_space<vmem>>, vector<16x512xf32>,
    %16 = vector.extract_strided_slice %13 {offsets = [0, 512], sizes = [16, 512], strides = [1, 1]} : vector<16x1024xf32> to vector<16x512xf32>
    %c0_13 = arith.constant 0 : index
    %c0_14 = arith.constant 0 : index
    %17 = vector.load %arg9[%c0_13, %c0_14] : memref<16x512xf32, #tpu.memory_space<vmem>>, vector<16x512xf32>
    tpu.vector_store %arg9[%c0_13, %c0_14], %16 {strides = array<i32>} : memref<16x512xf32, #tpu.memory_space<vmem>>, vector<16x512xf32>,
    %18 = arith.truncf %14 : vector<16x512xf32> to vector<16x512xbf16>
    %c0_15 = arith.constant 0 : index
    %c0_16 = arith.constant 0 : index
    %19 = vector.load %arg6[%c0_15, %c0_16] : memref<512x1152xbf16, #tpu.memory_space<vmem>>, vector<512x1152xbf16>
    %cst_17 = arith.constant dense<0.000000e+00> : vector<16x1152xf32>
    %20 = tpu.matmul %18, %19, %cst_17 {dimension_numbers = #tpu.dot_dimension_numbers<[1], [0], [0], [1], [0, 0, 1, 1], [], []>} : vector<16x512xbf16>, vector<512x1152xbf16>, vector<16x1152xf32> -> vector<16x1152xf32>
    %c0_18 = arith.constant 0 : index
    %c0_19 = arith.constant 0 : index
    %21 = vector.load %arg7[%c0_18, %c0_19] : memref<1x1152xf32, #tpu.memory_space<vmem>>, vector<1x1152xf32>
    %22 = vector.broadcast %21 : vector<1x1152xf32> to vector<16x1152xf32>
    %23 = arith.addf %20, %22 : vector<16x1152xf32>
    %cst_20 = arith.constant 0.000000e+00 : f32
    %24 = vector.broadcast %cst_20 : f32 to vector<16x1152xf32>
    %25 = arith.maximumf %23, %24 : vector<16x1152xf32>
    %26 = arith.truncf %25 : vector<16x1152xf32> to vector<16x1152xbf16>
    %c0_21 = arith.constant 0 : index
    %c0_22 = arith.constant 0 : index
    %27 = vector.load %arg10[%c0_21, %c0_22] : memref<16x1152xbf16, #tpu.memory_space<vmem>>, vector<16x1152xbf16>
    tpu.vector_store %arg10[%c0_21, %c0_22], %26 {strides = array<i32>} : memref<16x1152xbf16, #tpu.memory_space<vmem>>, vector<16x1152xbf16>,
    return
  }
  func.func @transform_0(%arg0: i32) -> (i32, i32) {
    %c0_i32 = arith.constant 0 : i32
    %c0_i32_0 = arith.constant 0 : i32
    %c0_i32_1 = arith.constant 0 : i32
    return %c0_i32, %c0_i32_0 : i32, i32
  }
  func.func @transform_1(%arg0: i32) -> (i32, i32) {
    %c0_i32 = arith.constant 0 : i32
    %c0_i32_0 = arith.constant 0 : i32
    %c0_i32_1 = arith.constant 0 : i32
    return %c0_i32, %c0_i32_0 : i32, i32
  }
  func.func @transform_2(%arg0: i32) -> (i32, i32) {
    %c0_i32 = arith.constant 0 : i32
    %c0_i32_0 = arith.constant 0 : i32
    %c0_i32_1 = arith.constant 0 : i32
    return %c0_i32, %c0_i32_0 : i32, i32
  }
  func.func @transform_3(%arg0: i32) -> (i32, i32) {
    %c0_i32 = arith.constant 0 : i32
    %c0_i32_0 = arith.constant 0 : i32
    %c0_i32_1 = arith.constant 0 : i32
    return %c0_i32, %c0_i32_0 : i32, i32
  }
  func.func @transform_4(%arg0: i32) -> (i32, i32) {
    %c0_i32 = arith.constant 0 : i32
    %c0_i32_0 = arith.constant 0 : i32
    %c0_i32_1 = arith.constant 0 : i32
    return %c0_i32, %c0_i32_0 : i32, i32
  }
  func.func @transform_5(%arg0: i32) -> (i32, i32) {
    %c0_i32 = arith.constant 0 : i32
    %c0_i32_0 = arith.constant 0 : i32
    %c0_i32_1 = arith.constant 0 : i32
    return %c0_i32, %c0_i32_0 : i32, i32
  }
  func.func @transform_6(%arg0: i32) -> (i32, i32) {
    %c0_i32 = arith.constant 0 : i32
    %c0_i32_0 = arith.constant 0 : i32
    %c0_i32_1 = arith.constant 0 : i32
    return %c0_i32, %c0_i32_0 : i32, i32
  }
  func.func @transform_7(%arg0: i32) -> (i32, i32) {
    %c0_i32 = arith.constant 0 : i32
    %c0_i32_0 = arith.constant 0 : i32
    %c0_i32_1 = arith.constant 0 : i32
    return %c0_i32, %c0_i32_0 : i32, i32
  }
  func.func @transform_8(%arg0: i32) -> (i32, i32) {
    %c0_i32 = arith.constant 0 : i32
    %c0_i32_0 = arith.constant 0 : i32
    %c0_i32_1 = arith.constant 0 : i32
    return %c0_i32, %c0_i32_0 : i32, i32
  }
  func.func @transform_9(%arg0: i32) -> (i32, i32) {
    %c0_i32 = arith.constant 0 : i32
    %c0_i32_0 = arith.constant 0 : i32
    %c0_i32_1 = arith.constant 0 : i32
    return %c0_i32, %c0_i32_0 : i32, i32
  }
}

module attributes {stable_mosaic.version = 11 : i64} {
  func.func @_gemm_t_kernel(%arg0: i32, %arg1: memref<64x512xbf16, #tpu.memory_space<vmem>>, %arg2: memref<512x256xbf16, #tpu.memory_space<vmem>>, %arg3: memref<64x1xf32, #tpu.memory_space<vmem>>, %arg4: memref<64x256xbf16, #tpu.memory_space<vmem>>) attributes {dimension_semantics = [#tpu.dimension_semantics<arbitrary>], iteration_bounds = array<i64: 1>, scalar_prefetch = 0 : i64, scratch_operands = 0 : i64, tpu.core_type = #tpu.core_type<tc>, window_params = [{pipeline_mode = #tpu.pipeline_mode<synchronous>, transform_indices = @transform_0, window_bounds = array<i64: 64, 512>}, {pipeline_mode = #tpu.pipeline_mode<synchronous>, transform_indices = @transform_1, window_bounds = array<i64: 512, 256>}, {pipeline_mode = #tpu.pipeline_mode<synchronous>, transform_indices = @transform_2, window_bounds = array<i64: 64, 1>}, {pipeline_mode = #tpu.pipeline_mode<synchronous>, transform_indices = @transform_3, window_bounds = array<i64: 64, 256>}]} {
    %c0 = arith.constant 0 : index
    %c0_0 = arith.constant 0 : index
    %0 = vector.load %arg1[%c0, %c0_0] : memref<64x512xbf16, #tpu.memory_space<vmem>>, vector<64x512xbf16>
    %c0_1 = arith.constant 0 : index
    %c0_2 = arith.constant 0 : index
    %1 = vector.load %arg2[%c0_1, %c0_2] : memref<512x256xbf16, #tpu.memory_space<vmem>>, vector<512x256xbf16>
    %cst = arith.constant dense<0.000000e+00> : vector<64x256xf32>
    %2 = tpu.matmul %0, %1, %cst {dimension_numbers = #tpu.dot_dimension_numbers<[1], [0], [0], [1], [0, 0, 1, 1], [], []>} : vector<64x512xbf16>, vector<512x256xbf16>, vector<64x256xf32> -> vector<64x256xf32>
    %c0_3 = arith.constant 0 : index
    %c0_4 = arith.constant 0 : index
    %3 = vector.load %arg3[%c0_3, %c0_4] : memref<64x1xf32, #tpu.memory_space<vmem>>, vector<64x1xf32>
    %4 = vector.broadcast %3 : vector<64x1xf32> to vector<64x256xf32>
    %5 = arith.addf %2, %4 : vector<64x256xf32>
    %cst_5 = arith.constant 0.000000e+00 : f32
    %6 = vector.broadcast %cst_5 : f32 to vector<64x256xf32>
    %7 = arith.maximumf %5, %6 : vector<64x256xf32>
    %8 = arith.truncf %7 : vector<64x256xf32> to vector<64x256xbf16>
    %c0_6 = arith.constant 0 : index
    %c0_7 = arith.constant 0 : index
    %9 = vector.load %arg4[%c0_6, %c0_7] : memref<64x256xbf16, #tpu.memory_space<vmem>>, vector<64x256xbf16>
    tpu.vector_store %arg4[%c0_6, %c0_7], %8 {strides = array<i32>} : memref<64x256xbf16, #tpu.memory_space<vmem>>, vector<64x256xbf16>,
    return
  }
  func.func @transform_0(%arg0: i32) -> (i32, i32) {
    %c0_i32 = arith.constant 0 : i32
    %c0_i32_0 = arith.constant 0 : i32
    %c0_i32_1 = arith.constant 0 : i32
    return %c0_i32, %c0_i32_0 : i32, i32
  }
  func.func @transform_1(%arg0: i32) -> (i32, i32) {
    %c0_i32 = arith.constant 0 : i32
    %c0_i32_0 = arith.constant 0 : i32
    %c0_i32_1 = arith.constant 0 : i32
    return %c0_i32, %c0_i32_0 : i32, i32
  }
  func.func @transform_2(%arg0: i32) -> (i32, i32) {
    %c0_i32 = arith.constant 0 : i32
    %c0_i32_0 = arith.constant 0 : i32
    %c0_i32_1 = arith.constant 0 : i32
    return %c0_i32, %c0_i32_0 : i32, i32
  }
  func.func @transform_3(%arg0: i32) -> (i32, i32) {
    %c0_i32 = arith.constant 0 : i32
    %c0_i32_0 = arith.constant 0 : i32
    %c0_i32_1 = arith.constant 0 : i32
    return %c0_i32, %c0_i32_0 : i32, i32
  }
}

module attributes {stable_mosaic.version = 11 : i64} {
  func.func @_gemm_t_kernel(%arg0: i32, %arg1: memref<32x256xbf16, #tpu.memory_space<vmem>>, %arg2: memref<256x896xbf16, #tpu.memory_space<vmem>>, %arg3: memref<32x1xf32, #tpu.memory_space<vmem>>, %arg4: memref<32x896xbf16, #tpu.memory_space<vmem>>) attributes {dimension_semantics = [#tpu.dimension_semantics<arbitrary>], iteration_bounds = array<i64: 1>, scalar_prefetch = 0 : i64, scratch_operands = 0 : i64, tpu.core_type = #tpu.core_type<tc>, window_params = [{pipeline_mode = #tpu.pipeline_mode<synchronous>, transform_indices = @transform_0, window_bounds = array<i64: 32, 256>}, {pipeline_mode = #tpu.pipeline_mode<synchronous>, transform_indices = @transform_1, window_bounds = array<i64: 256, 896>}, {pipeline_mode = #tpu.pipeline_mode<synchronous>, transform_indices = @transform_2, window_bounds = array<i64: 32, 1>}, {pipeline_mode = #tpu.pipeline_mode<synchronous>, transform_indices = @transform_3, window_bounds = array<i64: 32, 896>}]} {
    %c0 = arith.constant 0 : index
    %c0_0 = arith.constant 0 : index
    %0 = vector.load %arg1[%c0, %c0_0] : memref<32x256xbf16, #tpu.memory_space<vmem>>, vector<32x256xbf16>
    %c0_1 = arith.constant 0 : index
    %c0_2 = arith.constant 0 : index
    %1 = vector.load %arg2[%c0_1, %c0_2] : memref<256x896xbf16, #tpu.memory_space<vmem>>, vector<256x896xbf16>
    %cst = arith.constant dense<0.000000e+00> : vector<32x896xf32>
    %2 = tpu.matmul %0, %1, %cst {dimension_numbers = #tpu.dot_dimension_numbers<[1], [0], [0], [1], [0, 0, 1, 1], [], []>} : vector<32x256xbf16>, vector<256x896xbf16>, vector<32x896xf32> -> vector<32x896xf32>
    %c0_3 = arith.constant 0 : index
    %c0_4 = arith.constant 0 : index
    %3 = vector.load %arg3[%c0_3, %c0_4] : memref<32x1xf32, #tpu.memory_space<vmem>>, vector<32x1xf32>
    %4 = vector.broadcast %3 : vector<32x1xf32> to vector<32x896xf32>
    %5 = arith.addf %2, %4 : vector<32x896xf32>
    %cst_5 = arith.constant 0.000000e+00 : f32
    %6 = vector.broadcast %cst_5 : f32 to vector<32x896xf32>
    %7 = arith.maximumf %5, %6 : vector<32x896xf32>
    %8 = arith.truncf %7 : vector<32x896xf32> to vector<32x896xbf16>
    %c0_6 = arith.constant 0 : index
    %c0_7 = arith.constant 0 : index
    %9 = vector.load %arg4[%c0_6, %c0_7] : memref<32x896xbf16, #tpu.memory_space<vmem>>, vector<32x896xbf16>
    tpu.vector_store %arg4[%c0_6, %c0_7], %8 {strides = array<i32>} : memref<32x896xbf16, #tpu.memory_space<vmem>>, vector<32x896xbf16>,
    return
  }
  func.func @transform_0(%arg0: i32) -> (i32, i32) {
    %c0_i32 = arith.constant 0 : i32
    %c0_i32_0 = arith.constant 0 : i32
    %c0_i32_1 = arith.constant 0 : i32
    return %c0_i32, %c0_i32_0 : i32, i32
  }
  func.func @transform_1(%arg0: i32) -> (i32, i32) {
    %c0_i32 = arith.constant 0 : i32
    %c0_i32_0 = arith.constant 0 : i32
    %c0_i32_1 = arith.constant 0 : i32
    return %c0_i32, %c0_i32_0 : i32, i32
  }
  func.func @transform_2(%arg0: i32) -> (i32, i32) {
    %c0_i32 = arith.constant 0 : i32
    %c0_i32_0 = arith.constant 0 : i32
    %c0_i32_1 = arith.constant 0 : i32
    return %c0_i32, %c0_i32_0 : i32, i32
  }
  func.func @transform_3(%arg0: i32) -> (i32, i32) {
    %c0_i32 = arith.constant 0 : i32
    %c0_i32_0 = arith.constant 0 : i32
    %c0_i32_1 = arith.constant 0 : i32
    return %c0_i32, %c0_i32_0 : i32, i32
  }
}

module attributes {stable_mosaic.version = 11 : i64} {
  func.func @_gemm_t_kernel(%arg0: i32, %arg1: memref<16x128xbf16, #tpu.memory_space<vmem>>, %arg2: memref<128x3584xbf16, #tpu.memory_space<vmem>>, %arg3: memref<16x1xf32, #tpu.memory_space<vmem>>, %arg4: memref<16x3584xf32, #tpu.memory_space<vmem>>) attributes {dimension_semantics = [#tpu.dimension_semantics<arbitrary>], iteration_bounds = array<i64: 1>, scalar_prefetch = 0 : i64, scratch_operands = 0 : i64, tpu.core_type = #tpu.core_type<tc>, window_params = [{pipeline_mode = #tpu.pipeline_mode<synchronous>, transform_indices = @transform_0, window_bounds = array<i64: 16, 128>}, {pipeline_mode = #tpu.pipeline_mode<synchronous>, transform_indices = @transform_1, window_bounds = array<i64: 128, 3584>}, {pipeline_mode = #tpu.pipeline_mode<synchronous>, transform_indices = @transform_2, window_bounds = array<i64: 16, 1>}, {pipeline_mode = #tpu.pipeline_mode<synchronous>, transform_indices = @transform_3, window_bounds = array<i64: 16, 3584>}]} {
    %c0 = arith.constant 0 : index
    %c0_0 = arith.constant 0 : index
    %0 = vector.load %arg1[%c0, %c0_0] : memref<16x128xbf16, #tpu.memory_space<vmem>>, vector<16x128xbf16>
    %c0_1 = arith.constant 0 : index
    %c0_2 = arith.constant 0 : index
    %1 = vector.load %arg2[%c0_1, %c0_2] : memref<128x3584xbf16, #tpu.memory_space<vmem>>, vector<128x3584xbf16>
    %cst = arith.constant dense<0.000000e+00> : vector<16x3584xf32>
    %2 = tpu.matmul %0, %1, %cst {dimension_numbers = #tpu.dot_dimension_numbers<[1], [0], [0], [1], [0, 0, 1, 1], [], []>} : vector<16x128xbf16>, vector<128x3584xbf16>, vector<16x3584xf32> -> vector<16x3584xf32>
    %c0_3 = arith.constant 0 : index
    %c0_4 = arith.constant 0 : index
    %3 = vector.load %arg3[%c0_3, %c0_4] : memref<16x1xf32, #tpu.memory_space<vmem>>, vector<16x1xf32>
    %4 = vector.broadcast %3 : vector<16x1xf32> to vector<16x3584xf32>
    %5 = arith.addf %2, %4 : vector<16x3584xf32>
    %c0_5 = arith.constant 0 : index
    %c0_6 = arith.constant 0 : index
    %6 = vector.load %arg4[%c0_5, %c0_6] : memref<16x3584xf32, #tpu.memory_space<vmem>>, vector<16x3584xf32>
    tpu.vector_store %arg4[%c0_5, %c0_6], %5 {strides = array<i32>} : memref<16x3584xf32, #tpu.memory_space<vmem>>, vector<16x3584xf32>,
    return
  }
  func.func @transform_0(%arg0: i32) -> (i32, i32) {
    %c0_i32 = arith.constant 0 : i32
    %c0_i32_0 = arith.constant 0 : i32
    %c0_i32_1 = arith.constant 0 : i32
    return %c0_i32, %c0_i32_0 : i32, i32
  }
  func.func @transform_1(%arg0: i32) -> (i32, i32) {
    %c0_i32 = arith.constant 0 : i32
    %c0_i32_0 = arith.constant 0 : i32
    %c0_i32_1 = arith.constant 0 : i32
    return %c0_i32, %c0_i32_0 : i32, i32
  }
  func.func @transform_2(%arg0: i32) -> (i32, i32) {
    %c0_i32 = arith.constant 0 : i32
    %c0_i32_0 = arith.constant 0 : i32
    %c0_i32_1 = arith.constant 0 : i32
    return %c0_i32, %c0_i32_0 : i32, i32
  }
  func.func @transform_3(%arg0: i32) -> (i32, i32) {
    %c0_i32 = arith.constant 0 : i32
    %c0_i32_0 = arith.constant 0 : i32
    %c0_i32_1 = arith.constant 0 : i32
    return %c0_i32, %c0_i32_0 : i32, i32
  }
}

</mosaic_0001>

<bundles_post_ra>
// kernel: vae_forward.6
= control target key start
LH: loop header
LB: loop body
LE: loop exit
PB: predicated region body
PF: predicated region fallthrough
CT: control target
= control target key end

     0   :  { %v1300_v4 = vmov 0   ;;  %s1705_s1 = inlined_call_operand.vmem [shape: bf16[256,896], index: 1, kind: input, shape index: {}]   ;;  %s1706_s0 = inlined_call_operand.vmem [shape: bf16[16,256], index: 0, kind: input, shape index: {}]   ;;  %s1707_s2 = inlined_call_operand.vmem [shape: f32[16,1], index: 2, kind: input, shape index: {}]   ;;  %s1708_s3 = inlined_call_operand.vmem [shape: bf16[16,896], index: 3, kind: output, shape index: {}]  }
   0x1   :  { %v1137_v0 = vld [vmem:[%s1705_s1 + $0x4] ss:$28 sps:$4 sm:$0xff]   ;;  %v1140_v2 = vld [vmem:[%s1705_s1 + $0x3c] ss:$28 sps:$4 sm:$0xff]   ;;  %1136 = vset.pattern.permute.xlu0 %v1300_v4  ;;  %v1143_v5 = vld [vmem:[%s1705_s1 + $0x74] ss:$28 sps:$4 sm:$0xff]  }
   0x2   :  { %v1139_v1 = vld [vmem:[%s1705_s1] ss:$28 sps:$4 sm:$0xff]   ;;  %743 = vmatprep.subr.bf16.mxu0 %v1137_v0  ;;  %v1142_v3 = vld [vmem:[%s1705_s1 + $0x38] ss:$28 sps:$4 sm:$0xff]   ;;  %v1145_v6 = vld [vmem:[%s1705_s1 + $0x70] ss:$28 sps:$4 sm:$0xff]  }
   0x3   :  { %744 = vmatpush1.bf16.msra.mxu0 %v1139_v1  ;;  %v1146_v7 = vld [vmem:[%s1705_s1 + $0xac] ss:$28 sps:$4 sm:$0xff]   ;;  %v1149_v11 = vld [vmem:[%s1705_s1 + $0xe4] ss:$28 sps:$4 sm:$0xff]   ;;  %v1170_v15 = vld [vmem:[%s1705_s1 + $0x7c] ss:$28 sps:$4 sm:$0xff]  }
   0x4   :  { %745 = vmatprep.subr.bf16.mxu0 %v1140_v2  ;;  %v1158_v8 = vld [vmem:[%s1705_s1 + $0xc] ss:$28 sps:$4 sm:$0xff]   ;;  %v1164_v12 = vld [vmem:[%s1705_s1 + $0x44] ss:$28 sps:$4 sm:$0xff]   ;;  %v1152_v16 = vld [vmem:[%s1705_s1 + $0x11c] ss:$28 sps:$4 sm:$0xff]  }
   0x5   :  { %v1160_v9 = vld [vmem:[%s1705_s1 + $0x8] ss:$28 sps:$4 sm:$0xff]   ;;  %786 = vmatprep.subr.bf16.mxu1 %v1158_v8  ;;  %v1166_v13 = vld [vmem:[%s1705_s1 + $0x40] ss:$28 sps:$4 sm:$0xff]   ;;  %v1172_v17 = vld [vmem:[%s1705_s1 + $0x78] ss:$28 sps:$4 sm:$0xff]  }
   0x6   :  { %v1148_v10 = vld [vmem:[%s1705_s1 + $0xa8] ss:$28 sps:$4 sm:$0xff]   ;;  %787 = vmatpush1.bf16.msra.mxu1 %v1160_v9  ;;  %v1151_v14 = vld [vmem:[%s1705_s1 + $0xe0] ss:$28 sps:$4 sm:$0xff]   ;;  %v1176_v18 = vld [vmem:[%s1705_s1 + $0xb4] ss:$28 sps:$4 sm:$0xff]  }
   0x7   :  { %746 = vmatpush1.bf16.msra.mxu0 %v1142_v3  ;;  %788 = vmatprep.subr.bf16.mxu1 %v1164_v12  ;;  %v1154_v19 = vld [vmem:[%s1705_s1 + $0x118] ss:$28 sps:$4 sm:$0xff]   ;;  %v1178_v21 = vld [vmem:[%s1705_s1 + $0xb0] ss:$28 sps:$4 sm:$0xff]   ;;  %v1184_v25 = vld [vmem:[%s1705_s1 + $0xe8] ss:$28 sps:$4 sm:$0xff]  }
   0x8   :  { %747 = vmatprep.subr.bf16.mxu0 %v1143_v5  ;;  %v1155_v20 = vld [vmem:[%s1705_s1 + $0x154] ss:$28 sps:$4 sm:$0xff]   ;;  %v1182_v22 = vld [vmem:[%s1705_s1 + $0xec] ss:$28 sps:$4 sm:$0xff]   ;;  %v1188_v26 = vld [vmem:[%s1705_s1 + $0x124] ss:$28 sps:$4 sm:$0xff]  }
   0x9   :  { %v1157_v23 = vld [vmem:[%s1705_s1 + $0x150] ss:$28 sps:$4 sm:$0xff]   ;;  %v1163_v27 = vld [vmem:[%s1705_s1 + $0x188] ss:$28 sps:$4 sm:$0xff]   ;;  %v1190_v29 = vld [vmem:[%s1705_s1 + $0x120] ss:$28 sps:$4 sm:$0xff]  }
   0xa   :  { %789 = vmatpush1.bf16.msra.mxu1 %v1166_v13  ;;  %v1161_v24 = vld [vmem:[%s1705_s1 + $0x18c] ss:$28 sps:$4 sm:$0xff]   ;;  %v1167_v28 = vld [vmem:[%s1705_s1 + $0x1c4] ss:$28 sps:$4 sm:$0xff]   ;;  %v1194_v30 = vld [vmem:[%s1705_s1 + $0x15c] ss:$28 sps:$4 sm:$0xff]  }
   0xb   :  { %748 = vmatpush1.bf16.msra.mxu0 %v1145_v6  ;;  %790 = vmatprep.subr.bf16.mxu1 %v1170_v15  ;;  %v1169_v31 = vld [vmem:[%s1705_s1 + $0x1c0] ss:$28 sps:$4 sm:$0xff]   ;;  %v1196_v33 = vld [vmem:[%s1705_s1 + $0x158] ss:$28 sps:$4 sm:$0xff]   ;;  %v1429_v36 = vld [vmem:[%s1706_s0 + $0x4] ss:$8 sps:$4 sm:$0xff]  }
   0xc   :  { %749 = vmatprep.subr.bf16.mxu0 %v1146_v7  ;;  %v1173_v32 = vld [vmem:[%s1705_s1 + $0x1fc] ss:$28 sps:$4 sm:$0xff]   ;;  %v1200_v34 = vld [vmem:[%s1705_s1 + $0x194] ss:$28 sps:$4 sm:$0xff]   ;;  %775 = vmatprep.mubr.bf16.mxu0 %v1429_v36  ;;  %v1206_v39 = vld [vmem:[%s1705_s1 + $0x1cc] ss:$28 sps:$4 sm:$0xff]  }
   0xd   :  { %v1175_v35 = vld [vmem:[%s1705_s1 + $0x1f8] ss:$28 sps:$4 sm:$0xff]   ;;  %v1202_v38 = vld [vmem:[%s1705_s1 + $0x190] ss:$28 sps:$4 sm:$0xff]   ;;  %818 = vmatprep.mubr.bf16.mxu1 %v1429_v36  ;;  %v1208_v42 = vld [vmem:[%s1705_s1 + $0x1c8] ss:$28 sps:$4 sm:$0xff]  }
   0xe   :  { %791 = vmatpush1.bf16.msra.mxu1 %v1172_v17  ;;  %v1179_v37 = vld [vmem:[%s1705_s1 + $0x234] ss:$28 sps:$4 sm:$0xff]   ;;  %v1185_v41 = vld [vmem:[%s1705_s1 + $0x26c] ss:$28 sps:$4 sm:$0xff]   ;;  %v1212_v43 = vld [vmem:[%s1705_s1 + $0x204] ss:$28 sps:$4 sm:$0xff]  }
   0xf   :  { %750 = vmatpush1.bf16.msra.mxu0 %v1148_v10  ;;  %792 = vmatprep.subr.bf16.mxu1 %v1176_v18  ;;  %v1181_v40 = vld [vmem:[%s1705_s1 + $0x230] ss:$28 sps:$4 sm:$0xff]   ;;  %v1187_v44 = vld [vmem:[%s1705_s1 + $0x268] ss:$28 sps:$4 sm:$0xff]   ;;  %v1216_v46 = vld [vmem:[%s1705_s1 + $0x200] ss:$28 sps:$4 sm:$0xff]  }
  0x10   :  { %751 = vmatprep.subr.bf16.mxu0 %v1149_v11  ;;  %v1191_v45 = vld [vmem:[%s1705_s1 + $0x2a4] ss:$28 sps:$4 sm:$0xff]   ;;  %v1221_v47 = vld [vmem:[%s1705_s1 + $0x23c] ss:$28 sps:$4 sm:$0xff]   ;;  %v1227_v51 = vld [vmem:[%s1705_s1 + $0x274] ss:$28 sps:$4 sm:$0xff]  }
  0x11   :  { %v1193_v48 = vld [vmem:[%s1705_s1 + $0x2a0] ss:$28 sps:$4 sm:$0xff]   ;;  %v1223_v50 = vld [vmem:[%s1705_s1 + $0x238] ss:$28 sps:$4 sm:$0xff]   ;;  %v1229_v54 = vld [vmem:[%s1705_s1 + $0x270] ss:$28 sps:$4 sm:$0xff]  }
  0x12   :  { %793 = vmatpush1.bf16.msra.mxu1 %v1178_v21  ;;  %v1197_v49 = vld [vmem:[%s1705_s1 + $0x2dc] ss:$28 sps:$4 sm:$0xff]   ;;  %v1203_v53 = vld [vmem:[%s1705_s1 + $0x314] ss:$28 sps:$4 sm:$0xff]   ;;  %v1233_v55 = vld [vmem:[%s1705_s1 + $0x2ac] ss:$28 sps:$4 sm:$0xff]  }
  0x13   :  { %752 = vmatpush1.bf16.msra.mxu0 %v1151_v14  ;;  %794 = vmatprep.subr.bf16.mxu1 %v1182_v22  ;;  %v1199_v52 = vld [vmem:[%s1705_s1 + $0x2d8] ss:$28 sps:$4 sm:$0xff]   ;;  %v1205_v56 = vld [vmem:[%s1705_s1 + $0x310] ss:$28 sps:$4 sm:$0xff]   ;;  %v1235_v58 = vld [vmem:[%s1705_s1 + $0x2a8] ss:$28 sps:$4 sm:$0xff]  }
  0x14   :  { %753 = vmatprep.subr.bf16.mxu0 %v1152_v16  ;;  %v1209_v57 = vld [vmem:[%s1705_s1 + $0x34c] ss:$28 sps:$4 sm:$0xff]   ;;  %v1239_v59 = vld [vmem:[%s1705_s1 + $0x2e4] ss:$28 sps:$4 sm:$0xff]   ;;  %v1220_v62 = vld [vmem:[%s1705_s1 + $0x14] ss:$28 sps:$4 sm:$0xff]  }
  0x15   :  { %v1211_v60 = vld [vmem:[%s1705_s1 + $0x348] ss:$28 sps:$4 sm:$0xff]   ;;  %v1241_v63 = vld [vmem:[%s1705_s1 + $0x2e0] ss:$28 sps:$4 sm:$0xff]   ;;  %v1218_v1 = vld [vmem:[%s1705_s1 + $0x10] ss:$28 sps:$4 sm:$0xff]  }
  0x16   :  { %795 = vmatpush1.bf16.msra.mxu1 %v1184_v25  ;;  %v1508_v61 = vld [vmem:[%s1706_s0] ss:$8 sps:$4 sm:$0xff]   ;;  %v1245_v0 = vld [vmem:[%s1705_s1 + $0x31c] ss:$28 sps:$4 sm:$0xff]   ;;  %v1251_v4 = vld [vmem:[%s1705_s1 + $0x354] ss:$28 sps:$4 sm:$0xff]  }
  0x17   :  { %754 = vmatpush1.bf16.msra.mxu0 %v1154_v19  ;;  %796 = vmatprep.subr.bf16.mxu1 %v1188_v26  ;;  %v1226_v2 = vld [vmem:[%s1705_s1 + $0x4c] ss:$28 sps:$4 sm:$0xff]   ;;  %v1247_v3 = vld [vmem:[%s1705_s1 + $0x318] ss:$28 sps:$4 sm:$0xff]   ;;  %v1232_v6 = vld [vmem:[%s1705_s1 + $0x84] ss:$28 sps:$4 sm:$0xff]  }
  0x18   :  { %755 = vmatprep.subr.bf16.mxu0 %v1155_v20  ;;  %v1224_v5 = vld [vmem:[%s1705_s1 + $0x48] ss:$28 sps:$4 sm:$0xff]   ;;  %v1253_v7 = vld [vmem:[%s1705_s1 + $0x350] ss:$28 sps:$4 sm:$0xff]   ;;  %v1257_v8 = vld [vmem:[%s1705_s1 + $0x1d8] ss:$28 sps:$4 sm:$0xff]  }
  0x19   :  { %v1230_v9 = vld [vmem:[%s1705_s1 + $0x80] ss:$28 sps:$4 sm:$0xff]   ;;  %v1258_v11 = vld [vmem:[%s1705_s1 + $0x18] ss:$28 sps:$4 sm:$0xff]   ;;  %v1262_v12 = vld [vmem:[%s1705_s1 + $0x210] ss:$28 sps:$4 sm:$0xff]  }
  0x1a   :  { %797 = vmatpush1.bf16.msra.mxu1 %v1190_v29  ;;  %v1238_v10 = vld [vmem:[%s1705_s1 + $0xbc] ss:$28 sps:$4 sm:$0xff]   ;;  %v1244_v14 = vld [vmem:[%s1705_s1 + $0xf4] ss:$28 sps:$4 sm:$0xff]   ;;  %v1267_v16 = vld [vmem:[%s1705_s1 + $0x248] ss:$28 sps:$4 sm:$0xff]  }
  0x1b   :  { %756 = vmatpush1.bf16.msra.mxu0 %v1157_v23  ;;  %798 = vmatprep.subr.bf16.mxu1 %v1194_v30  ;;  %v1236_v13 = vld [vmem:[%s1705_s1 + $0xb8] ss:$28 sps:$4 sm:$0xff]   ;;  %v1263_v15 = vld [vmem:[%s1705_s1 + $0x50] ss:$28 sps:$4 sm:$0xff]   ;;  %v1268_v19 = vld [vmem:[%s1705_s1 + $0x88] ss:$28 sps:$4 sm:$0xff]  }
  0x1c   :  { %757 = vmatprep.subr.bf16.mxu0 %v1161_v24  ;;  %v1242_v17 = vld [vmem:[%s1705_s1 + $0xf0] ss:$28 sps:$4 sm:$0xff]   ;;  %v145_v20 = vld [vmem:[%s1707_s2] sm:$0xff]  ;;  %v1277_v26 = vld [vmem:[%s1705_s1 + $0x2b8] ss:$28 sps:$4 sm:$0xff]  }
  0x1d   :  { %v1250_v18 = vld [vmem:[%s1705_s1 + $0x12c] ss:$28 sps:$4 sm:$0xff]   ;;  %v1272_v21 = vld [vmem:[%s1705_s1 + $0x280] ss:$28 sps:$4 sm:$0xff]   ;;  %149 = vperm.xlu0 %1136, %v145_v20   ;;  %v1278_v29 = vld [vmem:[%s1705_s1 + $0xf8] ss:$28 sps:$4 sm:$0xff]  }
  0x1e   :  { %799 = vmatpush1.bf16.msra.mxu1 %v1196_v33  ;;  %v1248_v22 = vld [vmem:[%s1705_s1 + $0x128] ss:$28 sps:$4 sm:$0xff]   ;;  %v1273_v25 = vld [vmem:[%s1705_s1 + $0xc0] ss:$28 sps:$4 sm:$0xff]   ;;  %v1282_v30 = vld [vmem:[%s1705_s1 + $0x2f0] ss:$28 sps:$4 sm:$0xff]  }
  0x1f   :  { %758 = vmatpush1.bf16.msra.mxu0 %v1163_v27  ;;  %800 = vmatprep.subr.bf16.mxu1 %v1200_v34  ;;  %v146_v23 = vld [vmem:[%s1707_s2 + $0x8] sm:$0xff]  ;;  %v1256_v24 = vld [vmem:[%s1705_s1 + $0x164] ss:$28 sps:$4 sm:$0xff]  }
  0x20   :  { %759 = vmatprep.subr.bf16.mxu0 %v1167_v28  ;;  %v1254_v27 = vld [vmem:[%s1705_s1 + $0x160] ss:$28 sps:$4 sm:$0xff]   ;;  %v1283_v33 = vld [vmem:[%s1705_s1 + $0x130] ss:$28 sps:$4 sm:$0xff]   ;;  %v1287_v34 = vld [vmem:[%s1705_s1 + $0x328] ss:$28 sps:$4 sm:$0xff]  }
  0x21   :  { %154 = vperm.xlu0 %1136, %v146_v23   ;;  %v1261_v28 = vld [vmem:[%s1705_s1 + $0x19c] ss:$28 sps:$4 sm:$0xff]  }
  0x22   :  { %801 = vmatpush1.bf16.msra.mxu1 %v1202_v38  ;;  %v1292_v38 = vld [vmem:[%s1705_s1 + $0x360] ss:$28 sps:$4 sm:$0xff]  }
  0x23   :  { %760 = vmatpush1.bf16.msra.mxu0 %v1169_v31  ;;  %802 = vmatprep.subr.bf16.mxu1 %v1206_v39  ;;  %v1259_v31 = vld [vmem:[%s1705_s1 + $0x198] ss:$28 sps:$4 sm:$0xff]   ;;  %v1269_v39 = vld [vmem:[%s1705_s1 + $0x208] ss:$28 sps:$4 sm:$0xff]  }
  0x24   :  { %761 = vmatprep.subr.bf16.mxu0 %v1173_v32  ;;  %v1266_v32 = vld [vmem:[%s1705_s1 + $0x1d4] ss:$28 sps:$4 sm:$0xff]  }
  0x26   :  { %803 = vmatpush1.bf16.msra.mxu1 %v1208_v42  ;;  %v1274_v42 = vld [vmem:[%s1705_s1 + $0x240] ss:$28 sps:$4 sm:$0xff]  }
  0x27   :  { %762 = vmatpush1.bf16.msra.mxu0 %v1175_v35  ;;  %804 = vmatprep.subr.bf16.mxu1 %v1212_v43  ;;  %v1264_v35 = vld [vmem:[%s1705_s1 + $0x1d0] ss:$28 sps:$4 sm:$0xff]   ;;  %v1281_v43 = vld [vmem:[%s1705_s1 + $0x27c] ss:$28 sps:$4 sm:$0xff]  }
  0x28   :  { %763 = vmatprep.subr.bf16.mxu0 %v1179_v37  ;;  %v1288_v37 = vld [vmem:[%s1705_s1 + $0x168] ss:$28 sps:$4 sm:$0xff]  }
  0x2a   :  { %805 = vmatpush1.bf16.msra.mxu1 %v1216_v46  ;;  %v1284_v46 = vld [vmem:[%s1705_s1 + $0x2b0] ss:$28 sps:$4 sm:$0xff]  }
  0x2b   :  { %764 = vmatpush1.bf16.msra.mxu0 %v1181_v40  ;;  %806 = vmatprep.subr.bf16.mxu1 %v1221_v47  ;;  %v1276_v40 = vld [vmem:[%s1705_s1 + $0x244] ss:$28 sps:$4 sm:$0xff]   ;;  %v1291_v47 = vld [vmem:[%s1705_s1 + $0x2ec] ss:$28 sps:$4 sm:$0xff]  }
  0x2c   :  { %765 = vmatprep.subr.bf16.mxu0 %v1185_v41  ;;  %v1293_v41 = vld [vmem:[%s1705_s1 + $0x1a0] ss:$28 sps:$4 sm:$0xff]  }
  0x2e   :  { %807 = vmatpush1.bf16.msra.mxu1 %v1223_v50  ;;  %v1294_v50 = vld [vmem:[%s1705_s1 + $0x320] ss:$28 sps:$4 sm:$0xff]  }
  0x2f   :  { %766 = vmatpush1.bf16.msra.mxu0 %v1187_v44  ;;  %808 = vmatprep.subr.bf16.mxu1 %v1227_v51  ;;  %v1279_v44 = vld [vmem:[%s1705_s1 + $0x278] ss:$28 sps:$4 sm:$0xff]  }
  0x30   :  { %767 = vmatprep.subr.bf16.mxu0 %v1191_v45  ;;  %v1286_v45 = vld [vmem:[%s1705_s1 + $0x2b4] ss:$28 sps:$4 sm:$0xff]   ;;  %v1299_v51 = vld [vmem:[%s1705_s1 + $0x35c] ss:$28 sps:$4 sm:$0xff]  }
  0x32   :  { %809 = vmatpush1.bf16.msra.mxu1 %v1229_v54 }
  0x33   :  { %768 = vmatpush1.bf16.msra.mxu0 %v1193_v48  ;;  %810 = vmatprep.subr.bf16.mxu1 %v1233_v55  ;;  %v1289_v48 = vld [vmem:[%s1705_s1 + $0x2e8] ss:$28 sps:$4 sm:$0xff]  }
  0x34   :  { %769 = vmatprep.subr.bf16.mxu0 %v1197_v49  ;;  %v1296_v49 = vld [vmem:[%s1705_s1 + $0x324] ss:$28 sps:$4 sm:$0xff]  }
  0x36   :  { %811 = vmatpush1.bf16.msra.mxu1 %v1235_v58 }
  0x37   :  { %770 = vmatpush1.bf16.msra.mxu0 %v1199_v52  ;;  %812 = vmatprep.subr.bf16.mxu1 %v1239_v59  ;;  %v1297_v52 = vld [vmem:[%s1705_s1 + $0x358] ss:$28 sps:$4 sm:$0xff]  }
  0x38   :  { %771 = vmatprep.subr.bf16.mxu0 %v1203_v53 }
  0x3a   :  { %813 = vmatpush1.bf16.msra.mxu1 %v1241_v63 }
  0x3b   :  { %772 = vmatpush1.bf16.msra.mxu0 %v1205_v56  ;;  %814 = vmatprep.subr.bf16.mxu1 %v1245_v0 }
  0x3c   :  { %773 = vmatprep.subr.bf16.mxu0 %v1209_v57 }
  0x3e   :  { %815 = vmatpush1.bf16.msra.mxu1 %v1247_v3 }
  0x3f   :  { %774 = vmatpush1.bf16.msra.mxu0 %v1211_v60  ;;  %816 = vmatprep.subr.bf16.mxu1 %v1251_v4 }
  0x40   :  { %829 = vmatprep.subr.bf16.mxu0 %v1220_v62 }
  0x42   :  { %776 = vmatmul.mubr.bf16.vlgmr.msra.gmra.mrb[0].mxu0 %v1508_v61  ;;  %817 = vmatpush1.bf16.msra.mxu1 %v1253_v7 }
  0x43   :  { %830 = vmatpush1.bf16.msra.mxu0 %v1218_v1  ;;  %861 = vmatprep.mubr.bf16.mxu0 %v1429_v36 }
  0x44   :  { %831 = vmatprep.subr.bf16.mxu0 %v1226_v2  ;;  %1113 = vmatprep.subr.bf16.mxu1 %v1257_v8 }
  0x45   :  { %819 = vmatmul.mubr.bf16.vlgmr.msra.gmra.mrb[0].mxu1 %v1508_v61 }
  0x46   :  { %1114 = vmatpush3.bf16.msra.mxu1 %v1258_v11  ;;  %904 = vmatprep.mubr.bf16.mxu1 %v1429_v36  ;;  %v1271_v36 = vld [vmem:[%s1705_s1 + $0x20c] ss:$28 sps:$4 sm:$0xff]  }
  0x47   :  { %832 = vmatpush1.bf16.msra.mxu0 %v1224_v5  ;;  %1115 = vmatprep.subr.bf16.mxu1 %v1262_v12 }
  0x48   :  { %833 = vmatprep.subr.bf16.mxu0 %v1232_v6 }
  0x4a   :  { %1116 = vmatpush3.bf16.msra.mxu1 %v1263_v15 }
  0x4b   :  { %834 = vmatpush1.bf16.msra.mxu0 %v1230_v9  ;;  %1117 = vmatprep.subr.bf16.mxu1 %v1267_v16 }
  0x4c   :  { %835 = vmatprep.subr.bf16.mxu0 %v1238_v10 }
  0x4e   :  { %1118 = vmatpush3.bf16.msra.mxu1 %v1268_v19 }
  0x4f   :  { %836 = vmatpush1.bf16.msra.mxu0 %v1236_v13  ;;  %1119 = vmatprep.subr.bf16.mxu1 %v1272_v21 }
  0x50   :  { %837 = vmatprep.subr.bf16.mxu0 %v1244_v14 }
  0x52   :  { %1120 = vmatpush3.bf16.msra.mxu1 %v1273_v25 }
  0x53   :  { %838 = vmatpush1.bf16.msra.mxu0 %v1242_v17  ;;  %1121 = vmatprep.subr.bf16.mxu1 %v1277_v26 }
  0x54   :  { %839 = vmatprep.subr.bf16.mxu0 %v1250_v18 }
  0x56   :  { %1122 = vmatpush3.bf16.msra.mxu1 %v1278_v29 }
  0x57   :  { %840 = vmatpush1.bf16.msra.mxu0 %v1248_v22  ;;  %1123 = vmatprep.subr.bf16.mxu1 %v1282_v30 }
  0x58   :  { %841 = vmatprep.subr.bf16.mxu0 %v1256_v24 }
  0x5a   :  { %1124 = vmatpush3.bf16.msra.mxu1 %v1283_v33 }
  0x5b   :  { %842 = vmatpush1.bf16.msra.mxu0 %v1254_v27  ;;  %1125 = vmatprep.subr.bf16.mxu1 %v1287_v34 }
  0x5c   :  { %843 = vmatprep.subr.bf16.mxu0 %v1261_v28 }
  0x5e   :  { %1126 = vmatpush3.bf16.msra.mxu1 %v1288_v37 }
  0x5f   :  { %844 = vmatpush1.bf16.msra.mxu0 %v1259_v31  ;;  %1127 = vmatprep.subr.bf16.mxu1 %v1292_v38 }
  0x60   :  { %845 = vmatprep.subr.bf16.mxu0 %v1266_v32 }
  0x62   :  { %1128 = vmatpush3.bf16.msra.mxu1 %v1293_v41 }
  0x63   :  { %846 = vmatpush1.bf16.msra.mxu0 %v1264_v35 }
  0x64   :  { %847 = vmatprep.subr.bf16.mxu0 %v1271_v36 }
  0x65   :  { %905 = vmatmul.mubr.bf16.vlgmr.msra.gmra.mrb[4].mxu1 %v1508_v61 }
  0x67   :  { %848 = vmatpush1.bf16.msra.mxu0 %v1269_v39 }
  0x68   :  { %849 = vmatprep.subr.bf16.mxu0 %v1276_v40 }
  0x6b   :  { %850 = vmatpush1.bf16.msra.mxu0 %v1274_v42 }
  0x6c   :  { %851 = vmatprep.subr.bf16.mxu0 %v1281_v43 }
  0x6f   :  { %852 = vmatpush1.bf16.msra.mxu0 %v1279_v44 }
  0x70   :  { %853 = vmatprep.subr.bf16.mxu0 %v1286_v45 }
  0x73   :  { %854 = vmatpush1.bf16.msra.mxu0 %v1284_v46 }
  0x74   :  { %855 = vmatprep.subr.bf16.mxu0 %v1291_v47 }
  0x77   :  { %856 = vmatpush1.bf16.msra.mxu0 %v1289_v48 }
  0x78   :  { %857 = vmatprep.subr.bf16.mxu0 %v1296_v49 }
  0x7b   :  { %858 = vmatpush1.bf16.msra.mxu0 %v1294_v50 }
  0x7c   :  { %859 = vmatprep.subr.bf16.mxu0 %v1299_v51 }
  0x7f   :  { %860 = vmatpush1.bf16.msra.mxu0 %v1297_v52 }
  0x82   :  { %862 = vmatmul.mubr.bf16.vlgmr.msra.gmra.mrb[4].mxu0 %v1508_v61 }
  0x9c   :  { %v150_v53 = vpop.permute.xlu0 %149 }
  0xa0   :  { %v155_v55 = vpop.permute.xlu0 %154 }
 0x115   :  { %v777_v54 = vpop.f32.mrb[0].mxu0 }
 0x116   :  { %v778_v56 = vadd.f32 %v777_v54, %v150_v53  ;;  %v779_v57 = vpop.f32.mrb[1].mxu0 }
 0x117   :  { %v780_v58 = vadd.f32 %v779_v57, %v150_v53  ;;  %v781_v59 = vpop.f32.mrb[2].mxu0 }
 0x118   :  { %v913_v60 = vmax.f32 %v778_v56, 0.0  ;;  %v782_v62 = vadd.f32 %v781_v59, %v155_v55  ;;  %v783_v63 = vpop.f32.mrb[3].mxu0  ;;  %v820_v5 = vpop.f32.mrb[0].mxu1 }
 0x119   :  { %v914_v0 = vmax.f32 %v780_v58, 0.0  ;;  %v784_v1 = vadd.f32 %v783_v63, %v155_v55  ;;  %v821_v6 = vadd.f32 %v820_v5, %v150_v53  ;;  %v822_v7 = vpop.f32.mrb[1].mxu1 }
 0x11a   :  { %v920_v2 = vmax.f32 %v782_v62, 0.0  ;;  %v823_v8 = vadd.f32 %v822_v7, %v150_v53  ;;  %v824_v9 = vpop.f32.mrb[2].mxu1 }
 0x11b   :  { %v1105_v3 = vpack.c.bf16 %v914_v0, %v913_v60  ;;  %v921_v4 = vmax.f32 %v784_v1, 0.0  ;;  %v915_v10 = vmax.f32 %v821_v6, 0.0  ;;  %v825_v11 = vadd.f32 %v824_v9, %v155_v55  ;;  %v826_v12 = vpop.f32.mrb[3].mxu1 }
 0x11c   :  { %v916_v13 = vmax.f32 %v823_v8, 0.0  ;;  %v827_v14 = vadd.f32 %v826_v12, %v155_v55 }
 0x11d   :  { %971 = vst [vmem:[%s1708_s3] sm:$0xff] %v1105_v3  ;;  %v1109_v61 = vpack.c.bf16 %v921_v4, %v920_v2  ;;  %v922_v15 = vmax.f32 %v825_v11, 0.0 }
 0x11e   :  { %v1106_v16 = vpack.c.bf16 %v916_v13, %v915_v10  ;;  %v923_v17 = vmax.f32 %v827_v14, 0.0 }
 0x11f   :  { %975 = vst [vmem:[%s1708_s3 + $0x1c] sm:$0xff] %v1109_v61 }
 0x120   :  { %972 = vst [vmem:[%s1708_s3 + $0x8] sm:$0xff] %v1106_v16  ;;  %v1110_v18 = vpack.c.bf16 %v923_v17, %v922_v15 }
 0x122   :  { %976 = vst [vmem:[%s1708_s3 + $0x24] sm:$0xff] %v1110_v18 }
 0x138   :  { %v1129_v19 = vpop.f32.mrb[4].mxu1 }
 0x139   :  { %v1130_v20 = vpop.f32.mrb[5].mxu1 }
 0x13a   :  { %v1131_v21 = vadd.f32 %v1130_v20, %v1129_v19  ;;  %v1132_v22 = vpop.f32.mrb[6].mxu1 }
 0x13b   :  { %v1133_v23 = vpop.f32.mrb[7].mxu1 }
 0x13c   :  { %v907_v24 = vadd.f32 %v1131_v21, %v150_v53  ;;  %v1134_v25 = vadd.f32 %v1133_v23, %v1132_v22 }
 0x13e   :  { %v919_v26 = vmax.f32 %v907_v24, 0.0  ;;  %v910_v27 = vadd.f32 %v1134_v25, %v155_v55 }
 0x140   :  { %v1108_v28 = vpack.c.bf16 %v919_v26, %v919_v26  ;;  %v926_v29 = vmax.f32 %v910_v27, 0.0 }
 0x142   :  { %974 = vst [vmem:[%s1708_s3 + $0x18] sm:$0xf] %v1108_v28  ;;  %v1112_v30 = vpack.c.bf16 %v926_v29, %v926_v29 }
 0x144   :  { %978 = vst [vmem:[%s1708_s3 + $0x34] sm:$0xf] %v1112_v30 }
 0x155   :  { %v863_v31 = vpop.f32.mrb[4].mxu0 }
 0x156   :  { %v864_v32 = vadd.f32 %v863_v31, %v150_v53  ;;  %v865_v33 = vpop.f32.mrb[5].mxu0 }
 0x157   :  { %v866_v34 = vadd.f32 %v865_v33, %v150_v53  ;;  %v867_v35 = vpop.f32.mrb[6].mxu0 }
 0x158   :  { %v917_v36 = vmax.f32 %v864_v32, 0.0  ;;  %v868_v37 = vadd.f32 %v867_v35, %v155_v55  ;;  %v869_v38 = vpop.f32.mrb[7].mxu0 }
 0x159   :  { %v918_v39 = vmax.f32 %v866_v34, 0.0  ;;  %v870_v40 = vadd.f32 %v869_v38, %v155_v55 }
 0x15a   :  { %v924_v41 = vmax.f32 %v868_v37, 0.0 }
 0x15b   :  { %v1107_v42 = vpack.c.bf16 %v918_v39, %v917_v36  ;;  %v925_v43 = vmax.f32 %v870_v40, 0.0 }
 0x15d   :  { %973 = vst [vmem:[%s1708_s3 + $0x10] sm:$0xff] %v1107_v42  ;;  %v1111_v44 = vpack.c.bf16 %v925_v43, %v924_v41 }
 0x15f   :  { %977 = vst [vmem:[%s1708_s3 + $0x2c] sm:$0xff] %v1111_v44 }

// kernel: vae_forward.7
= control target key start
LH: loop header
LB: loop body
LE: loop exit
PB: predicated region body
PF: predicated region fallthrough
CT: control target
= control target key end

     0   :  { %v244_v1 = vmov 0   ;;  %s328_s1 = inlined_call_operand.vmem [shape: bf16[128,256], index: 1, kind: input, shape index: {}]   ;;  %s329_s2 = inlined_call_operand.vmem [shape: f32[16,1], index: 2, kind: input, shape index: {}]   ;;  %s330_s0 = inlined_call_operand.vmem [shape: bf16[16,128], index: 0, kind: input, shape index: {}]   ;;  %s331_s3 = inlined_call_operand.vmem [shape: bf16[16,256], index: 3, kind: output, shape index: {}]  }
   0x1   :  { %v219_v0 = vld [vmem:[%s328_s1 + $0x4] ss:$8 sps:$4 sm:$0xff]   ;;  %163 = vmatprep.mubr.bf16.mxu0 %v244_v1  ;;  %218 = vset.pattern.permute.xlu0 %v244_v1  ;;  %v221_v2 = vld [vmem:[%s328_s1] ss:$8 sps:$4 sm:$0xff]   ;;  %v222_v3 = vld [vmem:[%s328_s1 + $0x14] ss:$8 sps:$4 sm:$0xff]  }
   0x2   :  { %131 = vmatprep.subr.bf16.mxu0 %v219_v0  ;;  %v224_v4 = vld [vmem:[%s328_s1 + $0x10] ss:$8 sps:$4 sm:$0xff]   ;;  %v225_v5 = vld [vmem:[%s328_s1 + $0x24] ss:$8 sps:$4 sm:$0xff]   ;;  %v227_v6 = vld [vmem:[%s328_s1 + $0x20] ss:$8 sps:$4 sm:$0xff]  }
   0x3   :  { %132 = vmatpush1.bf16.msra.mxu0 %v221_v2  ;;  %v228_v7 = vld [vmem:[%s328_s1 + $0x34] ss:$8 sps:$4 sm:$0xff]   ;;  %v230_v8 = vld [vmem:[%s328_s1 + $0x30] ss:$8 sps:$4 sm:$0xff]   ;;  %v33_v9 = vld [vmem:[%s329_s2] sm:$0xff] }
   0x4   :  { %133 = vmatprep.subr.bf16.mxu0 %v222_v3  ;;  %v231_v10 = vld [vmem:[%s328_s1 + $0x44] ss:$8 sps:$4 sm:$0xff]   ;;  %37 = vperm.xlu0 %218, %v33_v9   ;;  %v233_v12 = vld [vmem:[%s328_s1 + $0x40] ss:$8 sps:$4 sm:$0xff]   ;;  %v234_v13 = vld [vmem:[%s328_s1 + $0x54] ss:$8 sps:$4 sm:$0xff]  }
   0x5   :  { %v34_v11 = vld [vmem:[%s329_s2 + $0x8] sm:$0xff]  ;;  %v236_v14 = vld [vmem:[%s328_s1 + $0x50] ss:$8 sps:$4 sm:$0xff]   ;;  %v240_v17 = vld [vmem:[%s328_s1 + $0x74] ss:$8 sps:$4 sm:$0xff]  }
   0x6   :  { %v237_v15 = vld [vmem:[%s328_s1 + $0x64] ss:$8 sps:$4 sm:$0xff]   ;;  %v239_v16 = vld [vmem:[%s328_s1 + $0x60] ss:$8 sps:$4 sm:$0xff]   ;;  %v242_v18 = vld [vmem:[%s328_s1 + $0x70] ss:$8 sps:$4 sm:$0xff]  }
   0x7   :  { %134 = vmatpush1.bf16.msra.mxu0 %v224_v4  ;;  %v243_v19 = vld [vmem:[%s330_s0] sm:$0xff]  }
   0x8   :  { %135 = vmatprep.subr.bf16.mxu0 %v225_v5  ;;  %42 = vperm.xlu0 %218, %v34_v11  }
   0xb   :  { %136 = vmatpush1.bf16.msra.mxu0 %v227_v6 }
   0xc   :  { %137 = vmatprep.subr.bf16.mxu0 %v228_v7 }
   0xf   :  { %138 = vmatpush1.bf16.msra.mxu0 %v230_v8 }
  0x10   :  { %139 = vmatprep.subr.bf16.mxu0 %v231_v10 }
  0x13   :  { %140 = vmatpush1.bf16.msra.mxu0 %v233_v12 }
  0x14   :  { %141 = vmatprep.subr.bf16.mxu0 %v234_v13 }
  0x17   :  { %142 = vmatpush1.bf16.msra.mxu0 %v236_v14 }
  0x18   :  { %143 = vmatprep.subr.bf16.mxu0 %v237_v15 }
  0x1b   :  { %144 = vmatpush1.bf16.msra.mxu0 %v239_v16 }
  0x1c   :  { %145 = vmatprep.subr.bf16.mxu0 %v240_v17 }
  0x1f   :  { %146 = vmatpush1.bf16.msra.mxu0 %v242_v18 }
  0x22   :  { %164 = vmatmul.mubr.bf16.vlgmr.msra.gmra.mrb[0].mxu0 %v243_v19 }
  0x83   :  { %v38_v20 = vpop.permute.xlu0 %37 }
  0x87   :  { %v43_v24 = vpop.permute.xlu0 %42 }
  0xf5   :  { %v165_v21 = vpop.f32.mrb[0].mxu0 }
  0xf6   :  { %v166_v22 = vadd.f32 %v165_v21, %v38_v20  ;;  %v167_v23 = vpop.f32.mrb[1].mxu0 }
  0xf7   :  { %v168_v25 = vadd.f32 %v167_v23, %v38_v20  ;;  %v169_v26 = vpop.f32.mrb[2].mxu0 }
  0xf8   :  { %v174_v27 = vmax.f32 %v166_v22, 0.0  ;;  %v170_v28 = vadd.f32 %v169_v26, %v43_v24  ;;  %v171_v29 = vpop.f32.mrb[3].mxu0 }
  0xf9   :  { %v175_v30 = vmax.f32 %v168_v25, 0.0  ;;  %v172_v31 = vadd.f32 %v171_v29, %v43_v24 }
  0xfa   :  { %v176_v32 = vmax.f32 %v170_v28, 0.0 }
  0xfb   :  { %v215_v33 = vpack.c.bf16 %v175_v30, %v174_v27  ;;  %v177_v34 = vmax.f32 %v172_v31, 0.0 }
  0xfd   :  { %190 = vst [vmem:[%s331_s3] sm:$0xff] %v215_v33  ;;  %v216_v35 = vpack.c.bf16 %v177_v34, %v176_v32 }
  0xff   :  { %191 = vst [vmem:[%s331_s3 + $0x8] sm:$0xff] %v216_v35 }

// kernel: vae_forward.8
= control target key start
LH: loop header
LB: loop body
LE: loop exit
PB: predicated region body
PF: predicated region fallthrough
CT: control target
= control target key end

     0   :  { %s6351_s1 = inlined_call_operand.vmem [shape: bf16[1024,128], index: 1, kind: input, shape index: {}]   ;;  %s6352_s0 = inlined_call_operand.vmem [shape: bf16[16,1024], index: 0, kind: input, shape index: {}]   ;;  %s6353_s3 = inlined_call_operand.vmem [shape: bf16[128,1024], index: 3, kind: input, shape index: {}]   ;;  %s6354_s5 = inlined_call_operand.vmem [shape: bf16[512,1152], index: 5, kind: input, shape index: {}]   ;;  %s6355_s2 = inlined_call_operand.vmem [shape: f32[1,128], index: 2, kind: input, shape index: {}]   ;;  %s6356_s4 = inlined_call_operand.vmem [shape: f32[1,1024], index: 4, kind: input, shape index: {}]   ;;  %s6357_s7 = inlined_call_operand.vmem [shape: f32[16,512], index: 7, kind: output, shape index: {0}]   ;;  %s6358_s8 = inlined_call_operand.vmem [shape: f32[16,512], index: 8, kind: output, shape index: {1}]   ;;  %s6359_s6 = inlined_call_operand.vmem [shape: f32[1,1152], index: 6, kind: input, shape index: {}]   ;;  %s6360_s9 = inlined_call_operand.vmem [shape: bf16[16,1152], index: 9, kind: output, shape index: {2}]  }
   0x1   :  { %v4356_v0 = vld [vmem:[%s6351_s1 + $0x40] sm:$0xff]   ;;  %v4360_v4 = vld [vmem:[%s6351_s1 + $0x48] sm:$0xff]   ;;  %v4364_v8 = vld [vmem:[%s6351_s1 + $0x50] sm:$0xff]  }
   0x2   :  { %v4357_v1 = vld [vmem:[%s6351_s1 + $0xc0] sm:$0xff]   ;;  %4191 = vmatprep.subr.bf16.mxu0 %v4356_v0  ;;  %v4361_v5 = vld [vmem:[%s6351_s1 + $0xc8] sm:$0xff]   ;;  %v4365_v9 = vld [vmem:[%s6351_s1 + $0xd0] sm:$0xff]  }
   0x3   :  { %v4358_v2 = vld [vmem:[%s6351_s1] sm:$0xff]   ;;  %4213 = vmatprep.subr.bf16.mxu1 %v4357_v1  ;;  %v4362_v6 = vld [vmem:[%s6351_s1 + $0x8] sm:$0xff]   ;;  %v4366_v10 = vld [vmem:[%s6351_s1 + $0x10] sm:$0xff]  }
   0x4   :  { %v4359_v3 = vld [vmem:[%s6351_s1 + $0x80] sm:$0xff]   ;;  %4192 = vmatpush3.bf16.msra.mxu0 %v4358_v2  ;;  %v4363_v7 = vld [vmem:[%s6351_s1 + $0x88] sm:$0xff]   ;;  %v4367_v11 = vld [vmem:[%s6351_s1 + $0x90] sm:$0xff]  }
   0x5   :  { %4214 = vmatpush3.bf16.msra.mxu1 %v4359_v3  ;;  %4193 = vmatprep.subr.bf16.mxu0 %v4360_v4  ;;  %v4368_v12 = vld [vmem:[%s6351_s1 + $0x58] sm:$0xff]   ;;  %v4372_v16 = vld [vmem:[%s6351_s1 + $0x60] sm:$0xff]   ;;  %v4376_v20 = vld [vmem:[%s6351_s1 + $0x68] sm:$0xff]  }
   0x6   :  { %4215 = vmatprep.subr.bf16.mxu1 %v4361_v5  ;;  %v4369_v13 = vld [vmem:[%s6351_s1 + $0xd8] sm:$0xff]   ;;  %v4373_v17 = vld [vmem:[%s6351_s1 + $0xe0] sm:$0xff]   ;;  %v4377_v21 = vld [vmem:[%s6351_s1 + $0xe8] sm:$0xff]  }
   0x7   :  { %v4370_v14 = vld [vmem:[%s6351_s1 + $0x18] sm:$0xff]   ;;  %v4374_v18 = vld [vmem:[%s6351_s1 + $0x20] sm:$0xff]   ;;  %v4378_v22 = vld [vmem:[%s6351_s1 + $0x28] sm:$0xff]  }
   0x8   :  { %4194 = vmatpush3.bf16.msra.mxu0 %v4362_v6  ;;  %v4371_v15 = vld [vmem:[%s6351_s1 + $0x98] sm:$0xff]   ;;  %v4375_v19 = vld [vmem:[%s6351_s1 + $0xa0] sm:$0xff]   ;;  %v4379_v23 = vld [vmem:[%s6351_s1 + $0xa8] sm:$0xff]  }
   0x9   :  { %4216 = vmatpush3.bf16.msra.mxu1 %v4363_v7  ;;  %4195 = vmatprep.subr.bf16.mxu0 %v4364_v8  ;;  %v4380_v24 = vld [vmem:[%s6351_s1 + $0x70] sm:$0xff]   ;;  %v4384_v28 = vld [vmem:[%s6351_s1 + $0x78] sm:$0xff]   ;;  %v30_v32 = vld [vmem:[%s6352_s0] sm:$0xff] }
   0xa   :  { %4217 = vmatprep.subr.bf16.mxu1 %v4365_v9  ;;  %v4381_v25 = vld [vmem:[%s6351_s1 + $0xf0] sm:$0xff]   ;;  %v4385_v29 = vld [vmem:[%s6351_s1 + $0xf8] sm:$0xff]   ;;  %v34_v33 = vld [vmem:[%s6352_s0 + $0x20] sm:$0xff] }
   0xb   :  { %v4382_v26 = vld [vmem:[%s6351_s1 + $0x30] sm:$0xff]   ;;  %v4386_v30 = vld [vmem:[%s6351_s1 + $0x38] sm:$0xff]   ;;  %v31_v34 = vld [vmem:[%s6352_s0 + $0x8] sm:$0xff]  ;;  %v3746_v35 = vcombine.low %v30_v32, %v34_v33  ;;  %v3747_v36 = vcombine.high %v30_v32, %v34_v33 }
   0xc   :  { %4196 = vmatpush3.bf16.msra.mxu0 %v4366_v10  ;;  %v4383_v27 = vld [vmem:[%s6351_s1 + $0xb0] sm:$0xff]   ;;  %v4387_v31 = vld [vmem:[%s6351_s1 + $0xb8] sm:$0xff]   ;;  %v35_v37 = vld [vmem:[%s6352_s0 + $0x28] sm:$0xff] }
   0xd   :  { %4218 = vmatpush3.bf16.msra.mxu1 %v4367_v11  ;;  %4197 = vmatprep.subr.bf16.mxu0 %v4368_v12  ;;  %v3748_v38 = vcombine.low %v31_v34, %v35_v37  ;;  %v3749_v39 = vcombine.high %v31_v34, %v35_v37  ;;  %v4388_v40 = vld [vmem:[%s6351_s1 + $0x140] sm:$0xff]   ;;  %v4392_v44 = vld [vmem:[%s6351_s1 + $0x148] sm:$0xff]   ;;  %v4396_v48 = vld [vmem:[%s6351_s1 + $0x150] sm:$0xff]  }
   0xe   :  { %4219 = vmatprep.subr.bf16.mxu1 %v4369_v13  ;;  %629 = vmatprep.mubr.bf16.mxu0 %v3747_v36  ;;  %v4389_v41 = vld [vmem:[%s6351_s1 + $0x1c0] sm:$0xff]   ;;  %v4393_v45 = vld [vmem:[%s6351_s1 + $0x1c8] sm:$0xff]   ;;  %v4397_v49 = vld [vmem:[%s6351_s1 + $0x1d0] sm:$0xff]  }
   0xf   :  { %670 = vmatprep.mubr.bf16.mxu1 %v3749_v39  ;;  %v4390_v42 = vld [vmem:[%s6351_s1 + $0x100] sm:$0xff]   ;;  %v4394_v46 = vld [vmem:[%s6351_s1 + $0x108] sm:$0xff]   ;;  %v4398_v50 = vld [vmem:[%s6351_s1 + $0x110] sm:$0xff]  }
  0x10   :  { %4198 = vmatpush3.bf16.msra.mxu0 %v4370_v14  ;;  %v4391_v43 = vld [vmem:[%s6351_s1 + $0x180] sm:$0xff]   ;;  %v4395_v47 = vld [vmem:[%s6351_s1 + $0x188] sm:$0xff]   ;;  %v4399_v51 = vld [vmem:[%s6351_s1 + $0x190] sm:$0xff]  }
  0x11   :  { %4220 = vmatpush3.bf16.msra.mxu1 %v4371_v15  ;;  %4199 = vmatprep.subr.bf16.mxu0 %v4372_v16  ;;  %v4400_v52 = vld [vmem:[%s6351_s1 + $0x158] sm:$0xff]   ;;  %v4404_v56 = vld [vmem:[%s6351_s1 + $0x160] sm:$0xff]   ;;  %v4408_v60 = vld [vmem:[%s6351_s1 + $0x168] sm:$0xff]  }
  0x12   :  { %4221 = vmatprep.subr.bf16.mxu1 %v4373_v17  ;;  %v4401_v53 = vld [vmem:[%s6351_s1 + $0x1d8] sm:$0xff]   ;;  %v4405_v57 = vld [vmem:[%s6351_s1 + $0x1e0] sm:$0xff]   ;;  %v4409_v61 = vld [vmem:[%s6351_s1 + $0x1e8] sm:$0xff]  }
  0x13   :  { %v4402_v54 = vld [vmem:[%s6351_s1 + $0x118] sm:$0xff]   ;;  %v4406_v58 = vld [vmem:[%s6351_s1 + $0x120] sm:$0xff]   ;;  %v4410_v62 = vld [vmem:[%s6351_s1 + $0x128] sm:$0xff]  }
  0x14   :  { %4200 = vmatpush3.bf16.msra.mxu0 %v4374_v18  ;;  %v4403_v55 = vld [vmem:[%s6351_s1 + $0x198] sm:$0xff]   ;;  %v4407_v59 = vld [vmem:[%s6351_s1 + $0x1a0] sm:$0xff]   ;;  %v4411_v63 = vld [vmem:[%s6351_s1 + $0x1a8] sm:$0xff]  }
  0x15   :  { %4222 = vmatpush3.bf16.msra.mxu1 %v4375_v19  ;;  %4201 = vmatprep.subr.bf16.mxu0 %v4376_v20  ;;  %v4412_v0 = vld [vmem:[%s6351_s1 + $0x170] sm:$0xff]   ;;  %v4416_v4 = vld [vmem:[%s6351_s1 + $0x178] sm:$0xff]   ;;  %v764_v16 = vld [vmem:[%s6353_s3] sm:$0xff] }
  0x16   :  { %4223 = vmatprep.subr.bf16.mxu1 %v4377_v21  ;;  %v4413_v1 = vld [vmem:[%s6351_s1 + $0x1f0] sm:$0xff]   ;;  %v4417_v5 = vld [vmem:[%s6351_s1 + $0x1f8] sm:$0xff]   ;;  %v768_v17 = vld [vmem:[%s6353_s3 + $0x20] sm:$0xff] }
  0x17   :  { %v4414_v2 = vld [vmem:[%s6351_s1 + $0x130] sm:$0xff]   ;;  %v4418_v6 = vld [vmem:[%s6351_s1 + $0x138] sm:$0xff]   ;;  %v765_v18 = vld [vmem:[%s6353_s3 + $0x8] sm:$0xff]  ;;  %v3818_v19 = vcombine.low %v764_v16, %v768_v17  ;;  %v3819_v20 = vcombine.high %v764_v16, %v768_v17 }
  0x18   :  { %4202 = vmatpush3.bf16.msra.mxu0 %v4378_v22  ;;  %v4415_v3 = vld [vmem:[%s6351_s1 + $0x1b0] sm:$0xff]   ;;  %v4419_v7 = vld [vmem:[%s6351_s1 + $0x1b8] sm:$0xff]   ;;  %v769_v21 = vld [vmem:[%s6353_s3 + $0x28] sm:$0xff] }
  0x19   :  { %4224 = vmatpush3.bf16.msra.mxu1 %v4379_v23  ;;  %4203 = vmatprep.subr.bf16.mxu0 %v4380_v24  ;;  %v32_v8 = vld [vmem:[%s6352_s0 + $0x10] sm:$0xff]  ;;  %v33_v12 = vld [vmem:[%s6352_s0 + $0x18] sm:$0xff]  ;;  %v772_v22 = vld [vmem:[%s6353_s3 + $0x40] sm:$0xff]  ;;  %v3820_v24 = vcombine.low %v765_v18, %v769_v21 }
  0x1a   :  { %4225 = vmatprep.subr.bf16.mxu1 %v4381_v25  ;;  %v36_v9 = vld [vmem:[%s6352_s0 + $0x30] sm:$0xff]  ;;  %v37_v13 = vld [vmem:[%s6352_s0 + $0x38] sm:$0xff]  ;;  %v776_v23 = vld [vmem:[%s6353_s3 + $0x60] sm:$0xff]  ;;  %v3821_v25 = vcombine.high %v765_v18, %v769_v21 }
  0x1b   :  { %v3750_v10 = vcombine.low %v32_v8, %v36_v9  ;;  %v3751_v11 = vcombine.high %v32_v8, %v36_v9  ;;  %v3752_v14 = vcombine.low %v33_v12, %v37_v13  ;;  %v3753_v15 = vcombine.high %v33_v12, %v37_v13  ;;  %v781_v32 = vld [vmem:[%s6353_s3 + $0x88] sm:$0xff]  ;;  %v792_v39 = vld [vmem:[%s6353_s3 + $0xe0] sm:$0xff]  ;;  %v5202_v16 = vld [vmem:[%s6353_s3 + $0x10] sm:$0xff] }
  0x1c   :  { %4204 = vmatpush3.bf16.msra.mxu0 %v4382_v26  ;;  %v3827_v26 = vcombine.high %v772_v22, %v776_v23  ;;  %v785_v33 = vld [vmem:[%s6353_s3 + $0xa8] sm:$0xff]  ;;  %v3826_v34 = vcombine.low %v772_v22, %v776_v23  ;;  %v820_v8 = vld [vmem:[%s6353_s3 + $0x1c0] sm:$0xff]  ;;  %v5207_v17 = vld [vmem:[%s6353_s3 + $0x30] sm:$0xff]  ;;  %v4836_v22 = vmov 0  }
  0x1d   :  { %4226 = vmatpush3.bf16.msra.mxu1 %v4383_v27  ;;  %4205 = vmatprep.subr.bf16.mxu0 %v4384_v28  ;;  %v773_v27 = vld [vmem:[%s6353_s3 + $0x48] sm:$0xff]  ;;  %v3837_v37 = vcombine.high %v781_v32, %v785_v33  ;;  %v824_v9 = vld [vmem:[%s6353_s3 + $0x1e0] sm:$0xff]  ;;  %v5212_v18 = vld [vmem:[%s6353_s3 + $0x18] sm:$0xff] }
  0x1e   :  { %4227 = vmatprep.subr.bf16.mxu1 %v4385_v29  ;;  %v777_v28 = vld [vmem:[%s6353_s3 + $0x68] sm:$0xff]  ;;  %v780_v29 = vld [vmem:[%s6353_s3 + $0x80] sm:$0xff]  ;;  %v3874_v13 = vcombine.low %v820_v8, %v824_v9  ;;  %v771_v21 = vld [vmem:[%s6353_s3 + $0x38] sm:$0xff] }
  0x1f   :  { %v825_v12 = vld [vmem:[%s6353_s3 + $0x1e8] sm:$0xff]  ;;  %v3824_v23 = vcombine.low %v5212_v18, %v771_v21 }
  0x20   :  { %4206 = vmatpush3.bf16.msra.mxu0 %v4386_v30  ;;  %v3829_v30 = vcombine.high %v773_v27, %v777_v28 }
  0x21   :  { %4228 = vmatpush3.bf16.msra.mxu1 %v4387_v31  ;;  %4235 = vmatprep.subr.bf16.mxu0 %v4388_v40  ;;  %v784_v31 = vld [vmem:[%s6353_s3 + $0xa0] sm:$0xff]  ;;  %v789_v40 = vld [vmem:[%s6353_s3 + $0xc8] sm:$0xff] }
  0x22   :  { %4257 = vmatprep.subr.bf16.mxu1 %v4389_v41  ;;  %v3835_v36 = vcombine.high %v780_v29, %v784_v31  ;;  %v793_v41 = vld [vmem:[%s6353_s3 + $0xe8] sm:$0xff] }
  0x23   :  { %630 = vmatmul.mubr.bf16.vlgmr.msra.gmra.mrb[0].mxu0 %v3746_v35  ;;  %v3828_v35 = vcombine.low %v773_v27, %v777_v28  ;;  %v3745_v27 = vld [vmem:[%s6355_s2] ss:$0 sm:$0xff] }
  0x24   :  { %671 = vmatmul.mubr.bf16.vlgmr.msra.gmra.mrb[0].mxu1 %v3748_v38  ;;  %4236 = vmatpush3.bf16.msra.mxu0 %v4390_v42  ;;  %v788_v38 = vld [vmem:[%s6353_s3 + $0xc0] sm:$0xff]  ;;  %v3834_v42 = vcombine.low %v780_v29, %v784_v31 }
  0x25   :  { %4258 = vmatpush3.bf16.msra.mxu1 %v4391_v43  ;;  %4237 = vmatprep.subr.bf16.mxu0 %v4392_v44  ;;  %v3836_v43 = vcombine.low %v781_v32, %v785_v33  ;;  %v3843_v44 = vcombine.high %v788_v38, %v792_v39 }
  0x26   :  { %4259 = vmatprep.subr.bf16.mxu1 %v4393_v45  ;;  %711 = vmatprep.mubr.bf16.mxu0 %v3751_v11  ;;  %v3845_v45 = vcombine.high %v789_v40, %v793_v41  ;;  %v3875_v11 = vcombine.high %v820_v8, %v824_v9  ;;  %v790_v9 = vld [vmem:[%s6353_s3 + $0xd0] sm:$0xff] }
  0x27   :  { %752 = vmatprep.mubr.bf16.mxu1 %v3753_v15 }
  0x28   :  { %4238 = vmatpush3.bf16.msra.mxu0 %v4394_v46  ;;  %v796_v46 = vld [vmem:[%s6353_s3 + $0x100] sm:$0xff] }
  0x29   :  { %4260 = vmatpush3.bf16.msra.mxu1 %v4395_v47  ;;  %4239 = vmatprep.subr.bf16.mxu0 %v4396_v48  ;;  %v800_v47 = vld [vmem:[%s6353_s3 + $0x120] sm:$0xff]  ;;  %v797_v48 = vld [vmem:[%s6353_s3 + $0x108] sm:$0xff] }
  0x2a   :  { %4261 = vmatprep.subr.bf16.mxu1 %v4397_v49  ;;  %v801_v49 = vld [vmem:[%s6353_s3 + $0x128] sm:$0xff] }
  0x2c   :  { %4240 = vmatpush3.bf16.msra.mxu0 %v4398_v50  ;;  %v3842_v50 = vcombine.low %v788_v38, %v792_v39 }
  0x2d   :  { %4262 = vmatpush3.bf16.msra.mxu1 %v4399_v51  ;;  %4241 = vmatprep.subr.bf16.mxu0 %v4400_v52  ;;  %v3844_v51 = vcombine.low %v789_v40, %v793_v41  ;;  %v3851_v52 = vcombine.high %v796_v46, %v800_v47 }
  0x2e   :  { %4263 = vmatprep.subr.bf16.mxu1 %v4401_v53  ;;  %v3853_v53 = vcombine.high %v797_v48, %v801_v49 }
  0x30   :  { %4242 = vmatpush3.bf16.msra.mxu0 %v4402_v54  ;;  %v3850_v54 = vcombine.low %v796_v46, %v800_v47 }
  0x31   :  { %4264 = vmatpush3.bf16.msra.mxu1 %v4403_v55  ;;  %4243 = vmatprep.subr.bf16.mxu0 %v4404_v56  ;;  %v3852_v55 = vcombine.low %v797_v48, %v801_v49  ;;  %v804_v56 = vld [vmem:[%s6353_s3 + $0x140] sm:$0xff] }
  0x32   :  { %4265 = vmatprep.subr.bf16.mxu1 %v4405_v57  ;;  %v808_v57 = vld [vmem:[%s6353_s3 + $0x160] sm:$0xff] }
  0x34   :  { %4244 = vmatpush3.bf16.msra.mxu0 %v4406_v58  ;;  %v805_v58 = vld [vmem:[%s6353_s3 + $0x148] sm:$0xff] }
  0x35   :  { %4266 = vmatpush3.bf16.msra.mxu1 %v4407_v59  ;;  %4245 = vmatprep.subr.bf16.mxu0 %v4408_v60  ;;  %v3859_v59 = vcombine.high %v804_v56, %v808_v57  ;;  %v809_v60 = vld [vmem:[%s6353_s3 + $0x168] sm:$0xff] }
  0x36   :  { %4267 = vmatprep.subr.bf16.mxu1 %v4409_v61  ;;  %v3858_v61 = vcombine.low %v804_v56, %v808_v57  ;;  %v774_v57 = vld [vmem:[%s6353_s3 + $0x50] sm:$0xff] }
  0x38   :  { %4246 = vmatpush3.bf16.msra.mxu0 %v4410_v62  ;;  %v3860_v62 = vcombine.low %v805_v58, %v809_v60 }
  0x39   :  { %4268 = vmatpush3.bf16.msra.mxu1 %v4411_v63  ;;  %4247 = vmatprep.subr.bf16.mxu0 %v4412_v0  ;;  %v3861_v63 = vcombine.high %v805_v58, %v809_v60  ;;  %v812_v0 = vld [vmem:[%s6353_s3 + $0x180] sm:$0xff]  ;;  %v778_v58 = vld [vmem:[%s6353_s3 + $0x70] sm:$0xff]  ;;  %v779_v60 = vld [vmem:[%s6353_s3 + $0x78] sm:$0xff] }
  0x3a   :  { %4269 = vmatprep.subr.bf16.mxu1 %v4413_v1  ;;  %v816_v1 = vld [vmem:[%s6353_s3 + $0x1a0] sm:$0xff] }
  0x3c   :  { %4248 = vmatpush3.bf16.msra.mxu0 %v4414_v2  ;;  %v813_v2 = vld [vmem:[%s6353_s3 + $0x188] sm:$0xff] }
  0x3d   :  { %4270 = vmatpush3.bf16.msra.mxu1 %v4415_v3  ;;  %4249 = vmatprep.subr.bf16.mxu0 %v4416_v4  ;;  %v3867_v3 = vcombine.high %v812_v0, %v816_v1  ;;  %v817_v4 = vld [vmem:[%s6353_s3 + $0x1a8] sm:$0xff] }
  0x3e   :  { %4271 = vmatprep.subr.bf16.mxu1 %v4417_v5  ;;  %v3866_v5 = vcombine.low %v812_v0, %v816_v1  ;;  %v782_v0 = vld [vmem:[%s6353_s3 + $0x90] sm:$0xff] }
  0x3f   :  { %v786_v1 = vld [vmem:[%s6353_s3 + $0xb0] sm:$0xff] }
  0x40   :  { %4250 = vmatpush3.bf16.msra.mxu0 %v4418_v6  ;;  %v3868_v6 = vcombine.low %v813_v2, %v817_v4 }
  0x41   :  { %4272 = vmatpush3.bf16.msra.mxu1 %v4419_v7  ;;  %1190 = vmatprep.subr.bf16.mxu0 %v3819_v20  ;;  %v3869_v7 = vcombine.high %v813_v2, %v817_v4  ;;  %v3823_v20 = vcombine.high %v5202_v16, %v5207_v17  ;;  %v783_v2 = vld [vmem:[%s6353_s3 + $0x98] sm:$0xff] }
  0x42   :  { %1233 = vmatprep.subr.bf16.mxu1 %v3821_v25 }
  0x43   :  { %712 = vmatmul.mubr.bf16.vlgmr.msra.gmra.mrb[4].mxu0 %v3750_v10  ;;  %v821_v10 = vld [vmem:[%s6353_s3 + $0x1c8] sm:$0xff] }
  0x44   :  { %753 = vmatmul.mubr.bf16.vlgmr.msra.gmra.mrb[4].mxu1 %v3752_v14  ;;  %1191 = vmatpush1.bf16.msra.mxu0 %v3818_v19  ;;  %v3876_v14 = vcombine.low %v821_v10, %v825_v12  ;;  %v3877_v15 = vcombine.high %v821_v10, %v825_v12  ;;  %v3822_v19 = vcombine.low %v5202_v16, %v5207_v17  ;;  %v794_v10 = vld [vmem:[%s6353_s3 + $0xf0] sm:$0xff]  ;;  %v795_v12 = vld [vmem:[%s6353_s3 + $0xf8] sm:$0xff] }
  0x45   :  { %1234 = vmatpush1.bf16.msra.mxu1 %v3820_v24  ;;  %1192 = vmatprep.subr.bf16.mxu0 %v3827_v26  ;;  %v3825_v24 = vcombine.high %v5212_v18, %v771_v21  ;;  %v798_v17 = vld [vmem:[%s6353_s3 + $0x110] sm:$0xff]  ;;  %v3847_v21 = vcombine.high %v790_v9, %v794_v10 }
  0x46   :  { %1235 = vmatprep.subr.bf16.mxu1 %v3829_v30  ;;  %1222 = vmatprep.mubr.bf16.mxu0 %v4836_v22  ;;  %v802_v18 = vld [vmem:[%s6353_s3 + $0x130] sm:$0xff] }
  0x47   :  { %1265 = vmatprep.mubr.bf16.mxu1 %v4836_v22 }
  0x48   :  { %1193 = vmatpush1.bf16.msra.mxu0 %v3826_v34 }
  0x49   :  { %1236 = vmatpush1.bf16.msra.mxu1 %v3828_v35  ;;  %1194 = vmatprep.subr.bf16.mxu0 %v3835_v36 }
  0x4a   :  { %1237 = vmatprep.subr.bf16.mxu1 %v3837_v37 }
  0x4c   :  { %1195 = vmatpush1.bf16.msra.mxu0 %v3834_v42 }
  0x4d   :  { %1238 = vmatpush1.bf16.msra.mxu1 %v3836_v43  ;;  %1196 = vmatprep.subr.bf16.mxu0 %v3843_v44 }
  0x4e   :  { %1239 = vmatprep.subr.bf16.mxu1 %v3845_v45 }
  0x50   :  { %1197 = vmatpush1.bf16.msra.mxu0 %v3842_v50 }
  0x51   :  { %1240 = vmatpush1.bf16.msra.mxu1 %v3844_v51  ;;  %1198 = vmatprep.subr.bf16.mxu0 %v3851_v52 }
  0x52   :  { %1241 = vmatprep.subr.bf16.mxu1 %v3853_v53 }
  0x54   :  { %1199 = vmatpush1.bf16.msra.mxu0 %v3850_v54 }
  0x55   :  { %1242 = vmatpush1.bf16.msra.mxu1 %v3852_v55  ;;  %1200 = vmatprep.subr.bf16.mxu0 %v3859_v59  ;;  %v775_v59 = vld [vmem:[%s6353_s3 + $0x58] sm:$0xff] }
  0x56   :  { %1243 = vmatprep.subr.bf16.mxu1 %v3861_v63  ;;  %v3832_v8 = vcombine.low %v775_v59, %v779_v60 }
  0x58   :  { %1201 = vmatpush1.bf16.msra.mxu0 %v3858_v61 }
  0x59   :  { %1244 = vmatpush1.bf16.msra.mxu1 %v3860_v62  ;;  %1202 = vmatprep.subr.bf16.mxu0 %v3867_v3  ;;  %v787_v3 = vld [vmem:[%s6353_s3 + $0xb8] sm:$0xff] }
  0x5a   :  { %1245 = vmatprep.subr.bf16.mxu1 %v3869_v7  ;;  %v3830_v7 = vcombine.low %v774_v57, %v778_v58  ;;  %v3840_v16 = vcombine.low %v783_v2, %v787_v3 }
  0x5c   :  { %1203 = vmatpush1.bf16.msra.mxu0 %v3866_v5  ;;  %v3831_v5 = vcombine.high %v774_v57, %v778_v58  ;;  %v4428_v57 = vld [vmem:[%s6354_s5 + $0x4c] ss:$36 sps:$4 sm:$0xff]   ;;  %v4431_v58 = vld [vmem:[%s6354_s5 + $0x54] ss:$36 sps:$4 sm:$0xff]  }
  0x5d   :  { %1246 = vmatpush1.bf16.msra.mxu1 %v3868_v6  ;;  %1204 = vmatprep.subr.bf16.mxu0 %v3875_v11  ;;  %v3833_v6 = vcombine.high %v775_v59, %v779_v60  ;;  %v791_v11 = vld [vmem:[%s6353_s3 + $0xd8] sm:$0xff]  ;;  %v4426_v59 = vld [vmem:[%s6354_s5 + $0x48] ss:$36 sps:$4 sm:$0xff]   ;;  %v4429_v60 = vld [vmem:[%s6354_s5 + $0x50] ss:$36 sps:$4 sm:$0xff]  }
  0x5e   :  { %1247 = vmatprep.subr.bf16.mxu1 %v3877_v15  ;;  %v3838_v15 = vcombine.low %v782_v0, %v786_v1 }
  0x60   :  { %1205 = vmatpush1.bf16.msra.mxu0 %v3874_v13  ;;  %v3839_v13 = vcombine.high %v782_v0, %v786_v1  ;;  %v4435_v0 = vld [vmem:[%s6354_s5 + $0x98] ss:$36 sps:$4 sm:$0xff]  }
  0x61   :  { %1248 = vmatpush1.bf16.msra.mxu1 %v3876_v14  ;;  %1276 = vmatprep.subr.bf16.mxu0 %v3823_v20  ;;  %v3841_v14 = vcombine.high %v783_v2, %v787_v3  ;;  %v803_v20 = vld [vmem:[%s6353_s3 + $0x138] sm:$0xff]  ;;  %v4443_v2 = vld [vmem:[%s6354_s5 + $0xe4] ss:$36 sps:$4 sm:$0xff]  }
  0x62   :  { %1319 = vmatprep.subr.bf16.mxu1 %v3825_v24  ;;  %v3848_v24 = vcombine.low %v791_v11, %v795_v12  ;;  %v4440_v1 = vld [vmem:[%s6354_s5 + $0xdc] ss:$36 sps:$4 sm:$0xff]  }
  0x63   :  { %v4438_v3 = vld [vmem:[%s6354_s5 + $0xd8] ss:$36 sps:$4 sm:$0xff]  }
  0xf6   :  { %v4207_v25 = vpop.f32.mrb[0].mxu0 }
  0xf7   :  { %v4229_v26 = vpop.f32.mrb[0].mxu1  ;;  %v4208_v28 = vpop.f32.mrb[1].mxu0 }
  0xf8   :  { %v4209_v29 = vadd.f32 %v4208_v28, %v4207_v25  ;;  %v4230_v30 = vpop.f32.mrb[1].mxu1  ;;  %v4210_v31 = vpop.f32.mrb[2].mxu0  ;;  %v806_v25 = vld [vmem:[%s6353_s3 + $0x150] sm:$0xff]  ;;  %v811_v28 = vld [vmem:[%s6353_s3 + $0x178] sm:$0xff] }
  0xf9   :  { %v4231_v32 = vadd.f32 %v4230_v30, %v4229_v26  ;;  %v4232_v33 = vpop.f32.mrb[2].mxu1  ;;  %v4211_v34 = vpop.f32.mrb[3].mxu0  ;;  %v810_v26 = vld [vmem:[%s6353_s3 + $0x170] sm:$0xff] }
  0xfa   :  { %v632_v35 = vadd.f32 %v4209_v29, %v3745_v27  ;;  %v4212_v36 = vadd.f32 %v4211_v34, %v4210_v31  ;;  %v4233_v37 = vpop.f32.mrb[3].mxu1  ;;  %v3855_v29 = vcombine.high %v798_v17, %v802_v18  ;;  %v3854_v31 = vcombine.low %v798_v17, %v802_v18  ;;  %v818_v34 = vld [vmem:[%s6353_s3 + $0x1b0] sm:$0xff]  ;;  %v4464_v17 = vld [vmem:[%s6354_s5 + $0x1fc] ss:$36 sps:$4 sm:$0xff]   ;;  %v4467_v18 = vld [vmem:[%s6354_s5 + $0x204] ss:$36 sps:$4 sm:$0xff]  }
  0xfb   :  { %v4234_v38 = vadd.f32 %v4233_v37, %v4232_v33  ;;  %v814_v33 = vld [vmem:[%s6353_s3 + $0x190] sm:$0xff]  ;;  %v3863_v37 = vcombine.high %v806_v25, %v810_v26 }
  0xfc   :  { %v673_v39 = vadd.f32 %v4231_v32, %v632_v35  ;;  %v635_v40 = vadd.f32 %v4212_v36, %v3745_v27  ;;  %v807_v27 = vld [vmem:[%s6353_s3 + $0x158] sm:$0xff] }
  0xfd   :  { %v815_v35 = vld [vmem:[%s6353_s3 + $0x198] sm:$0xff] }
  0xfe   :  { %v676_v41 = vadd.f32 %v4234_v38, %v635_v40  ;;  %v819_v36 = vld [vmem:[%s6353_s3 + $0x1b8] sm:$0xff]  ;;  %v3865_v38 = vcombine.high %v807_v27, %v811_v28  ;;  %v3864_v40 = vcombine.low %v807_v27, %v811_v28  ;;  %v4474_v27 = vld [vmem:[%s6354_s5 + $0x288] ss:$36 sps:$4 sm:$0xff]   ;;  %v4477_v28 = vld [vmem:[%s6354_s5 + $0x290] ss:$36 sps:$4 sm:$0xff]  }
 0x116   :  { %v4251_v42 = vpop.f32.mrb[4].mxu0 }
 0x117   :  { %v4273_v43 = vpop.f32.mrb[4].mxu1  ;;  %v4252_v44 = vpop.f32.mrb[5].mxu0 }
 0x118   :  { %v4253_v45 = vadd.f32 %v4252_v44, %v4251_v42  ;;  %v4274_v46 = vpop.f32.mrb[5].mxu1  ;;  %v4254_v47 = vpop.f32.mrb[6].mxu0  ;;  %v826_v42 = vld [vmem:[%s6353_s3 + $0x1f0] sm:$0xff]  ;;  %v827_v44 = vld [vmem:[%s6353_s3 + $0x1f8] sm:$0xff] }
 0x119   :  { %v4275_v48 = vadd.f32 %v4274_v46, %v4273_v43  ;;  %v4276_v49 = vpop.f32.mrb[6].mxu1  ;;  %v4255_v50 = vpop.f32.mrb[7].mxu0  ;;  %v823_v43 = vld [vmem:[%s6353_s3 + $0x1d8] sm:$0xff]  ;;  %v3873_v46 = vcombine.high %v815_v35, %v819_v36 }
 0x11a   :  { %v714_v51 = vadd.f32 %v4253_v45, %v673_v39  ;;  %v4256_v52 = vadd.f32 %v4255_v50, %v4254_v47  ;;  %v4277_v53 = vpop.f32.mrb[7].mxu1  ;;  %v3862_v39 = vcombine.low %v806_v25, %v810_v26  ;;  %v3871_v45 = vcombine.high %v814_v33, %v818_v34  ;;  %v4476_v25 = vld [vmem:[%s6354_s5 + $0x28c] ss:$36 sps:$4 sm:$0xff]   ;;  %v4479_v26 = vld [vmem:[%s6354_s5 + $0x294] ss:$36 sps:$4 sm:$0xff]  }
 0x11b   :  { %v4278_v54 = vadd.f32 %v4277_v53, %v4276_v49  ;;  %v3870_v47 = vcombine.low %v814_v33, %v818_v34  ;;  %v3881_v50 = vcombine.high %v823_v43, %v827_v44  ;;  %v4488_v33 = vld [vmem:[%s6354_s5 + $0x31c] ss:$36 sps:$4 sm:$0xff]   ;;  %v4491_v34 = vld [vmem:[%s6354_s5 + $0x324] ss:$36 sps:$4 sm:$0xff]  }
 0x11c   :  { %v755_v55 = vadd.f32 %v4275_v48, %v714_v51  ;;  %v717_v56 = vadd.f32 %v4256_v52, %v676_v41  ;;  %v822_v41 = vld [vmem:[%s6353_s3 + $0x1d0] sm:$0xff]  ;;  %v3872_v48 = vcombine.low %v815_v35, %v819_v36  ;;  %v4422_v51 = vld [vmem:[%s6354_s5 + $0x4] ss:$36 sps:$4 sm:$0xff]   ;;  %v4486_v35 = vld [vmem:[%s6354_s5 + $0x318] ss:$36 sps:$4 sm:$0xff]  }
 0x11d   :  { %v3879_v49 = vcombine.high %v822_v41, %v826_v42  ;;  %v4425_v52 = vld [vmem:[%s6354_s5 + $0xc] ss:$36 sps:$4 sm:$0xff]   ;;  %v3878_v53 = vcombine.low %v822_v41, %v826_v42  ;;  %v4489_v36 = vld [vmem:[%s6354_s5 + $0x320] ss:$36 sps:$4 sm:$0xff]   ;;  %v4503_v42 = vld [vmem:[%s6354_s5 + $0x3b4] ss:$36 sps:$4 sm:$0xff]  }
 0x11e   :  { %v758_v61 = vadd.f32 %v4278_v54, %v717_v56  ;;  %v761_v62 = vmax.f32 %v755_v55, 0.0  ;;  %v3880_v54 = vcombine.low %v823_v43, %v827_v44  ;;  %v4420_v55 = vld [vmem:[%s6354_s5] ss:$36 sps:$4 sm:$0xff]   ;;  %v4423_v56 = vld [vmem:[%s6354_s5 + $0x8] ss:$36 sps:$4 sm:$0xff]  }
 0x11f   :  { %v4500_v41 = vld [vmem:[%s6354_s5 + $0x3ac] ss:$36 sps:$4 sm:$0xff]  }
 0x120   :  { %v762_v63 = vmax.f32 %v758_v61, 0.0  ;;  %v4434_v61 = vld [vmem:[%s6354_s5 + $0x94] ss:$36 sps:$4 sm:$0xff]   ;;  %v4498_v43 = vld [vmem:[%s6354_s5 + $0x3a8] ss:$36 sps:$4 sm:$0xff]  }
 0x121   :  { %v4501_v44 = vld [vmem:[%s6354_s5 + $0x3b0] ss:$36 sps:$4 sm:$0xff]  }
 0x122   :  { %v5252_v4 = vpack.c.bf16 %v762_v63, %v761_v62  ;;  %v4437_v62 = vld [vmem:[%s6354_s5 + $0x9c] ss:$36 sps:$4 sm:$0xff]   ;;  %v4432_v63 = vld [vmem:[%s6354_s5 + $0x90] ss:$36 sps:$4 sm:$0xff]  }
 0x124   :  { %1223 = vmatmul.mubr.bf16.vlgmr.msra.gmra.mrb[8].mxu0 %v5252_v4  ;;  %1266 = vmatmul.mubr.bf16.vlgmr.msra.gmra.mrb[8].mxu1 %v5252_v4 }
 0x125   :  { %1277 = vmatpush1.bf16.msra.mxu0 %v3822_v19  ;;  %1320 = vmatpush1.bf16.msra.mxu1 %v3824_v23  ;;  %v799_v19 = vld [vmem:[%s6353_s3 + $0x118] sm:$0xff]  ;;  %v3846_v23 = vcombine.low %v790_v9, %v794_v10  ;;  %v4452_v9 = vld [vmem:[%s6354_s5 + $0x16c] ss:$36 sps:$4 sm:$0xff]  }
 0x126   :  { %1278 = vmatprep.subr.bf16.mxu0 %v3831_v5  ;;  %1321 = vmatprep.subr.bf16.mxu1 %v3833_v6  ;;  %v3857_v30 = vcombine.high %v799_v19, %v803_v20  ;;  %v3856_v32 = vcombine.low %v799_v19, %v803_v20  ;;  %v4446_v5 = vld [vmem:[%s6354_s5 + $0x124] ss:$36 sps:$4 sm:$0xff]   ;;  %v4449_v6 = vld [vmem:[%s6354_s5 + $0x12c] ss:$36 sps:$4 sm:$0xff]   ;;  %v4455_v10 = vld [vmem:[%s6354_s5 + $0x174] ss:$36 sps:$4 sm:$0xff]  }
 0x127   :  { %1308 = vmatprep.mubr.bf16.mxu0 %v4836_v22  ;;  %1351 = vmatprep.mubr.bf16.mxu1 %v4836_v22  ;;  %v3849_v22 = vcombine.high %v791_v11, %v795_v12  ;;  %v4450_v11 = vld [vmem:[%s6354_s5 + $0x168] ss:$36 sps:$4 sm:$0xff]   ;;  %v4453_v12 = vld [vmem:[%s6354_s5 + $0x170] ss:$36 sps:$4 sm:$0xff]   ;;  %v4462_v19 = vld [vmem:[%s6354_s5 + $0x1f8] ss:$36 sps:$4 sm:$0xff]  }
 0x128   :  { %v4465_v20 = vld [vmem:[%s6354_s5 + $0x200] ss:$36 sps:$4 sm:$0xff]  }
 0x129   :  { %1279 = vmatpush1.bf16.msra.mxu0 %v3830_v7  ;;  %1322 = vmatpush1.bf16.msra.mxu1 %v3832_v8  ;;  %v4444_v7 = vld [vmem:[%s6354_s5 + $0x120] ss:$36 sps:$4 sm:$0xff]   ;;  %v4447_v8 = vld [vmem:[%s6354_s5 + $0x128] ss:$36 sps:$4 sm:$0xff]  }
 0x12a   :  { %1280 = vmatprep.subr.bf16.mxu0 %v3839_v13  ;;  %1323 = vmatprep.subr.bf16.mxu1 %v3841_v14  ;;  %v4458_v13 = vld [vmem:[%s6354_s5 + $0x1b4] ss:$36 sps:$4 sm:$0xff]   ;;  %v4461_v14 = vld [vmem:[%s6354_s5 + $0x1bc] ss:$36 sps:$4 sm:$0xff]  }
 0x12d   :  { %1281 = vmatpush1.bf16.msra.mxu0 %v3838_v15  ;;  %1324 = vmatpush1.bf16.msra.mxu1 %v3840_v16  ;;  %v4456_v15 = vld [vmem:[%s6354_s5 + $0x1b0] ss:$36 sps:$4 sm:$0xff]   ;;  %v4459_v16 = vld [vmem:[%s6354_s5 + $0x1b8] ss:$36 sps:$4 sm:$0xff]  }
 0x12e   :  { %1282 = vmatprep.subr.bf16.mxu0 %v3847_v21  ;;  %1325 = vmatprep.subr.bf16.mxu1 %v3849_v22  ;;  %v4470_v21 = vld [vmem:[%s6354_s5 + $0x244] ss:$36 sps:$4 sm:$0xff]   ;;  %v4473_v22 = vld [vmem:[%s6354_s5 + $0x24c] ss:$36 sps:$4 sm:$0xff]  }
 0x131   :  { %1283 = vmatpush1.bf16.msra.mxu0 %v3846_v23  ;;  %1326 = vmatpush1.bf16.msra.mxu1 %v3848_v24  ;;  %v4468_v23 = vld [vmem:[%s6354_s5 + $0x240] ss:$36 sps:$4 sm:$0xff]   ;;  %v4471_v24 = vld [vmem:[%s6354_s5 + $0x248] ss:$36 sps:$4 sm:$0xff]  }
 0x132   :  { %1284 = vmatprep.subr.bf16.mxu0 %v3855_v29  ;;  %1327 = vmatprep.subr.bf16.mxu1 %v3857_v30  ;;  %v4482_v29 = vld [vmem:[%s6354_s5 + $0x2d4] ss:$36 sps:$4 sm:$0xff]   ;;  %v4485_v30 = vld [vmem:[%s6354_s5 + $0x2dc] ss:$36 sps:$4 sm:$0xff]  }
 0x135   :  { %1285 = vmatpush1.bf16.msra.mxu0 %v3854_v31  ;;  %1328 = vmatpush1.bf16.msra.mxu1 %v3856_v32  ;;  %v4480_v31 = vld [vmem:[%s6354_s5 + $0x2d0] ss:$36 sps:$4 sm:$0xff]   ;;  %v4483_v32 = vld [vmem:[%s6354_s5 + $0x2d8] ss:$36 sps:$4 sm:$0xff]  }
 0x136   :  { %1286 = vmatprep.subr.bf16.mxu0 %v3863_v37  ;;  %1329 = vmatprep.subr.bf16.mxu1 %v3865_v38  ;;  %v4494_v37 = vld [vmem:[%s6354_s5 + $0x364] ss:$36 sps:$4 sm:$0xff]   ;;  %v4497_v38 = vld [vmem:[%s6354_s5 + $0x36c] ss:$36 sps:$4 sm:$0xff]  }
 0x139   :  { %1287 = vmatpush1.bf16.msra.mxu0 %v3862_v39  ;;  %1330 = vmatpush1.bf16.msra.mxu1 %v3864_v40  ;;  %v4492_v39 = vld [vmem:[%s6354_s5 + $0x360] ss:$36 sps:$4 sm:$0xff]   ;;  %v4495_v40 = vld [vmem:[%s6354_s5 + $0x368] ss:$36 sps:$4 sm:$0xff]  }
 0x13a   :  { %1288 = vmatprep.subr.bf16.mxu0 %v3871_v45  ;;  %1331 = vmatprep.subr.bf16.mxu1 %v3873_v46  ;;  %v4506_v45 = vld [vmem:[%s6354_s5 + $0x3f4] ss:$36 sps:$4 sm:$0xff]   ;;  %v4509_v46 = vld [vmem:[%s6354_s5 + $0x3fc] ss:$36 sps:$4 sm:$0xff]  }
 0x13d   :  { %1289 = vmatpush1.bf16.msra.mxu0 %v3870_v47  ;;  %1332 = vmatpush1.bf16.msra.mxu1 %v3872_v48  ;;  %v4504_v47 = vld [vmem:[%s6354_s5 + $0x3f0] ss:$36 sps:$4 sm:$0xff]   ;;  %v4507_v48 = vld [vmem:[%s6354_s5 + $0x3f8] ss:$36 sps:$4 sm:$0xff]  }
 0x13e   :  { %1290 = vmatprep.subr.bf16.mxu0 %v3879_v49  ;;  %1333 = vmatprep.subr.bf16.mxu1 %v3881_v50  ;;  %v4512_v49 = vld [vmem:[%s6354_s5 + $0x43c] ss:$36 sps:$4 sm:$0xff]   ;;  %v4515_v50 = vld [vmem:[%s6354_s5 + $0x444] ss:$36 sps:$4 sm:$0xff]  }
 0x141   :  { %1291 = vmatpush1.bf16.msra.mxu0 %v3878_v53  ;;  %1334 = vmatpush1.bf16.msra.mxu1 %v3880_v54  ;;  %v4518_v53 = vld [vmem:[%s6354_s5 + $0x484] ss:$36 sps:$4 sm:$0xff]   ;;  %v4521_v54 = vld [vmem:[%s6354_s5 + $0x48c] ss:$36 sps:$4 sm:$0xff]  }
 0x142   :  { %3223 = vmatprep.subr.bf16.mxu0 %v4422_v51  ;;  %3309 = vmatprep.subr.bf16.mxu1 %v4425_v52  ;;  %v4510_v51 = vld [vmem:[%s6354_s5 + $0x438] ss:$36 sps:$4 sm:$0xff]   ;;  %v4513_v52 = vld [vmem:[%s6354_s5 + $0x440] ss:$36 sps:$4 sm:$0xff]  }
 0x144   :  { %1309 = vmatmul.mubr.bf16.vlgmr.msra.gmra.mrb[12].mxu0 %v5252_v4  ;;  %1352 = vmatmul.mubr.bf16.vlgmr.msra.gmra.mrb[12].mxu1 %v5252_v4  ;;  %v4441_v4 = vld [vmem:[%s6354_s5 + $0xe0] ss:$36 sps:$4 sm:$0xff]  }
 0x145   :  { %3224 = vmatpush1.bf16.msra.mxu0 %v4420_v55  ;;  %3310 = vmatpush1.bf16.msra.mxu1 %v4423_v56  ;;  %v830_v55 = vlaneseq }
 0x146   :  { %3225 = vmatprep.subr.bf16.mxu0 %v4428_v57  ;;  %3311 = vmatprep.subr.bf16.mxu1 %v4431_v58 }
 0x147   :  { %v5518_v56 = vshrl.u32 %v830_v55, 7  ;;  %v4555_v55 = vld [vmem:[%s6354_s5 + $0x638] ss:$36 sps:$4 sm:$0xff]  }
 0x149   :  { %3226 = vmatpush1.bf16.msra.mxu0 %v4426_v59  ;;  %3312 = vmatpush1.bf16.msra.mxu1 %v4429_v60  ;;  %v832_v57 = vsub.s32 0, %v5518_v56  ;;  %v840_v58 = vsub.s32 2, %v5518_v56  ;;  %v5525_v59 = vld [vmem:[%s6356_s4] sm:$0xff]  ;;  %v836_v60 = vsub.s32 1, %v5518_v56 }
 0x14a   :  { %3227 = vmatprep.subr.bf16.mxu0 %v4434_v61  ;;  %3313 = vmatprep.subr.bf16.mxu1 %v4437_v62  ;;  %v844_v61 = vsub.s32 3, %v5518_v56 }
 0x14b   :  { %v833_v62 = vrot.slane %v5525_v59, %v832_v57 }
 0x14d   :  { %3228 = vmatpush1.bf16.msra.mxu0 %v4432_v63  ;;  %3314 = vmatpush1.bf16.msra.mxu1 %v4435_v0  ;;  %v841_v63 = vrot.slane %v5525_v59, %v840_v58  ;;  %v837_v0 = vrot.slane %v5525_v59, %v836_v60 }
 0x14e   :  { %3229 = vmatprep.subr.bf16.mxu0 %v4440_v1  ;;  %3315 = vmatprep.subr.bf16.mxu1 %v4443_v2  ;;  %v845_v1 = vrot.slane %v5525_v59, %v844_v61 }
 0x151   :  { %3230 = vmatpush1.bf16.msra.mxu0 %v4438_v3  ;;  %3316 = vmatpush1.bf16.msra.mxu1 %v4441_v4 }
 0x152   :  { %3231 = vmatprep.subr.bf16.mxu0 %v4446_v5  ;;  %3317 = vmatprep.subr.bf16.mxu1 %v4449_v6 }
 0x155   :  { %3232 = vmatpush1.bf16.msra.mxu0 %v4444_v7  ;;  %3318 = vmatpush1.bf16.msra.mxu1 %v4447_v8 }
 0x156   :  { %3233 = vmatprep.subr.bf16.mxu0 %v4452_v9  ;;  %3319 = vmatprep.subr.bf16.mxu1 %v4455_v10 }
 0x159   :  { %3234 = vmatpush1.bf16.msra.mxu0 %v4450_v11  ;;  %3320 = vmatpush1.bf16.msra.mxu1 %v4453_v12 }
 0x15a   :  { %3235 = vmatprep.subr.bf16.mxu0 %v4458_v13  ;;  %3321 = vmatprep.subr.bf16.mxu1 %v4461_v14 }
 0x15d   :  { %3236 = vmatpush1.bf16.msra.mxu0 %v4456_v15  ;;  %3322 = vmatpush1.bf16.msra.mxu1 %v4459_v16 }
 0x15e   :  { %3237 = vmatprep.subr.bf16.mxu0 %v4464_v17  ;;  %3323 = vmatprep.subr.bf16.mxu1 %v4467_v18 }
 0x161   :  { %3238 = vmatpush1.bf16.msra.mxu0 %v4462_v19  ;;  %3324 = vmatpush1.bf16.msra.mxu1 %v4465_v20 }
 0x162   :  { %3239 = vmatprep.subr.bf16.mxu0 %v4470_v21  ;;  %3325 = vmatprep.subr.bf16.mxu1 %v4473_v22  ;;  %v4516_v22 = vld [vmem:[%s6354_s5 + $0x480] ss:$36 sps:$4 sm:$0xff]  }
 0x165   :  { %3240 = vmatpush1.bf16.msra.mxu0 %v4468_v23  ;;  %3326 = vmatpush1.bf16.msra.mxu1 %v4471_v24  ;;  %v4519_v23 = vld [vmem:[%s6354_s5 + $0x488] ss:$36 sps:$4 sm:$0xff]  }
 0x166   :  { %3241 = vmatprep.subr.bf16.mxu0 %v4476_v25  ;;  %3327 = vmatprep.subr.bf16.mxu1 %v4479_v26  ;;  %v4524_v24 = vld [vmem:[%s6354_s5 + $0x4cc] ss:$36 sps:$4 sm:$0xff]   ;;  %v4527_v25 = vld [vmem:[%s6354_s5 + $0x4d4] ss:$36 sps:$4 sm:$0xff]  }
 0x167   :  { %v4522_v26 = vld [vmem:[%s6354_s5 + $0x4c8] ss:$36 sps:$4 sm:$0xff]  }
 0x169   :  { %3242 = vmatpush1.bf16.msra.mxu0 %v4474_v27  ;;  %3328 = vmatpush1.bf16.msra.mxu1 %v4477_v28  ;;  %v4525_v27 = vld [vmem:[%s6354_s5 + $0x4d0] ss:$36 sps:$4 sm:$0xff]  }
 0x16a   :  { %3243 = vmatprep.subr.bf16.mxu0 %v4482_v29  ;;  %3329 = vmatprep.subr.bf16.mxu1 %v4485_v30  ;;  %v4530_v28 = vld [vmem:[%s6354_s5 + $0x514] ss:$36 sps:$4 sm:$0xff]   ;;  %v4533_v29 = vld [vmem:[%s6354_s5 + $0x51c] ss:$36 sps:$4 sm:$0xff]  }
 0x16b   :  { %v4528_v30 = vld [vmem:[%s6354_s5 + $0x510] ss:$36 sps:$4 sm:$0xff]  }
 0x16d   :  { %3244 = vmatpush1.bf16.msra.mxu0 %v4480_v31  ;;  %3330 = vmatpush1.bf16.msra.mxu1 %v4483_v32  ;;  %v4531_v31 = vld [vmem:[%s6354_s5 + $0x518] ss:$36 sps:$4 sm:$0xff]  }
 0x16e   :  { %3245 = vmatprep.subr.bf16.mxu0 %v4488_v33  ;;  %3331 = vmatprep.subr.bf16.mxu1 %v4491_v34  ;;  %v4536_v32 = vld [vmem:[%s6354_s5 + $0x55c] ss:$36 sps:$4 sm:$0xff]   ;;  %v4539_v33 = vld [vmem:[%s6354_s5 + $0x564] ss:$36 sps:$4 sm:$0xff]  }
 0x16f   :  { %v4534_v34 = vld [vmem:[%s6354_s5 + $0x558] ss:$36 sps:$4 sm:$0xff]  }
 0x171   :  { %3246 = vmatpush1.bf16.msra.mxu0 %v4486_v35  ;;  %3332 = vmatpush1.bf16.msra.mxu1 %v4489_v36  ;;  %v4537_v35 = vld [vmem:[%s6354_s5 + $0x560] ss:$36 sps:$4 sm:$0xff]  }
 0x172   :  { %3247 = vmatprep.subr.bf16.mxu0 %v4494_v37  ;;  %3333 = vmatprep.subr.bf16.mxu1 %v4497_v38  ;;  %v4542_v36 = vld [vmem:[%s6354_s5 + $0x5a4] ss:$36 sps:$4 sm:$0xff]   ;;  %v4545_v37 = vld [vmem:[%s6354_s5 + $0x5ac] ss:$36 sps:$4 sm:$0xff]  }
 0x173   :  { %v4540_v38 = vld [vmem:[%s6354_s5 + $0x5a0] ss:$36 sps:$4 sm:$0xff]  }
 0x175   :  { %3248 = vmatpush1.bf16.msra.mxu0 %v4492_v39  ;;  %3334 = vmatpush1.bf16.msra.mxu1 %v4495_v40  ;;  %v4543_v39 = vld [vmem:[%s6354_s5 + $0x5a8] ss:$36 sps:$4 sm:$0xff]  }
 0x176   :  { %3249 = vmatprep.subr.bf16.mxu0 %v4500_v41  ;;  %3335 = vmatprep.subr.bf16.mxu1 %v4503_v42  ;;  %v4548_v40 = vld [vmem:[%s6354_s5 + $0x5ec] ss:$36 sps:$4 sm:$0xff]   ;;  %v4551_v41 = vld [vmem:[%s6354_s5 + $0x5f4] ss:$36 sps:$4 sm:$0xff]   ;;  %v848_v42 = vsub.s32 4, %v5518_v56 }
 0x179   :  { %3250 = vmatpush1.bf16.msra.mxu0 %v4498_v43  ;;  %3336 = vmatpush1.bf16.msra.mxu1 %v4501_v44  ;;  %v856_v43 = vsub.s32 6, %v5518_v56  ;;  %v4546_v44 = vld [vmem:[%s6354_s5 + $0x5e8] ss:$36 sps:$4 sm:$0xff]  }
 0x17a   :  { %3251 = vmatprep.subr.bf16.mxu0 %v4506_v45  ;;  %3337 = vmatprep.subr.bf16.mxu1 %v4509_v46  ;;  %v4549_v45 = vld [vmem:[%s6354_s5 + $0x5f0] ss:$36 sps:$4 sm:$0xff]   ;;  %v852_v46 = vsub.s32 5, %v5518_v56 }
 0x17d   :  { %3252 = vmatpush1.bf16.msra.mxu0 %v4504_v47  ;;  %3338 = vmatpush1.bf16.msra.mxu1 %v4507_v48  ;;  %v860_v47 = vsub.s32 7, %v5518_v56  ;;  %v4554_v48 = vld [vmem:[%s6354_s5 + $0x634] ss:$36 sps:$4 sm:$0xff]  }
 0x17e   :  { %3253 = vmatprep.subr.bf16.mxu0 %v4512_v49  ;;  %3339 = vmatprep.subr.bf16.mxu1 %v4515_v50  ;;  %v4557_v49 = vld [vmem:[%s6354_s5 + $0x63c] ss:$36 sps:$4 sm:$0xff]   ;;  %v849_v50 = vrot.slane %v5525_v59, %v848_v42 }
 0x181   :  { %3254 = vmatpush1.bf16.msra.mxu0 %v4510_v51  ;;  %3340 = vmatpush1.bf16.msra.mxu1 %v4513_v52  ;;  %v857_v51 = vrot.slane %v5525_v59, %v856_v43  ;;  %v853_v52 = vrot.slane %v5525_v59, %v852_v46 }
 0x182   :  { %3266 = vmatprep.subr.bf16.mxu0 %v4518_v53  ;;  %3352 = vmatprep.subr.bf16.mxu1 %v4521_v54  ;;  %v861_v53 = vrot.slane %v5525_v59, %v860_v47  ;;  %v4552_v54 = vld [vmem:[%s6354_s5 + $0x630] ss:$36 sps:$4 sm:$0xff]  }
 0x1f7   :  { %v1224_v2 = vpop.f32.mrb[8].mxu0  ;;  %v1267_v3 = vpop.f32.mrb[8].mxu1 }
 0x1f8   :  { %v1225_v4 = vadd.f32 %v1224_v2, %v833_v62  ;;  %v1268_v5 = vadd.f32 %v1267_v3, %v841_v63  ;;  %v1226_v6 = vpop.f32.mrb[9].mxu0  ;;  %v1269_v7 = vpop.f32.mrb[9].mxu1 }
 0x1f9   :  { %v1227_v8 = vadd.f32 %v1226_v6, %v837_v0  ;;  %v1270_v9 = vadd.f32 %v1269_v7, %v845_v1  ;;  %v1228_v10 = vpop.f32.mrb[10].mxu0  ;;  %v1271_v11 = vpop.f32.mrb[10].mxu1 }
 0x1fa   :  { %1362 = vst [vmem:[%s6357_s7] sm:$0xff] %v1225_v4  ;;  %1364 = vst [vmem:[%s6357_s7 + $0x10] sm:$0xff] %v1268_v5  ;;  %v1229_v12 = vadd.f32 %v1228_v10, %v833_v62  ;;  %v1272_v13 = vadd.f32 %v1271_v11, %v841_v63  ;;  %v1230_v14 = vpop.f32.mrb[11].mxu0  ;;  %v1273_v15 = vpop.f32.mrb[11].mxu1  ;;  %v4560_v62 = vld [vmem:[%s6354_s5 + $0x67c] ss:$36 sps:$4 sm:$0xff]  }
 0x1fb   :  { %1363 = vst [vmem:[%s6357_s7 + $0x8] sm:$0xff] %v1227_v8  ;;  %1365 = vst [vmem:[%s6357_s7 + $0x18] sm:$0xff] %v1270_v9  ;;  %v1231_v16 = vadd.f32 %v1230_v14, %v837_v0  ;;  %v1274_v17 = vadd.f32 %v1273_v15, %v845_v1  ;;  %v4563_v63 = vld [vmem:[%s6354_s5 + $0x684] ss:$36 sps:$4 sm:$0xff]  }
 0x1fc   :  { %1366 = vst [vmem:[%s6357_s7 + $0x20] sm:$0xff] %v1229_v12  ;;  %v5556_v18 = vpack.c.bf16 %v1229_v12, %v1225_v4  ;;  %1368 = vst [vmem:[%s6357_s7 + $0x30] sm:$0xff] %v1272_v13  ;;  %v5561_v19 = vpack.c.bf16 %v1272_v13, %v1268_v5  ;;  %v4561_v10 = vld [vmem:[%s6354_s5 + $0x680] ss:$36 sps:$4 sm:$0xff]  }
 0x1fd   :  { %1367 = vst [vmem:[%s6357_s7 + $0x28] sm:$0xff] %v1231_v16  ;;  %v5566_v20 = vpack.c.bf16 %v1231_v16, %v1227_v8  ;;  %1369 = vst [vmem:[%s6357_s7 + $0x38] sm:$0xff] %v1274_v17  ;;  %v5571_v21 = vpack.c.bf16 %v1274_v17, %v1270_v9  ;;  %v4558_v9 = vld [vmem:[%s6354_s5 + $0x678] ss:$36 sps:$4 sm:$0xff]   ;;  %v4566_v15 = vld [vmem:[%s6354_s5 + $0x6c4] ss:$36 sps:$4 sm:$0xff]  }
 0x1fe   :  { %v4569_v16 = vld [vmem:[%s6354_s5 + $0x6cc] ss:$36 sps:$4 sm:$0xff]  }
 0x1ff   :  { %3255 = vmatprep.mubr.bf16.mxu0 %v5566_v20  ;;  %3341 = vmatprep.mubr.bf16.mxu1 %v5566_v20 }
 0x200   :  { %3256 = vmatmul.mubr.bf16.vlgmr.msra.gmra.mrb[16].mxu0 %v5556_v18  ;;  %3342 = vmatmul.mubr.bf16.vlgmr.msra.gmra.mrb[16].mxu1 %v5556_v18 }
 0x201   :  { %3267 = vmatpush1.bf16.msra.mxu0 %v4516_v22  ;;  %3353 = vmatpush1.bf16.msra.mxu1 %v4519_v23  ;;  %v4564_v23 = vld [vmem:[%s6354_s5 + $0x6c0] ss:$36 sps:$4 sm:$0xff]  }
 0x202   :  { %3298 = vmatprep.mubr.bf16.mxu0 %v5571_v21  ;;  %3384 = vmatprep.mubr.bf16.mxu1 %v5571_v21 }
 0x203   :  { %3268 = vmatprep.subr.bf16.mxu0 %v4524_v24  ;;  %3354 = vmatprep.subr.bf16.mxu1 %v4527_v25  ;;  %v4567_v24 = vld [vmem:[%s6354_s5 + $0x6c8] ss:$36 sps:$4 sm:$0xff]  }
 0x204   :  { %v4572_v25 = vld [vmem:[%s6354_s5 + $0x70c] ss:$36 sps:$4 sm:$0xff]  }
 0x205   :  { %3269 = vmatpush1.bf16.msra.mxu0 %v4522_v26  ;;  %3355 = vmatpush1.bf16.msra.mxu1 %v4525_v27  ;;  %v4575_v26 = vld [vmem:[%s6354_s5 + $0x714] ss:$36 sps:$4 sm:$0xff]   ;;  %v4570_v27 = vld [vmem:[%s6354_s5 + $0x708] ss:$36 sps:$4 sm:$0xff]  }
 0x206   :  { %3270 = vmatprep.subr.bf16.mxu0 %v4530_v28  ;;  %3356 = vmatprep.subr.bf16.mxu1 %v4533_v29  ;;  %v4573_v28 = vld [vmem:[%s6354_s5 + $0x710] ss:$36 sps:$4 sm:$0xff]  }
 0x207   :  { %v4578_v29 = vld [vmem:[%s6354_s5 + $0x754] ss:$36 sps:$4 sm:$0xff]  }
 0x209   :  { %3271 = vmatpush1.bf16.msra.mxu0 %v4528_v30  ;;  %3357 = vmatpush1.bf16.msra.mxu1 %v4531_v31  ;;  %v4581_v30 = vld [vmem:[%s6354_s5 + $0x75c] ss:$36 sps:$4 sm:$0xff]   ;;  %v4576_v31 = vld [vmem:[%s6354_s5 + $0x750] ss:$36 sps:$4 sm:$0xff]  }
 0x20a   :  { %3272 = vmatprep.subr.bf16.mxu0 %v4536_v32  ;;  %3358 = vmatprep.subr.bf16.mxu1 %v4539_v33  ;;  %v4579_v32 = vld [vmem:[%s6354_s5 + $0x758] ss:$36 sps:$4 sm:$0xff]  }
 0x20b   :  { %v4584_v33 = vld [vmem:[%s6354_s5 + $0x79c] ss:$36 sps:$4 sm:$0xff]  }
 0x20d   :  { %3273 = vmatpush1.bf16.msra.mxu0 %v4534_v34  ;;  %3359 = vmatpush1.bf16.msra.mxu1 %v4537_v35  ;;  %v4587_v34 = vld [vmem:[%s6354_s5 + $0x7a4] ss:$36 sps:$4 sm:$0xff]   ;;  %v4582_v35 = vld [vmem:[%s6354_s5 + $0x798] ss:$36 sps:$4 sm:$0xff]  }
 0x20e   :  { %3274 = vmatprep.subr.bf16.mxu0 %v4542_v36  ;;  %3360 = vmatprep.subr.bf16.mxu1 %v4545_v37  ;;  %v4585_v36 = vld [vmem:[%s6354_s5 + $0x7a0] ss:$36 sps:$4 sm:$0xff]  }
 0x20f   :  { %v4590_v37 = vld [vmem:[%s6354_s5 + $0x7e4] ss:$36 sps:$4 sm:$0xff]  }
 0x211   :  { %3275 = vmatpush1.bf16.msra.mxu0 %v4540_v38  ;;  %3361 = vmatpush1.bf16.msra.mxu1 %v4543_v39  ;;  %v4593_v38 = vld [vmem:[%s6354_s5 + $0x7ec] ss:$36 sps:$4 sm:$0xff]   ;;  %v4588_v39 = vld [vmem:[%s6354_s5 + $0x7e0] ss:$36 sps:$4 sm:$0xff]  }
 0x212   :  { %3276 = vmatprep.subr.bf16.mxu0 %v4548_v40  ;;  %3362 = vmatprep.subr.bf16.mxu1 %v4551_v41  ;;  %v4591_v40 = vld [vmem:[%s6354_s5 + $0x7e8] ss:$36 sps:$4 sm:$0xff]  }
 0x213   :  { %v4596_v41 = vld [vmem:[%s6354_s5 + $0x82c] ss:$36 sps:$4 sm:$0xff]  }
 0x215   :  { %3277 = vmatpush1.bf16.msra.mxu0 %v4546_v44  ;;  %3363 = vmatpush1.bf16.msra.mxu1 %v4549_v45  ;;  %v4599_v44 = vld [vmem:[%s6354_s5 + $0x834] ss:$36 sps:$4 sm:$0xff]   ;;  %v4594_v45 = vld [vmem:[%s6354_s5 + $0x828] ss:$36 sps:$4 sm:$0xff]  }
 0x216   :  { %3278 = vmatprep.subr.bf16.mxu0 %v4554_v48  ;;  %3364 = vmatprep.subr.bf16.mxu1 %v4557_v49  ;;  %v4597_v48 = vld [vmem:[%s6354_s5 + $0x830] ss:$36 sps:$4 sm:$0xff]  }
 0x217   :  { %v1310_v0 = vpop.f32.mrb[12].mxu0  ;;  %v1353_v59 = vpop.f32.mrb[12].mxu1  ;;  %v4602_v49 = vld [vmem:[%s6354_s5 + $0x874] ss:$36 sps:$4 sm:$0xff]  }
 0x218   :  { %v1311_v1 = vadd.f32 %v1310_v0, %v849_v50  ;;  %v1354_v2 = vadd.f32 %v1353_v59, %v857_v51  ;;  %v1312_v3 = vpop.f32.mrb[13].mxu0  ;;  %v1355_v4 = vpop.f32.mrb[13].mxu1  ;;  %v4617_v0 = vld [vmem:[%s6354_s5 + $0x1c] ss:$36 sps:$4 sm:$0xff]   ;;  %v4612_v59 = vld [vmem:[%s6354_s5 + $0x10] ss:$36 sps:$4 sm:$0xff]  }
 0x219   :  { %v1313_v5 = vadd.f32 %v1312_v3, %v853_v52  ;;  %v1356_v6 = vadd.f32 %v1355_v4, %v861_v53  ;;  %v1314_v7 = vpop.f32.mrb[14].mxu0  ;;  %v1357_v8 = vpop.f32.mrb[14].mxu1  ;;  %3279 = vmatpush1.bf16.msra.mxu0 %v4552_v54  ;;  %3365 = vmatpush1.bf16.msra.mxu1 %v4555_v55  ;;  %v4611_v54 = vld [vmem:[%s6354_s5 + $0x8c4] ss:$36 sps:$4 sm:$0xff]   ;;  %v4606_v55 = vld [vmem:[%s6354_s5 + $0x8b8] ss:$36 sps:$4 sm:$0xff]  }
 0x21a   :  { %1370 = vst [vmem:[%s6358_s8] sm:$0xff] %v1311_v1  ;;  %1372 = vst [vmem:[%s6358_s8 + $0x10] sm:$0xff] %v1354_v2  ;;  %v1315_v11 = vadd.f32 %v1314_v7, %v849_v50  ;;  %v1358_v12 = vadd.f32 %v1357_v8, %v857_v51  ;;  %v1316_v13 = vpop.f32.mrb[15].mxu0  ;;  %v1359_v14 = vpop.f32.mrb[15].mxu1  ;;  %3280 = vmatprep.subr.bf16.mxu0 %v4560_v62  ;;  %3366 = vmatprep.subr.bf16.mxu1 %v4563_v63  ;;  %v4605_v50 = vld [vmem:[%s6354_s5 + $0x87c] ss:$36 sps:$4 sm:$0xff]  }
 0x21b   :  { %1371 = vst [vmem:[%s6358_s8 + $0x8] sm:$0xff] %v1313_v5  ;;  %1373 = vst [vmem:[%s6358_s8 + $0x18] sm:$0xff] %v1356_v6  ;;  %v1317_v17 = vadd.f32 %v1316_v13, %v853_v52  ;;  %v1360_v22 = vadd.f32 %v1359_v14, %v861_v53  ;;  %v4600_v51 = vld [vmem:[%s6354_s5 + $0x870] ss:$36 sps:$4 sm:$0xff]   ;;  %v4603_v52 = vld [vmem:[%s6354_s5 + $0x878] ss:$36 sps:$4 sm:$0xff]  }
 0x21c   :  { %1374 = vst [vmem:[%s6358_s8 + $0x20] sm:$0xff] %v1315_v11  ;;  %1376 = vst [vmem:[%s6358_s8 + $0x30] sm:$0xff] %v1358_v12  ;;  %v4608_v53 = vld [vmem:[%s6354_s5 + $0x8bc] ss:$36 sps:$4 sm:$0xff]   ;;  %v4614_v63 = vld [vmem:[%s6354_s5 + $0x14] ss:$36 sps:$4 sm:$0xff]  }
 0x21d   :  { %1375 = vst [vmem:[%s6358_s8 + $0x28] sm:$0xff] %v1317_v17  ;;  %1377 = vst [vmem:[%s6358_s8 + $0x38] sm:$0xff] %v1360_v22  ;;  %3281 = vmatpush1.bf16.msra.mxu0 %v4558_v9  ;;  %3367 = vmatpush1.bf16.msra.mxu1 %v4561_v10  ;;  %v4609_v62 = vld [vmem:[%s6354_s5 + $0x8c0] ss:$36 sps:$4 sm:$0xff]   ;;  %v4615_v1 = vld [vmem:[%s6354_s5 + $0x18] ss:$36 sps:$4 sm:$0xff]  }
 0x21e   :  { %3282 = vmatprep.subr.bf16.mxu0 %v4566_v15  ;;  %3368 = vmatprep.subr.bf16.mxu1 %v4569_v16  ;;  %v4620_v2 = vld [vmem:[%s6354_s5 + $0x5c] ss:$36 sps:$4 sm:$0xff]   ;;  %v4623_v3 = vld [vmem:[%s6354_s5 + $0x64] ss:$36 sps:$4 sm:$0xff]   ;;  %v4629_v7 = vld [vmem:[%s6354_s5 + $0xac] ss:$36 sps:$4 sm:$0xff]  }
 0x21f   :  { %v4618_v4 = vld [vmem:[%s6354_s5 + $0x58] ss:$36 sps:$4 sm:$0xff]   ;;  %v4621_v5 = vld [vmem:[%s6354_s5 + $0x60] ss:$36 sps:$4 sm:$0xff]   ;;  %v4627_v9 = vld [vmem:[%s6354_s5 + $0xa8] ss:$36 sps:$4 sm:$0xff]  }
 0x220   :  { %v4626_v6 = vld [vmem:[%s6354_s5 + $0xa4] ss:$36 sps:$4 sm:$0xff]   ;;  %v4632_v10 = vld [vmem:[%s6354_s5 + $0xec] ss:$36 sps:$4 sm:$0xff]   ;;  %v4635_v11 = vld [vmem:[%s6354_s5 + $0xf4] ss:$36 sps:$4 sm:$0xff]  }
 0x221   :  { %3283 = vmatpush1.bf16.msra.mxu0 %v4564_v23  ;;  %3369 = vmatpush1.bf16.msra.mxu1 %v4567_v24  ;;  %v4624_v8 = vld [vmem:[%s6354_s5 + $0xa0] ss:$36 sps:$4 sm:$0xff]   ;;  %v4630_v12 = vld [vmem:[%s6354_s5 + $0xe8] ss:$36 sps:$4 sm:$0xff]   ;;  %v4633_v13 = vld [vmem:[%s6354_s5 + $0xf0] ss:$36 sps:$4 sm:$0xff]  }
 0x222   :  { %3284 = vmatprep.subr.bf16.mxu0 %v4572_v25  ;;  %3370 = vmatprep.subr.bf16.mxu1 %v4575_v26  ;;  %v4638_v14 = vld [vmem:[%s6354_s5 + $0x134] ss:$36 sps:$4 sm:$0xff]   ;;  %v4641_v15 = vld [vmem:[%s6354_s5 + $0x13c] ss:$36 sps:$4 sm:$0xff]   ;;  %v4647_v23 = vld [vmem:[%s6354_s5 + $0x184] ss:$36 sps:$4 sm:$0xff]  }
 0x223   :  { %v4636_v16 = vld [vmem:[%s6354_s5 + $0x130] ss:$36 sps:$4 sm:$0xff]   ;;  %v4639_v17 = vld [vmem:[%s6354_s5 + $0x138] ss:$36 sps:$4 sm:$0xff]   ;;  %v4645_v25 = vld [vmem:[%s6354_s5 + $0x180] ss:$36 sps:$4 sm:$0xff]  }
 0x224   :  { %v4644_v22 = vld [vmem:[%s6354_s5 + $0x17c] ss:$36 sps:$4 sm:$0xff]   ;;  %v4650_v26 = vld [vmem:[%s6354_s5 + $0x1c4] ss:$36 sps:$4 sm:$0xff]  }
 0x225   :  { %3285 = vmatpush1.bf16.msra.mxu0 %v4570_v27  ;;  %3371 = vmatpush1.bf16.msra.mxu1 %v4573_v28  ;;  %v4642_v24 = vld [vmem:[%s6354_s5 + $0x178] ss:$36 sps:$4 sm:$0xff]   ;;  %v4653_v27 = vld [vmem:[%s6354_s5 + $0x1cc] ss:$36 sps:$4 sm:$0xff]   ;;  %v4648_v28 = vld [vmem:[%s6354_s5 + $0x1c0] ss:$36 sps:$4 sm:$0xff]  }
 0x226   :  { %3286 = vmatprep.subr.bf16.mxu0 %v4578_v29  ;;  %3372 = vmatprep.subr.bf16.mxu1 %v4581_v30  ;;  %v4651_v29 = vld [vmem:[%s6354_s5 + $0x1c8] ss:$36 sps:$4 sm:$0xff]  }
 0x227   :  { %v4656_v30 = vld [vmem:[%s6354_s5 + $0x20c] ss:$36 sps:$4 sm:$0xff]  }
 0x229   :  { %3287 = vmatpush1.bf16.msra.mxu0 %v4576_v31  ;;  %3373 = vmatpush1.bf16.msra.mxu1 %v4579_v32  ;;  %v4659_v31 = vld [vmem:[%s6354_s5 + $0x214] ss:$36 sps:$4 sm:$0xff]   ;;  %v4654_v32 = vld [vmem:[%s6354_s5 + $0x208] ss:$36 sps:$4 sm:$0xff]  }
 0x22a   :  { %3288 = vmatprep.subr.bf16.mxu0 %v4584_v33  ;;  %3374 = vmatprep.subr.bf16.mxu1 %v4587_v34  ;;  %v4657_v33 = vld [vmem:[%s6354_s5 + $0x210] ss:$36 sps:$4 sm:$0xff]  }
 0x22b   :  { %v4662_v34 = vld [vmem:[%s6354_s5 + $0x254] ss:$36 sps:$4 sm:$0xff]  }
 0x22d   :  { %3289 = vmatpush1.bf16.msra.mxu0 %v4582_v35  ;;  %3375 = vmatpush1.bf16.msra.mxu1 %v4585_v36  ;;  %v4665_v35 = vld [vmem:[%s6354_s5 + $0x25c] ss:$36 sps:$4 sm:$0xff]   ;;  %v4660_v36 = vld [vmem:[%s6354_s5 + $0x250] ss:$36 sps:$4 sm:$0xff]  }
 0x22e   :  { %3290 = vmatprep.subr.bf16.mxu0 %v4590_v37  ;;  %3376 = vmatprep.subr.bf16.mxu1 %v4593_v38  ;;  %v4663_v37 = vld [vmem:[%s6354_s5 + $0x258] ss:$36 sps:$4 sm:$0xff]  }
 0x22f   :  { %v4668_v38 = vld [vmem:[%s6354_s5 + $0x29c] ss:$36 sps:$4 sm:$0xff]  }
 0x231   :  { %3291 = vmatpush1.bf16.msra.mxu0 %v4588_v39  ;;  %3377 = vmatpush1.bf16.msra.mxu1 %v4591_v40  ;;  %v4671_v39 = vld [vmem:[%s6354_s5 + $0x2a4] ss:$36 sps:$4 sm:$0xff]   ;;  %v4666_v40 = vld [vmem:[%s6354_s5 + $0x298] ss:$36 sps:$4 sm:$0xff]  }
 0x232   :  { %3292 = vmatprep.subr.bf16.mxu0 %v4596_v41  ;;  %3378 = vmatprep.subr.bf16.mxu1 %v4599_v44  ;;  %v4669_v41 = vld [vmem:[%s6354_s5 + $0x2a0] ss:$36 sps:$4 sm:$0xff]  }
 0x233   :  { %v4674_v44 = vld [vmem:[%s6354_s5 + $0x2e4] ss:$36 sps:$4 sm:$0xff]  }
 0x235   :  { %3293 = vmatpush1.bf16.msra.mxu0 %v4594_v45  ;;  %3379 = vmatpush1.bf16.msra.mxu1 %v4597_v48  ;;  %v4677_v45 = vld [vmem:[%s6354_s5 + $0x2ec] ss:$36 sps:$4 sm:$0xff]   ;;  %v4672_v48 = vld [vmem:[%s6354_s5 + $0x2e0] ss:$36 sps:$4 sm:$0xff]  }
 0x236   :  { %3294 = vmatprep.subr.bf16.mxu0 %v4602_v49  ;;  %3380 = vmatprep.subr.bf16.mxu1 %v4605_v50  ;;  %v4675_v49 = vld [vmem:[%s6354_s5 + $0x2e8] ss:$36 sps:$4 sm:$0xff]  }
 0x237   :  { %v4680_v50 = vld [vmem:[%s6354_s5 + $0x32c] ss:$36 sps:$4 sm:$0xff]  }
 0x239   :  { %3295 = vmatpush1.bf16.msra.mxu0 %v4600_v51  ;;  %3381 = vmatpush1.bf16.msra.mxu1 %v4603_v52  ;;  %v4683_v51 = vld [vmem:[%s6354_s5 + $0x334] ss:$36 sps:$4 sm:$0xff]   ;;  %v4678_v52 = vld [vmem:[%s6354_s5 + $0x328] ss:$36 sps:$4 sm:$0xff]  }
 0x23a   :  { %3296 = vmatprep.subr.bf16.mxu0 %v4608_v53  ;;  %3382 = vmatprep.subr.bf16.mxu1 %v4611_v54  ;;  %v4681_v53 = vld [vmem:[%s6354_s5 + $0x330] ss:$36 sps:$4 sm:$0xff]  }
 0x23b   :  { %v4686_v54 = vld [vmem:[%s6354_s5 + $0x374] ss:$36 sps:$4 sm:$0xff]  }
 0x23d   :  { %3297 = vmatpush1.bf16.msra.mxu0 %v4606_v55  ;;  %3383 = vmatpush1.bf16.msra.mxu1 %v4609_v62  ;;  %v4689_v55 = vld [vmem:[%s6354_s5 + $0x37c] ss:$36 sps:$4 sm:$0xff]   ;;  %v4684_v62 = vld [vmem:[%s6354_s5 + $0x370] ss:$36 sps:$4 sm:$0xff]  }
 0x23e   :  { %3395 = vmatprep.subr.bf16.mxu0 %v4614_v63  ;;  %3481 = vmatprep.subr.bf16.mxu1 %v4617_v0  ;;  %v4687_v63 = vld [vmem:[%s6354_s5 + $0x378] ss:$36 sps:$4 sm:$0xff]  }
 0x23f   :  { %v4692_v0 = vld [vmem:[%s6354_s5 + $0x3bc] ss:$36 sps:$4 sm:$0xff]  }
 0x240   :  { %3299 = vmatmul.mubr.bf16.vlgmr.msra.gmra.mrb[16].mxu0 %v5561_v19  ;;  %3385 = vmatmul.mubr.bf16.vlgmr.msra.gmra.mrb[16].mxu1 %v5561_v19 }
 0x241   :  { %3396 = vmatpush1.bf16.msra.mxu0 %v4612_v59  ;;  %3427 = vmatprep.mubr.bf16.mxu0 %v5566_v20  ;;  %v4695_v59 = vld [vmem:[%s6354_s5 + $0x3c4] ss:$36 sps:$4 sm:$0xff]  }
 0x242   :  { %3482 = vmatpush1.bf16.msra.mxu1 %v4615_v1  ;;  %3513 = vmatprep.mubr.bf16.mxu1 %v5566_v20  ;;  %v4690_v1 = vld [vmem:[%s6354_s5 + $0x3b8] ss:$36 sps:$4 sm:$0xff]  }
 0x243   :  { %3397 = vmatprep.subr.bf16.mxu0 %v4620_v2  ;;  %3483 = vmatprep.subr.bf16.mxu1 %v4623_v3  ;;  %v4693_v2 = vld [vmem:[%s6354_s5 + $0x3c0] ss:$36 sps:$4 sm:$0xff]  }
 0x244   :  { %v4698_v3 = vld [vmem:[%s6354_s5 + $0x404] ss:$36 sps:$4 sm:$0xff]  }
 0x245   :  { %3398 = vmatpush1.bf16.msra.mxu0 %v4618_v4  ;;  %v4701_v4 = vld [vmem:[%s6354_s5 + $0x40c] ss:$36 sps:$4 sm:$0xff]  }
 0x246   :  { %3484 = vmatpush1.bf16.msra.mxu1 %v4621_v5  ;;  %3399 = vmatprep.subr.bf16.mxu0 %v4626_v6  ;;  %v4696_v5 = vld [vmem:[%s6354_s5 + $0x400] ss:$36 sps:$4 sm:$0xff]   ;;  %v4699_v6 = vld [vmem:[%s6354_s5 + $0x408] ss:$36 sps:$4 sm:$0xff]  }
 0x247   :  { %3485 = vmatprep.subr.bf16.mxu1 %v4629_v7  ;;  %v4704_v7 = vld [vmem:[%s6354_s5 + $0x44c] ss:$36 sps:$4 sm:$0xff]  }
 0x249   :  { %3400 = vmatpush1.bf16.msra.mxu0 %v4624_v8  ;;  %v4707_v8 = vld [vmem:[%s6354_s5 + $0x454] ss:$36 sps:$4 sm:$0xff]  }
 0x24a   :  { %3486 = vmatpush1.bf16.msra.mxu1 %v4627_v9  ;;  %3401 = vmatprep.subr.bf16.mxu0 %v4632_v10  ;;  %v4702_v9 = vld [vmem:[%s6354_s5 + $0x448] ss:$36 sps:$4 sm:$0xff]   ;;  %v4705_v10 = vld [vmem:[%s6354_s5 + $0x450] ss:$36 sps:$4 sm:$0xff]  }
 0x24b   :  { %3487 = vmatprep.subr.bf16.mxu1 %v4635_v11  ;;  %v4710_v11 = vld [vmem:[%s6354_s5 + $0x494] ss:$36 sps:$4 sm:$0xff]  }
 0x24d   :  { %3402 = vmatpush1.bf16.msra.mxu0 %v4630_v12  ;;  %v4713_v12 = vld [vmem:[%s6354_s5 + $0x49c] ss:$36 sps:$4 sm:$0xff]  }
 0x24e   :  { %3488 = vmatpush1.bf16.msra.mxu1 %v4633_v13  ;;  %3403 = vmatprep.subr.bf16.mxu0 %v4638_v14  ;;  %v4708_v13 = vld [vmem:[%s6354_s5 + $0x490] ss:$36 sps:$4 sm:$0xff]   ;;  %v4711_v14 = vld [vmem:[%s6354_s5 + $0x498] ss:$36 sps:$4 sm:$0xff]  }
 0x24f   :  { %3489 = vmatprep.subr.bf16.mxu1 %v4641_v15  ;;  %v4716_v15 = vld [vmem:[%s6354_s5 + $0x4dc] ss:$36 sps:$4 sm:$0xff]  }
 0x251   :  { %3404 = vmatpush1.bf16.msra.mxu0 %v4636_v16  ;;  %v4719_v16 = vld [vmem:[%s6354_s5 + $0x4e4] ss:$36 sps:$4 sm:$0xff]  }
 0x252   :  { %3490 = vmatpush1.bf16.msra.mxu1 %v4639_v17  ;;  %3405 = vmatprep.subr.bf16.mxu0 %v4644_v22  ;;  %v4714_v17 = vld [vmem:[%s6354_s5 + $0x4d8] ss:$36 sps:$4 sm:$0xff]   ;;  %v4717_v22 = vld [vmem:[%s6354_s5 + $0x4e0] ss:$36 sps:$4 sm:$0xff]  }
 0x253   :  { %3491 = vmatprep.subr.bf16.mxu1 %v4647_v23  ;;  %v4722_v23 = vld [vmem:[%s6354_s5 + $0x524] ss:$36 sps:$4 sm:$0xff]  }
 0x255   :  { %3406 = vmatpush1.bf16.msra.mxu0 %v4642_v24  ;;  %v4725_v24 = vld [vmem:[%s6354_s5 + $0x52c] ss:$36 sps:$4 sm:$0xff]  }
 0x256   :  { %3492 = vmatpush1.bf16.msra.mxu1 %v4645_v25  ;;  %3407 = vmatprep.subr.bf16.mxu0 %v4650_v26  ;;  %v4720_v25 = vld [vmem:[%s6354_s5 + $0x520] ss:$36 sps:$4 sm:$0xff]   ;;  %v4723_v26 = vld [vmem:[%s6354_s5 + $0x528] ss:$36 sps:$4 sm:$0xff]  }
 0x257   :  { %3493 = vmatprep.subr.bf16.mxu1 %v4653_v27  ;;  %v4728_v27 = vld [vmem:[%s6354_s5 + $0x56c] ss:$36 sps:$4 sm:$0xff]  }
 0x259   :  { %3408 = vmatpush1.bf16.msra.mxu0 %v4648_v28  ;;  %v4731_v28 = vld [vmem:[%s6354_s5 + $0x574] ss:$36 sps:$4 sm:$0xff]  }
 0x25a   :  { %3494 = vmatpush1.bf16.msra.mxu1 %v4651_v29  ;;  %3409 = vmatprep.subr.bf16.mxu0 %v4656_v30  ;;  %v4726_v29 = vld [vmem:[%s6354_s5 + $0x568] ss:$36 sps:$4 sm:$0xff]   ;;  %v4729_v30 = vld [vmem:[%s6354_s5 + $0x570] ss:$36 sps:$4 sm:$0xff]  }
 0x25b   :  { %3495 = vmatprep.subr.bf16.mxu1 %v4659_v31  ;;  %v4734_v31 = vld [vmem:[%s6354_s5 + $0x5b4] ss:$36 sps:$4 sm:$0xff]  }
 0x25d   :  { %3410 = vmatpush1.bf16.msra.mxu0 %v4654_v32  ;;  %v4737_v32 = vld [vmem:[%s6354_s5 + $0x5bc] ss:$36 sps:$4 sm:$0xff]  }
 0x25e   :  { %3496 = vmatpush1.bf16.msra.mxu1 %v4657_v33  ;;  %3411 = vmatprep.subr.bf16.mxu0 %v4662_v34  ;;  %v4732_v33 = vld [vmem:[%s6354_s5 + $0x5b0] ss:$36 sps:$4 sm:$0xff]   ;;  %v4735_v34 = vld [vmem:[%s6354_s5 + $0x5b8] ss:$36 sps:$4 sm:$0xff]  }
 0x25f   :  { %3497 = vmatprep.subr.bf16.mxu1 %v4665_v35  ;;  %v4740_v35 = vld [vmem:[%s6354_s5 + $0x5fc] ss:$36 sps:$4 sm:$0xff]  }
 0x261   :  { %3412 = vmatpush1.bf16.msra.mxu0 %v4660_v36  ;;  %v4743_v36 = vld [vmem:[%s6354_s5 + $0x604] ss:$36 sps:$4 sm:$0xff]  }
 0x262   :  { %3498 = vmatpush1.bf16.msra.mxu1 %v4663_v37  ;;  %3413 = vmatprep.subr.bf16.mxu0 %v4668_v38  ;;  %v4738_v37 = vld [vmem:[%s6354_s5 + $0x5f8] ss:$36 sps:$4 sm:$0xff]   ;;  %v4741_v38 = vld [vmem:[%s6354_s5 + $0x600] ss:$36 sps:$4 sm:$0xff]  }
 0x263   :  { %3499 = vmatprep.subr.bf16.mxu1 %v4671_v39  ;;  %v4746_v39 = vld [vmem:[%s6354_s5 + $0x644] ss:$36 sps:$4 sm:$0xff]  }
 0x265   :  { %3414 = vmatpush1.bf16.msra.mxu0 %v4666_v40  ;;  %v4749_v40 = vld [vmem:[%s6354_s5 + $0x64c] ss:$36 sps:$4 sm:$0xff]  }
 0x266   :  { %3500 = vmatpush1.bf16.msra.mxu1 %v4669_v41  ;;  %3415 = vmatprep.subr.bf16.mxu0 %v4674_v44  ;;  %v4744_v41 = vld [vmem:[%s6354_s5 + $0x640] ss:$36 sps:$4 sm:$0xff]   ;;  %v4747_v44 = vld [vmem:[%s6354_s5 + $0x648] ss:$36 sps:$4 sm:$0xff]  }
 0x267   :  { %3501 = vmatprep.subr.bf16.mxu1 %v4677_v45  ;;  %v4752_v45 = vld [vmem:[%s6354_s5 + $0x68c] ss:$36 sps:$4 sm:$0xff]  }
 0x269   :  { %3416 = vmatpush1.bf16.msra.mxu0 %v4672_v48  ;;  %v4755_v48 = vld [vmem:[%s6354_s5 + $0x694] ss:$36 sps:$4 sm:$0xff]  }
 0x26a   :  { %3502 = vmatpush1.bf16.msra.mxu1 %v4675_v49  ;;  %3417 = vmatprep.subr.bf16.mxu0 %v4680_v50  ;;  %v4750_v49 = vld [vmem:[%s6354_s5 + $0x688] ss:$36 sps:$4 sm:$0xff]   ;;  %v4753_v50 = vld [vmem:[%s6354_s5 + $0x690] ss:$36 sps:$4 sm:$0xff]  }
 0x26b   :  { %3503 = vmatprep.subr.bf16.mxu1 %v4683_v51  ;;  %v4758_v51 = vld [vmem:[%s6354_s5 + $0x6d4] ss:$36 sps:$4 sm:$0xff]  }
 0x26d   :  { %3418 = vmatpush1.bf16.msra.mxu0 %v4678_v52  ;;  %v4761_v52 = vld [vmem:[%s6354_s5 + $0x6dc] ss:$36 sps:$4 sm:$0xff]  }
 0x26e   :  { %3504 = vmatpush1.bf16.msra.mxu1 %v4681_v53  ;;  %3419 = vmatprep.subr.bf16.mxu0 %v4686_v54  ;;  %v4756_v53 = vld [vmem:[%s6354_s5 + $0x6d0] ss:$36 sps:$4 sm:$0xff]   ;;  %v4759_v54 = vld [vmem:[%s6354_s5 + $0x6d8] ss:$36 sps:$4 sm:$0xff]  }
 0x26f   :  { %3505 = vmatprep.subr.bf16.mxu1 %v4689_v55  ;;  %v4764_v55 = vld [vmem:[%s6354_s5 + $0x71c] ss:$36 sps:$4 sm:$0xff]  }
 0x271   :  { %3420 = vmatpush1.bf16.msra.mxu0 %v4684_v62  ;;  %v4767_v62 = vld [vmem:[%s6354_s5 + $0x724] ss:$36 sps:$4 sm:$0xff]  }
 0x272   :  { %3506 = vmatpush1.bf16.msra.mxu1 %v4687_v63  ;;  %3421 = vmatprep.subr.bf16.mxu0 %v4692_v0  ;;  %v4762_v63 = vld [vmem:[%s6354_s5 + $0x718] ss:$36 sps:$4 sm:$0xff]   ;;  %v4765_v0 = vld [vmem:[%s6354_s5 + $0x720] ss:$36 sps:$4 sm:$0xff]  }
 0x273   :  { %3507 = vmatprep.subr.bf16.mxu1 %v4695_v59  ;;  %v4770_v59 = vld [vmem:[%s6354_s5 + $0x764] ss:$36 sps:$4 sm:$0xff]  }
 0x275   :  { %3422 = vmatpush1.bf16.msra.mxu0 %v4690_v1  ;;  %v4773_v1 = vld [vmem:[%s6354_s5 + $0x76c] ss:$36 sps:$4 sm:$0xff]  }
 0x276   :  { %3508 = vmatpush1.bf16.msra.mxu1 %v4693_v2  ;;  %3423 = vmatprep.subr.bf16.mxu0 %v4698_v3  ;;  %v4768_v2 = vld [vmem:[%s6354_s5 + $0x760] ss:$36 sps:$4 sm:$0xff]   ;;  %v4771_v3 = vld [vmem:[%s6354_s5 + $0x768] ss:$36 sps:$4 sm:$0xff]  }
 0x277   :  { %3509 = vmatprep.subr.bf16.mxu1 %v4701_v4  ;;  %v4776_v4 = vld [vmem:[%s6354_s5 + $0x7ac] ss:$36 sps:$4 sm:$0xff]  }
 0x279   :  { %3424 = vmatpush1.bf16.msra.mxu0 %v4696_v5  ;;  %v4779_v5 = vld [vmem:[%s6354_s5 + $0x7b4] ss:$36 sps:$4 sm:$0xff]  }
 0x27a   :  { %3510 = vmatpush1.bf16.msra.mxu1 %v4699_v6  ;;  %3425 = vmatprep.subr.bf16.mxu0 %v4704_v7  ;;  %v4774_v6 = vld [vmem:[%s6354_s5 + $0x7a8] ss:$36 sps:$4 sm:$0xff]   ;;  %v4777_v7 = vld [vmem:[%s6354_s5 + $0x7b0] ss:$36 sps:$4 sm:$0xff]  }
 0x27b   :  { %3511 = vmatprep.subr.bf16.mxu1 %v4707_v8  ;;  %v4782_v8 = vld [vmem:[%s6354_s5 + $0x7f4] ss:$36 sps:$4 sm:$0xff]  }
 0x27d   :  { %3426 = vmatpush1.bf16.msra.mxu0 %v4702_v9  ;;  %v4785_v9 = vld [vmem:[%s6354_s5 + $0x7fc] ss:$36 sps:$4 sm:$0xff]  }
 0x27e   :  { %3512 = vmatpush1.bf16.msra.mxu1 %v4705_v10  ;;  %3438 = vmatprep.subr.bf16.mxu0 %v4710_v11  ;;  %v4780_v10 = vld [vmem:[%s6354_s5 + $0x7f0] ss:$36 sps:$4 sm:$0xff]   ;;  %v4783_v11 = vld [vmem:[%s6354_s5 + $0x7f8] ss:$36 sps:$4 sm:$0xff]  }
 0x27f   :  { %3524 = vmatprep.subr.bf16.mxu1 %v4713_v12  ;;  %v4788_v12 = vld [vmem:[%s6354_s5 + $0x83c] ss:$36 sps:$4 sm:$0xff]  }
 0x280   :  { %3428 = vmatmul.mubr.bf16.vlgmr.msra.gmra.mrb[20].mxu0 %v5556_v18 }
 0x281   :  { %3514 = vmatmul.mubr.bf16.vlgmr.msra.gmra.mrb[20].mxu1 %v5556_v18  ;;  %3439 = vmatpush1.bf16.msra.mxu0 %v4708_v13  ;;  %v4791_v13 = vld [vmem:[%s6354_s5 + $0x844] ss:$36 sps:$4 sm:$0xff]  }
 0x282   :  { %3470 = vmatprep.mubr.bf16.mxu0 %v5571_v21  ;;  %3525 = vmatpush1.bf16.msra.mxu1 %v4711_v14  ;;  %v4786_v14 = vld [vmem:[%s6354_s5 + $0x838] ss:$36 sps:$4 sm:$0xff]  }
 0x283   :  { %3556 = vmatprep.mubr.bf16.mxu1 %v5571_v21  ;;  %3440 = vmatprep.subr.bf16.mxu0 %v4716_v15  ;;  %v4789_v15 = vld [vmem:[%s6354_s5 + $0x840] ss:$36 sps:$4 sm:$0xff]  }
 0x284   :  { %3526 = vmatprep.subr.bf16.mxu1 %v4719_v16  ;;  %v4794_v16 = vld [vmem:[%s6354_s5 + $0x884] ss:$36 sps:$4 sm:$0xff]  }
 0x285   :  { %3441 = vmatpush1.bf16.msra.mxu0 %v4714_v17  ;;  %v4797_v17 = vld [vmem:[%s6354_s5 + $0x88c] ss:$36 sps:$4 sm:$0xff]  }
 0x286   :  { %3527 = vmatpush1.bf16.msra.mxu1 %v4717_v22  ;;  %3442 = vmatprep.subr.bf16.mxu0 %v4722_v23  ;;  %v4792_v22 = vld [vmem:[%s6354_s5 + $0x880] ss:$36 sps:$4 sm:$0xff]   ;;  %v4795_v23 = vld [vmem:[%s6354_s5 + $0x888] ss:$36 sps:$4 sm:$0xff]  }
 0x287   :  { %3528 = vmatprep.subr.bf16.mxu1 %v4725_v24  ;;  %v4800_v24 = vld [vmem:[%s6354_s5 + $0x8cc] ss:$36 sps:$4 sm:$0xff]  }
 0x289   :  { %3443 = vmatpush1.bf16.msra.mxu0 %v4720_v25  ;;  %v4803_v25 = vld [vmem:[%s6354_s5 + $0x8d4] ss:$36 sps:$4 sm:$0xff]  }
 0x28a   :  { %3529 = vmatpush1.bf16.msra.mxu1 %v4723_v26  ;;  %3444 = vmatprep.subr.bf16.mxu0 %v4728_v27  ;;  %v4798_v26 = vld [vmem:[%s6354_s5 + $0x8c8] ss:$36 sps:$4 sm:$0xff]   ;;  %v4801_v27 = vld [vmem:[%s6354_s5 + $0x8d0] ss:$36 sps:$4 sm:$0xff]  }
 0x28b   :  { %3530 = vmatprep.subr.bf16.mxu1 %v4731_v28  ;;  %v4804_v28 = vld [vmem:[%s6354_s5 + $0x260] ss:$36 sps:$4 sm:$0xff]  }
 0x28d   :  { %3445 = vmatpush1.bf16.msra.mxu0 %v4726_v29  ;;  %v4805_v29 = vld [vmem:[%s6354_s5 + $0x6e0] ss:$36 sps:$4 sm:$0xff]  }
 0x28e   :  { %3531 = vmatpush1.bf16.msra.mxu1 %v4729_v30  ;;  %3446 = vmatprep.subr.bf16.mxu0 %v4734_v31  ;;  %v4806_v30 = vld [vmem:[%s6354_s5 + $0x20] ss:$36 sps:$4 sm:$0xff]  }
 0x28f   :  { %3532 = vmatprep.subr.bf16.mxu1 %v4737_v32  ;;  %v4807_v31 = vld [vmem:[%s6354_s5 + $0x4a0] ss:$36 sps:$4 sm:$0xff]   ;;  %v4808_v32 = vld [vmem:[%s6354_s5 + $0x2a8] ss:$36 sps:$4 sm:$0xff]  }
 0x291   :  { %3447 = vmatpush1.bf16.msra.mxu0 %v4732_v33  ;;  %v4809_v33 = vld [vmem:[%s6354_s5 + $0x728] ss:$36 sps:$4 sm:$0xff]  }
 0x292   :  { %3533 = vmatpush1.bf16.msra.mxu1 %v4735_v34  ;;  %3448 = vmatprep.subr.bf16.mxu0 %v4740_v35  ;;  %v4810_v34 = vld [vmem:[%s6354_s5 + $0x68] ss:$36 sps:$4 sm:$0xff]  }
 0x293   :  { %3534 = vmatprep.subr.bf16.mxu1 %v4743_v36  ;;  %v4811_v35 = vld [vmem:[%s6354_s5 + $0x4e8] ss:$36 sps:$4 sm:$0xff]   ;;  %v4812_v36 = vld [vmem:[%s6354_s5 + $0x2f0] ss:$36 sps:$4 sm:$0xff]  }
 0x295   :  { %3449 = vmatpush1.bf16.msra.mxu0 %v4738_v37  ;;  %v4813_v37 = vld [vmem:[%s6354_s5 + $0x770] ss:$36 sps:$4 sm:$0xff]  }
 0x296   :  { %3535 = vmatpush1.bf16.msra.mxu1 %v4741_v38  ;;  %3450 = vmatprep.subr.bf16.mxu0 %v4746_v39  ;;  %v4815_v38 = vld [vmem:[%s6354_s5 + $0x530] ss:$36 sps:$4 sm:$0xff]   ;;  %v4817_v39 = vld [vmem:[%s6354_s5 + $0x7b8] ss:$36 sps:$4 sm:$0xff]  }
 0x297   :  { %3536 = vmatprep.subr.bf16.mxu1 %v4749_v40  ;;  %v4818_v40 = vld [vmem:[%s6354_s5 + $0xf8] ss:$36 sps:$4 sm:$0xff]  }
 0x299   :  { %3451 = vmatpush1.bf16.msra.mxu0 %v4744_v41  ;;  %v4819_v41 = vld [vmem:[%s6354_s5 + $0x578] ss:$36 sps:$4 sm:$0xff]  }
 0x29a   :  { %3537 = vmatpush1.bf16.msra.mxu1 %v4747_v44  ;;  %3452 = vmatprep.subr.bf16.mxu0 %v4752_v45  ;;  %v4820_v44 = vld [vmem:[%s6354_s5 + $0x380] ss:$36 sps:$4 sm:$0xff]  }
 0x29b   :  { %3538 = vmatprep.subr.bf16.mxu1 %v4755_v48  ;;  %v4821_v45 = vld [vmem:[%s6354_s5 + $0x800] ss:$36 sps:$4 sm:$0xff]  }
 0x29c   :  { %v4822_v48 = vld [vmem:[%s6354_s5 + $0x140] ss:$36 sps:$4 sm:$0xff]  }
 0x29d   :  { %3453 = vmatpush1.bf16.msra.mxu0 %v4750_v49  ;;  %v4823_v49 = vld [vmem:[%s6354_s5 + $0x5c0] ss:$36 sps:$4 sm:$0xff]  }
 0x29e   :  { %3539 = vmatpush1.bf16.msra.mxu1 %v4753_v50  ;;  %3454 = vmatprep.subr.bf16.mxu0 %v4758_v51  ;;  %v4824_v50 = vld [vmem:[%s6354_s5 + $0x3c8] ss:$36 sps:$4 sm:$0xff]  }
 0x29f   :  { %3540 = vmatprep.subr.bf16.mxu1 %v4761_v52  ;;  %v4825_v51 = vld [vmem:[%s6354_s5 + $0x848] ss:$36 sps:$4 sm:$0xff]  }
 0x2a0   :  { %v4826_v52 = vld [vmem:[%s6354_s5 + $0x188] ss:$36 sps:$4 sm:$0xff]  }
 0x2a1   :  { %3455 = vmatpush1.bf16.msra.mxu0 %v4756_v53  ;;  %v4827_v53 = vld [vmem:[%s6354_s5 + $0x608] ss:$36 sps:$4 sm:$0xff]  }
 0x2a2   :  { %3541 = vmatpush1.bf16.msra.mxu1 %v4759_v54  ;;  %3456 = vmatprep.subr.bf16.mxu0 %v4764_v55  ;;  %v4828_v54 = vld [vmem:[%s6354_s5 + $0x410] ss:$36 sps:$4 sm:$0xff]  }
 0x2a3   :  { %3542 = vmatprep.subr.bf16.mxu1 %v4767_v62  ;;  %v4829_v55 = vld [vmem:[%s6354_s5 + $0x890] ss:$36 sps:$4 sm:$0xff]  }
 0x2a4   :  { %v4830_v62 = vld [vmem:[%s6354_s5 + $0x1d0] ss:$36 sps:$4 sm:$0xff]  }
 0x2a5   :  { %3457 = vmatpush1.bf16.msra.mxu0 %v4762_v63  ;;  %v4831_v63 = vld [vmem:[%s6354_s5 + $0x650] ss:$36 sps:$4 sm:$0xff]  }
 0x2a6   :  { %3543 = vmatpush1.bf16.msra.mxu1 %v4765_v0  ;;  %3458 = vmatprep.subr.bf16.mxu0 %v4770_v59  ;;  %v4832_v0 = vld [vmem:[%s6354_s5 + $0x458] ss:$36 sps:$4 sm:$0xff]  }
 0x2a7   :  { %3544 = vmatprep.subr.bf16.mxu1 %v4773_v1  ;;  %v4833_v59 = vld [vmem:[%s6354_s5 + $0x8d8] ss:$36 sps:$4 sm:$0xff]  }
 0x2a8   :  { %v4834_v1 = vld [vmem:[%s6354_s5 + $0x218] ss:$36 sps:$4 sm:$0xff]  }
 0x2a9   :  { %3459 = vmatpush1.bf16.msra.mxu0 %v4768_v2  ;;  %v4835_v2 = vld [vmem:[%s6354_s5 + $0x698] ss:$36 sps:$4 sm:$0xff]  }
 0x2aa   :  { %3545 = vmatpush1.bf16.msra.mxu1 %v4771_v3  ;;  %3460 = vmatprep.subr.bf16.mxu0 %v4776_v4  ;;  %v1702_v3 = vld [vmem:[%s6359_s6] sm:$0xff] }
 0x2ab   :  { %3546 = vmatprep.subr.bf16.mxu1 %v4779_v5  ;;  %v1709_v4 = vrot.slane %v1702_v3, %v832_v57  ;;  %v1717_v5 = vrot.slane %v1702_v3, %v840_v58 }
 0x2ad   :  { %3461 = vmatpush1.bf16.msra.mxu0 %v4774_v6  ;;  %v1713_v6 = vrot.slane %v1702_v3, %v836_v60 }
 0x2ae   :  { %3547 = vmatpush1.bf16.msra.mxu1 %v4777_v7  ;;  %3462 = vmatprep.subr.bf16.mxu0 %v4782_v8  ;;  %v1721_v7 = vrot.slane %v1702_v3, %v844_v61 }
 0x2af   :  { %3548 = vmatprep.subr.bf16.mxu1 %v4785_v9 }
 0x2b1   :  { %3463 = vmatpush1.bf16.msra.mxu0 %v4780_v10 }
 0x2b2   :  { %3549 = vmatpush1.bf16.msra.mxu1 %v4783_v11  ;;  %3464 = vmatprep.subr.bf16.mxu0 %v4788_v12 }
 0x2b3   :  { %3550 = vmatprep.subr.bf16.mxu1 %v4791_v13 }
 0x2b5   :  { %3465 = vmatpush1.bf16.msra.mxu0 %v4786_v14 }
 0x2b6   :  { %3551 = vmatpush1.bf16.msra.mxu1 %v4789_v15  ;;  %3466 = vmatprep.subr.bf16.mxu0 %v4794_v16 }
 0x2b7   :  { %3552 = vmatprep.subr.bf16.mxu1 %v4797_v17 }
 0x2b9   :  { %3467 = vmatpush1.bf16.msra.mxu0 %v4792_v22 }
 0x2ba   :  { %3553 = vmatpush1.bf16.msra.mxu1 %v4795_v23  ;;  %3468 = vmatprep.subr.bf16.mxu0 %v4800_v24 }
 0x2bb   :  { %3554 = vmatprep.subr.bf16.mxu1 %v4803_v25 }
 0x2bd   :  { %3469 = vmatpush1.bf16.msra.mxu0 %v4798_v26 }
 0x2be   :  { %3555 = vmatpush1.bf16.msra.mxu1 %v4801_v27  ;;  %4279 = vmatprep.subr.bf16.mxu0 %v4804_v28 }
 0x2bf   :  { %4301 = vmatprep.subr.bf16.mxu1 %v4805_v29 }
 0x2c0   :  { %3471 = vmatmul.mubr.bf16.vlgmr.msra.gmra.mrb[20].mxu0 %v5561_v19 }
 0x2c1   :  { %3557 = vmatmul.mubr.bf16.vlgmr.msra.gmra.mrb[20].mxu1 %v5561_v19  ;;  %4280 = vmatpush3.bf16.msra.mxu0 %v4806_v30 }
 0x2c2   :  { %3599 = vmatprep.mubr.bf16.mxu0 %v5566_v20  ;;  %4302 = vmatpush3.bf16.msra.mxu1 %v4807_v31  ;;  %v4814_v20 = vld [vmem:[%s6354_s5 + $0xb0] ss:$36 sps:$4 sm:$0xff]  }
 0x2c3   :  { %3640 = vmatprep.mubr.bf16.mxu1 %v5571_v21  ;;  %4281 = vmatprep.subr.bf16.mxu0 %v4808_v32  ;;  %v4816_v21 = vld [vmem:[%s6354_s5 + $0x338] ss:$36 sps:$4 sm:$0xff]  }
 0x2c4   :  { %4303 = vmatprep.subr.bf16.mxu1 %v4809_v33 }
 0x2c5   :  { %4282 = vmatpush3.bf16.msra.mxu0 %v4810_v34  ;;  %v1725_v34 = vrot.slane %v1702_v3, %v848_v42 }
 0x2c6   :  { %4304 = vmatpush3.bf16.msra.mxu1 %v4811_v35  ;;  %4283 = vmatprep.subr.bf16.mxu0 %v4812_v36  ;;  %v1733_v35 = vrot.slane %v1702_v3, %v856_v43  ;;  %v1729_v36 = vrot.slane %v1702_v3, %v852_v46 }
 0x2c7   :  { %4305 = vmatprep.subr.bf16.mxu1 %v4813_v37  ;;  %v1737_v37 = vrot.slane %v1702_v3, %v860_v47 }
 0x2c9   :  { %4284 = vmatpush3.bf16.msra.mxu0 %v4814_v20 }
 0x2ca   :  { %4306 = vmatpush3.bf16.msra.mxu1 %v4815_v38  ;;  %4285 = vmatprep.subr.bf16.mxu0 %v4816_v21 }
 0x2cb   :  { %4307 = vmatprep.subr.bf16.mxu1 %v4817_v39 }
 0x2cd   :  { %4286 = vmatpush3.bf16.msra.mxu0 %v4818_v40 }
 0x2ce   :  { %4308 = vmatpush3.bf16.msra.mxu1 %v4819_v41  ;;  %4287 = vmatprep.subr.bf16.mxu0 %v4820_v44 }
 0x2cf   :  { %4309 = vmatprep.subr.bf16.mxu1 %v4821_v45 }
 0x2d1   :  { %4288 = vmatpush3.bf16.msra.mxu0 %v4822_v48 }
 0x2d2   :  { %4310 = vmatpush3.bf16.msra.mxu1 %v4823_v49  ;;  %4289 = vmatprep.subr.bf16.mxu0 %v4824_v50 }
 0x2d3   :  { %4311 = vmatprep.subr.bf16.mxu1 %v4825_v51 }
 0x2d5   :  { %4290 = vmatpush3.bf16.msra.mxu0 %v4826_v52 }
 0x2d6   :  { %4312 = vmatpush3.bf16.msra.mxu1 %v4827_v53  ;;  %4291 = vmatprep.subr.bf16.mxu0 %v4828_v54 }
 0x2d7   :  { %4313 = vmatprep.subr.bf16.mxu1 %v4829_v55 }
 0x2d9   :  { %4292 = vmatpush3.bf16.msra.mxu0 %v4830_v62 }
 0x2da   :  { %4314 = vmatpush3.bf16.msra.mxu1 %v4831_v63  ;;  %4293 = vmatprep.subr.bf16.mxu0 %v4832_v0 }
 0x2db   :  { %4315 = vmatprep.subr.bf16.mxu1 %v4833_v59 }
 0x2dd   :  { %4294 = vmatpush3.bf16.msra.mxu0 %v4834_v1 }
 0x2de   :  { %4316 = vmatpush3.bf16.msra.mxu1 %v4835_v2 }
 0x2e0   :  { %3600 = vmatmul.mubr.bf16.vlgmr.msra.gmra.mrb[24].mxu0 %v5556_v18 }
 0x2e1   :  { %3641 = vmatmul.mubr.bf16.vlgmr.msra.gmra.mrb[24].mxu1 %v5561_v19 }
 0x313   :  { %v3300_v8 = vpop.f32.mrb[16].mxu0  ;;  %v3386_v18 = vpop.f32.mrb[16].mxu1 }
 0x314   :  { %v4323_v9 = vadd.f32 %v3300_v8, %v1709_v4  ;;  %v4327_v19 = vadd.f32 %v3386_v18, %v1717_v5  ;;  %v3302_v10 = vpop.f32.mrb[17].mxu0  ;;  %v3388_v11 = vpop.f32.mrb[17].mxu1 }
 0x315   :  { %v4324_v12 = vadd.f32 %v3302_v10, %v1713_v6  ;;  %v4328_v13 = vadd.f32 %v3388_v11, %v1721_v7  ;;  %v3304_v14 = vpop.f32.mrb[18].mxu0  ;;  %v3390_v15 = vpop.f32.mrb[18].mxu1 }
 0x316   :  { %v3649_v57 = vmax.f32 %v4323_v9, 0.0  ;;  %v3651_v16 = vmax.f32 %v4327_v19, 0.0  ;;  %v4325_v17 = vadd.f32 %v3304_v14, %v1709_v4  ;;  %v4329_v58 = vadd.f32 %v3390_v15, %v1717_v5  ;;  %v3306_v22 = vpop.f32.mrb[19].mxu0  ;;  %v3392_v23 = vpop.f32.mrb[19].mxu1 }
 0x317   :  { %v3650_v60 = vmax.f32 %v4324_v12, 0.0  ;;  %v3652_v24 = vmax.f32 %v4328_v13, 0.0  ;;  %v4326_v25 = vadd.f32 %v3306_v22, %v1713_v6  ;;  %v4330_v61 = vadd.f32 %v3392_v23, %v1721_v7  ;;  %v3882_v6 = vld [vmem:[%s6359_s6 + $0x8] ss:$0 sm:$0xff] }
 0x318   :  { %v3658_v26 = vmax.f32 %v4325_v17, 0.0  ;;  %v3660_v27 = vmax.f32 %v4329_v58, 0.0 }
 0x319   :  { %v4181_v28 = vpack.c.bf16 %v3650_v60, %v3649_v57  ;;  %v4182_v29 = vpack.c.bf16 %v3652_v24, %v3651_v16  ;;  %v3659_v30 = vmax.f32 %v4326_v25, 0.0  ;;  %v3661_v31 = vmax.f32 %v4330_v61, 0.0 }
 0x31b   :  { %3723 = vst [vmem:[%s6360_s9] sm:$0xff] %v4181_v28  ;;  %3724 = vst [vmem:[%s6360_s9 + $0x8] sm:$0xff] %v4182_v29  ;;  %v4186_v32 = vpack.c.bf16 %v3659_v30, %v3658_v26  ;;  %v4187_v33 = vpack.c.bf16 %v3661_v31, %v3660_v27 }
 0x31d   :  { %3728 = vst [vmem:[%s6360_s9 + $0x24] sm:$0xff] %v4186_v32  ;;  %3729 = vst [vmem:[%s6360_s9 + $0x2c] sm:$0xff] %v4187_v33 }
 0x393   :  { %v3472_v20 = vpop.f32.mrb[20].mxu0 }
 0x394   :  { %v4331_v38 = vadd.f32 %v3472_v20, %v1725_v34  ;;  %v3558_v21 = vpop.f32.mrb[20].mxu1  ;;  %v3474_v39 = vpop.f32.mrb[21].mxu0 }
 0x395   :  { %v4335_v40 = vadd.f32 %v3558_v21, %v1733_v35  ;;  %v4332_v41 = vadd.f32 %v3474_v39, %v1729_v36  ;;  %v3560_v44 = vpop.f32.mrb[21].mxu1  ;;  %v3476_v45 = vpop.f32.mrb[22].mxu0 }
 0x396   :  { %v3653_v48 = vmax.f32 %v4331_v38, 0.0  ;;  %v4336_v49 = vadd.f32 %v3560_v44, %v1737_v37  ;;  %v4333_v42 = vadd.f32 %v3476_v45, %v1725_v34  ;;  %v3562_v50 = vpop.f32.mrb[22].mxu1  ;;  %v3478_v51 = vpop.f32.mrb[23].mxu0 }
 0x397   :  { %v3655_v43 = vmax.f32 %v4335_v40, 0.0  ;;  %v3654_v52 = vmax.f32 %v4332_v41, 0.0  ;;  %v4337_v53 = vadd.f32 %v3562_v50, %v1733_v35  ;;  %v4334_v46 = vadd.f32 %v3478_v51, %v1729_v36  ;;  %v3564_v54 = vpop.f32.mrb[23].mxu1 }
 0x398   :  { %v3656_v56 = vmax.f32 %v4336_v49, 0.0  ;;  %v3662_v47 = vmax.f32 %v4333_v42, 0.0  ;;  %v4338_v55 = vadd.f32 %v3564_v54, %v1737_v37 }
 0x399   :  { %v4183_v62 = vpack.c.bf16 %v3654_v52, %v3653_v48  ;;  %v3664_v63 = vmax.f32 %v4337_v53, 0.0  ;;  %v3663_v0 = vmax.f32 %v4334_v46, 0.0 }
 0x39a   :  { %v4184_v59 = vpack.c.bf16 %v3656_v56, %v3655_v43  ;;  %v3665_v1 = vmax.f32 %v4338_v55, 0.0 }
 0x39b   :  { %3725 = vst [vmem:[%s6360_s9 + $0x10] sm:$0xff] %v4183_v62  ;;  %v4188_v2 = vpack.c.bf16 %v3663_v0, %v3662_v47 }
 0x39c   :  { %3726 = vst [vmem:[%s6360_s9 + $0x18] sm:$0xff] %v4184_v59  ;;  %v4189_v3 = vpack.c.bf16 %v3665_v1, %v3664_v63 }
 0x39d   :  { %3730 = vst [vmem:[%s6360_s9 + $0x34] sm:$0xff] %v4188_v2 }
 0x39e   :  { %3731 = vst [vmem:[%s6360_s9 + $0x3c] sm:$0xff] %v4189_v3 }
 0x3b3   :  { %v4295_v4 = vpop.f32.mrb[24].mxu0 }
 0x3b4   :  { %v4317_v5 = vpop.f32.mrb[24].mxu1  ;;  %v4296_v7 = vpop.f32.mrb[25].mxu0 }
 0x3b5   :  { %v4297_v8 = vadd.f32 %v4296_v7, %v4295_v4  ;;  %v4318_v18 = vpop.f32.mrb[25].mxu1  ;;  %v4298_v9 = vpop.f32.mrb[26].mxu0 }
 0x3b6   :  { %v4319_v19 = vadd.f32 %v4318_v18, %v4317_v5  ;;  %v4320_v10 = vpop.f32.mrb[26].mxu1  ;;  %v4299_v11 = vpop.f32.mrb[27].mxu0 }
 0x3b7   :  { %v3602_v12 = vadd.f32 %v4297_v8, %v3882_v6  ;;  %v4300_v13 = vadd.f32 %v4299_v11, %v4298_v9  ;;  %v4321_v14 = vpop.f32.mrb[27].mxu1 }
 0x3b8   :  { %v4322_v15 = vadd.f32 %v4321_v14, %v4320_v10 }
 0x3b9   :  { %v3643_v57 = vadd.f32 %v4319_v19, %v3602_v12  ;;  %v3605_v16 = vadd.f32 %v4300_v13, %v3882_v6 }
 0x3bb   :  { %v3657_v17 = vmax.f32 %v3643_v57, 0.0  ;;  %v3646_v58 = vadd.f32 %v4322_v15, %v3605_v16 }
 0x3bd   :  { %v4185_v22 = vpack.c.bf16 %v3657_v17, %v3657_v17  ;;  %v3666_v23 = vmax.f32 %v3646_v58, 0.0 }
 0x3bf   :  { %3727 = vst [vmem:[%s6360_s9 + $0x20] sm:$0xf] %v4185_v22  ;;  %v4190_v60 = vpack.c.bf16 %v3666_v23, %v3666_v23 }
 0x3c1   :  { %3732 = vst [vmem:[%s6360_s9 + $0x44] sm:$0xf] %v4190_v60 }

// kernel: vae_forward.9
= control target key start
LH: loop header
LB: loop body
LE: loop exit
PB: predicated region body
PF: predicated region fallthrough
CT: control target
= control target key end

     0   :  { %v1015_v1 = vmov 0   ;;  %s1324_s1 = inlined_call_operand.vmem [shape: bf16[512,256], index: 1, kind: input, shape index: {}]   ;;  %s1325_s0 = inlined_call_operand.vmem [shape: bf16[64,512], index: 0, kind: input, shape index: {}]   ;;  %s1326_s2 = inlined_call_operand.vmem [shape: f32[64,1], index: 2, kind: input, shape index: {}]   ;;  %s1327_s3 = inlined_call_operand.vmem [shape: bf16[64,256], index: 3, kind: output, shape index: {}]  }
   0x1   :  { %v895_v0 = vld [vmem:[%s1324_s1 + $0x4] ss:$8 sps:$4 sm:$0xff]   ;;  %893 = vset.pattern.permute.xlu0 %v1015_v1  ;;  %894 = vset.pattern.permute.xlu1 %v1015_v1  ;;  %v899_v3 = vld [vmem:[%s1324_s1] ss:$8 sps:$4 sm:$0xff]   ;;  %v901_v5 = vld [vmem:[%s1324_s1 + $0x14] ss:$8 sps:$4 sm:$0xff]  }
   0x2   :  { %v897_v2 = vld [vmem:[%s1324_s1 + $0x104] ss:$8 sps:$4 sm:$0xff]   ;;  %542 = vmatprep.subr.bf16.mxu1 %v895_v0  ;;  %v900_v4 = vld [vmem:[%s1324_s1 + $0x100] ss:$8 sps:$4 sm:$0xff]   ;;  %v903_v6 = vld [vmem:[%s1324_s1 + $0x114] ss:$8 sps:$4 sm:$0xff]  }
   0x3   :  { %615 = vmatprep.subr.bf16.mxu0 %v897_v2  ;;  %543 = vmatpush1.bf16.msra.mxu1 %v899_v3  ;;  %v905_v7 = vld [vmem:[%s1324_s1 + $0x10] ss:$8 sps:$4 sm:$0xff]   ;;  %v907_v9 = vld [vmem:[%s1324_s1 + $0x24] ss:$8 sps:$4 sm:$0xff]   ;;  %v911_v11 = vld [vmem:[%s1324_s1 + $0x20] ss:$8 sps:$4 sm:$0xff]  }
   0x4   :  { %616 = vmatpush1.bf16.msra.mxu0 %v900_v4  ;;  %544 = vmatprep.subr.bf16.mxu1 %v901_v5  ;;  %v906_v8 = vld [vmem:[%s1324_s1 + $0x110] ss:$8 sps:$4 sm:$0xff]   ;;  %v909_v10 = vld [vmem:[%s1324_s1 + $0x124] ss:$8 sps:$4 sm:$0xff]   ;;  %v912_v12 = vld [vmem:[%s1324_s1 + $0x120] ss:$8 sps:$4 sm:$0xff]  }
   0x5   :  { %617 = vmatprep.subr.bf16.mxu0 %v903_v6  ;;  %v913_v13 = vld [vmem:[%s1324_s1 + $0x34] ss:$8 sps:$4 sm:$0xff]   ;;  %v917_v15 = vld [vmem:[%s1324_s1 + $0x30] ss:$8 sps:$4 sm:$0xff]   ;;  %v919_v17 = vld [vmem:[%s1324_s1 + $0x44] ss:$8 sps:$4 sm:$0xff]  }
   0x6   :  { %v915_v14 = vld [vmem:[%s1324_s1 + $0x134] ss:$8 sps:$4 sm:$0xff]   ;;  %v918_v16 = vld [vmem:[%s1324_s1 + $0x130] ss:$8 sps:$4 sm:$0xff]   ;;  %v921_v18 = vld [vmem:[%s1324_s1 + $0x144] ss:$8 sps:$4 sm:$0xff]  }
   0x7   :  { %545 = vmatpush1.bf16.msra.mxu1 %v905_v7  ;;  %v923_v19 = vld [vmem:[%s1324_s1 + $0x40] ss:$8 sps:$4 sm:$0xff]   ;;  %v925_v21 = vld [vmem:[%s1324_s1 + $0x54] ss:$8 sps:$4 sm:$0xff]   ;;  %v929_v23 = vld [vmem:[%s1324_s1 + $0x50] ss:$8 sps:$4 sm:$0xff]  }
   0x8   :  { %618 = vmatpush1.bf16.msra.mxu0 %v906_v8  ;;  %546 = vmatprep.subr.bf16.mxu1 %v907_v9  ;;  %v924_v20 = vld [vmem:[%s1324_s1 + $0x140] ss:$8 sps:$4 sm:$0xff]   ;;  %v927_v22 = vld [vmem:[%s1324_s1 + $0x154] ss:$8 sps:$4 sm:$0xff]   ;;  %v930_v24 = vld [vmem:[%s1324_s1 + $0x150] ss:$8 sps:$4 sm:$0xff]  }
   0x9   :  { %619 = vmatprep.subr.bf16.mxu0 %v909_v10  ;;  %v931_v25 = vld [vmem:[%s1324_s1 + $0x64] ss:$8 sps:$4 sm:$0xff]   ;;  %v935_v27 = vld [vmem:[%s1324_s1 + $0x60] ss:$8 sps:$4 sm:$0xff]   ;;  %v937_v29 = vld [vmem:[%s1324_s1 + $0x74] ss:$8 sps:$4 sm:$0xff]  }
   0xa   :  { %v933_v26 = vld [vmem:[%s1324_s1 + $0x164] ss:$8 sps:$4 sm:$0xff]   ;;  %v936_v28 = vld [vmem:[%s1324_s1 + $0x160] ss:$8 sps:$4 sm:$0xff]   ;;  %v939_v30 = vld [vmem:[%s1324_s1 + $0x174] ss:$8 sps:$4 sm:$0xff]  }
   0xb   :  { %547 = vmatpush1.bf16.msra.mxu1 %v911_v11  ;;  %v941_v31 = vld [vmem:[%s1324_s1 + $0x70] ss:$8 sps:$4 sm:$0xff]   ;;  %v943_v33 = vld [vmem:[%s1324_s1 + $0x84] ss:$8 sps:$4 sm:$0xff]   ;;  %v947_v35 = vld [vmem:[%s1324_s1 + $0x80] ss:$8 sps:$4 sm:$0xff]  }
   0xc   :  { %620 = vmatpush1.bf16.msra.mxu0 %v912_v12  ;;  %548 = vmatprep.subr.bf16.mxu1 %v913_v13  ;;  %v942_v32 = vld [vmem:[%s1324_s1 + $0x170] ss:$8 sps:$4 sm:$0xff]   ;;  %v945_v34 = vld [vmem:[%s1324_s1 + $0x184] ss:$8 sps:$4 sm:$0xff]   ;;  %v948_v36 = vld [vmem:[%s1324_s1 + $0x180] ss:$8 sps:$4 sm:$0xff]  }
   0xd   :  { %621 = vmatprep.subr.bf16.mxu0 %v915_v14  ;;  %v949_v37 = vld [vmem:[%s1324_s1 + $0x94] ss:$8 sps:$4 sm:$0xff]   ;;  %v953_v39 = vld [vmem:[%s1324_s1 + $0x90] ss:$8 sps:$4 sm:$0xff]   ;;  %v955_v41 = vld [vmem:[%s1324_s1 + $0xa4] ss:$8 sps:$4 sm:$0xff]  }
   0xe   :  { %v951_v38 = vld [vmem:[%s1324_s1 + $0x194] ss:$8 sps:$4 sm:$0xff]   ;;  %v954_v40 = vld [vmem:[%s1324_s1 + $0x190] ss:$8 sps:$4 sm:$0xff]   ;;  %v957_v42 = vld [vmem:[%s1324_s1 + $0x1a4] ss:$8 sps:$4 sm:$0xff]  }
   0xf   :  { %549 = vmatpush1.bf16.msra.mxu1 %v917_v15  ;;  %v959_v43 = vld [vmem:[%s1324_s1 + $0xa0] ss:$8 sps:$4 sm:$0xff]   ;;  %v961_v45 = vld [vmem:[%s1324_s1 + $0xb4] ss:$8 sps:$4 sm:$0xff]   ;;  %v965_v47 = vld [vmem:[%s1324_s1 + $0xb0] ss:$8 sps:$4 sm:$0xff]  }
  0x10   :  { %622 = vmatpush1.bf16.msra.mxu0 %v918_v16  ;;  %550 = vmatprep.subr.bf16.mxu1 %v919_v17  ;;  %v960_v44 = vld [vmem:[%s1324_s1 + $0x1a0] ss:$8 sps:$4 sm:$0xff]   ;;  %v963_v46 = vld [vmem:[%s1324_s1 + $0x1b4] ss:$8 sps:$4 sm:$0xff]   ;;  %v966_v48 = vld [vmem:[%s1324_s1 + $0x1b0] ss:$8 sps:$4 sm:$0xff]  }
  0x11   :  { %623 = vmatprep.subr.bf16.mxu0 %v921_v18  ;;  %v967_v49 = vld [vmem:[%s1324_s1 + $0xc4] ss:$8 sps:$4 sm:$0xff]   ;;  %v971_v53 = vld [vmem:[%s1324_s1 + $0xc0] ss:$8 sps:$4 sm:$0xff]   ;;  %v973_v55 = vld [vmem:[%s1324_s1 + $0xd4] ss:$8 sps:$4 sm:$0xff]  }
  0x12   :  { %v993_v50 = vld [vmem:[%s1325_s0 + $0x4] ss:$16 sps:$4 sm:$0xff]   ;;  %v996_v52 = vld [vmem:[%s1325_s0 + $0xc] ss:$16 sps:$4 sm:$0xff]   ;;  %v972_v54 = vld [vmem:[%s1324_s1 + $0x1c0] ss:$8 sps:$4 sm:$0xff]  }
  0x13   :  { %551 = vmatpush1.bf16.msra.mxu1 %v923_v19  ;;  %v969_v51 = vld [vmem:[%s1324_s1 + $0x1c4] ss:$8 sps:$4 sm:$0xff]   ;;  %574 = vmatprep.mubr.bf16.mxu1 %v993_v50  ;;  %v975_v56 = vld [vmem:[%s1324_s1 + $0x1d4] ss:$8 sps:$4 sm:$0xff]   ;;  %v977_v57 = vld [vmem:[%s1324_s1 + $0xd0] ss:$8 sps:$4 sm:$0xff]  }
  0x14   :  { %624 = vmatpush1.bf16.msra.mxu0 %v924_v20  ;;  %552 = vmatprep.subr.bf16.mxu1 %v925_v21  ;;  %v978_v58 = vld [vmem:[%s1324_s1 + $0x1d0] ss:$8 sps:$4 sm:$0xff]   ;;  %v979_v59 = vld [vmem:[%s1324_s1 + $0xe4] ss:$8 sps:$4 sm:$0xff]   ;;  %v983_v0 = vld [vmem:[%s1324_s1 + $0xe0] ss:$8 sps:$4 sm:$0xff]  }
  0x15   :  { %625 = vmatprep.subr.bf16.mxu0 %v927_v22  ;;  %647 = vmatprep.mubr.bf16.mxu0 %v996_v52  ;;  %v981_v60 = vld [vmem:[%s1324_s1 + $0x1e4] ss:$8 sps:$4 sm:$0xff]   ;;  %v96_v62 = vld [vmem:[%s1326_s2 + $0x10] sm:$0xff]  ;;  %v984_v1 = vld [vmem:[%s1324_s1 + $0x1e0] ss:$8 sps:$4 sm:$0xff]  }
  0x16   :  { %v94_v61 = vld [vmem:[%s1326_s2] sm:$0xff]  ;;  %v95_v63 = vld [vmem:[%s1326_s2 + $0x8] sm:$0xff]  ;;  %114 = vperm.xlu1 %894, %v96_v62   ;;  %v97_v2 = vld [vmem:[%s1326_s2 + $0x18] sm:$0xff] }
  0x17   :  { %553 = vmatpush1.bf16.msra.mxu1 %v929_v23  ;;  %104 = vperm.xlu0 %893, %v94_v61   ;;  %v985_v3 = vld [vmem:[%s1324_s1 + $0xf4] ss:$8 sps:$4 sm:$0xff]   ;;  %v98_v5 = vld [vmem:[%s1326_s2 + $0x20] sm:$0xff]  ;;  %v989_v6 = vld [vmem:[%s1324_s1 + $0xf0] ss:$8 sps:$4 sm:$0xff]  }
  0x18   :  { %626 = vmatpush1.bf16.msra.mxu0 %v930_v24  ;;  %554 = vmatprep.subr.bf16.mxu1 %v931_v25  ;;  %v987_v4 = vld [vmem:[%s1324_s1 + $0x1f4] ss:$8 sps:$4 sm:$0xff]   ;;  %v990_v7 = vld [vmem:[%s1324_s1 + $0x1f0] ss:$8 sps:$4 sm:$0xff]   ;;  %v99_v8 = vld [vmem:[%s1326_s2 + $0x28] sm:$0xff] }
  0x19   :  { %627 = vmatprep.subr.bf16.mxu0 %v933_v26  ;;  %v991_v9 = vld [vmem:[%s1325_s0] ss:$16 sps:$4 sm:$0xff]   ;;  %v994_v10 = vld [vmem:[%s1325_s0 + $0x8] ss:$16 sps:$4 sm:$0xff]   ;;  %v997_v12 = vld [vmem:[%s1325_s0 + $0x24] ss:$16 sps:$4 sm:$0xff]  }
  0x1a   :  { %119 = vperm.xlu1 %894, %v97_v2   ;;  %v100_v11 = vld [vmem:[%s1326_s2 + $0x30] sm:$0xff]  ;;  %v999_v13 = vld [vmem:[%s1325_s0 + $0x2c] ss:$16 sps:$4 sm:$0xff]   ;;  %v1002_v16 = vld [vmem:[%s1325_s0 + $0x28] ss:$16 sps:$4 sm:$0xff]  }
  0x1b   :  { %555 = vmatpush1.bf16.msra.mxu1 %v935_v27  ;;  %109 = vperm.xlu0 %893, %v95_v63   ;;  %v101_v14 = vld [vmem:[%s1326_s2 + $0x38] sm:$0xff]  ;;  %v1001_v15 = vld [vmem:[%s1325_s0 + $0x20] ss:$16 sps:$4 sm:$0xff]   ;;  %v1003_v17 = vld [vmem:[%s1325_s0 + $0x44] ss:$16 sps:$4 sm:$0xff]  }
  0x1c   :  { %628 = vmatpush1.bf16.msra.mxu0 %v936_v28  ;;  %556 = vmatprep.subr.bf16.mxu1 %v937_v29  ;;  %v1005_v18 = vld [vmem:[%s1325_s0 + $0x4c] ss:$16 sps:$4 sm:$0xff]   ;;  %v1007_v19 = vld [vmem:[%s1325_s0 + $0x40] ss:$16 sps:$4 sm:$0xff]   ;;  %v1008_v20 = vld [vmem:[%s1325_s0 + $0x48] ss:$16 sps:$4 sm:$0xff]  }
  0x1d   :  { %629 = vmatprep.subr.bf16.mxu0 %v939_v30  ;;  %v1009_v21 = vld [vmem:[%s1325_s0 + $0x64] ss:$16 sps:$4 sm:$0xff]   ;;  %v1011_v22 = vld [vmem:[%s1325_s0 + $0x6c] ss:$16 sps:$4 sm:$0xff]   ;;  %v1013_v23 = vld [vmem:[%s1325_s0 + $0x60] ss:$16 sps:$4 sm:$0xff]  }
  0x1e   :  { %129 = vperm.xlu1 %894, %v99_v8   ;;  %v1014_v24 = vld [vmem:[%s1325_s0 + $0x68] ss:$16 sps:$4 sm:$0xff]  }
  0x1f   :  { %557 = vmatpush1.bf16.msra.mxu1 %v941_v31  ;;  %124 = vperm.xlu0 %893, %v98_v5  }
  0x20   :  { %630 = vmatpush1.bf16.msra.mxu0 %v942_v32  ;;  %558 = vmatprep.subr.bf16.mxu1 %v943_v33 }
  0x21   :  { %631 = vmatprep.subr.bf16.mxu0 %v945_v34 }
  0x22   :  { %139 = vperm.xlu1 %894, %v101_v14  }
  0x23   :  { %559 = vmatpush1.bf16.msra.mxu1 %v947_v35  ;;  %134 = vperm.xlu0 %893, %v100_v11  }
  0x24   :  { %632 = vmatpush1.bf16.msra.mxu0 %v948_v36  ;;  %560 = vmatprep.subr.bf16.mxu1 %v949_v37 }
  0x25   :  { %633 = vmatprep.subr.bf16.mxu0 %v951_v38 }
  0x27   :  { %561 = vmatpush1.bf16.msra.mxu1 %v953_v39 }
  0x28   :  { %634 = vmatpush1.bf16.msra.mxu0 %v954_v40  ;;  %562 = vmatprep.subr.bf16.mxu1 %v955_v41 }
  0x29   :  { %635 = vmatprep.subr.bf16.mxu0 %v957_v42 }
  0x2b   :  { %563 = vmatpush1.bf16.msra.mxu1 %v959_v43 }
  0x2c   :  { %636 = vmatpush1.bf16.msra.mxu0 %v960_v44  ;;  %564 = vmatprep.subr.bf16.mxu1 %v961_v45 }
  0x2d   :  { %637 = vmatprep.subr.bf16.mxu0 %v963_v46 }
  0x2f   :  { %565 = vmatpush1.bf16.msra.mxu1 %v965_v47 }
  0x30   :  { %638 = vmatpush1.bf16.msra.mxu0 %v966_v48  ;;  %566 = vmatprep.subr.bf16.mxu1 %v967_v49 }
  0x31   :  { %639 = vmatprep.subr.bf16.mxu0 %v969_v51 }
  0x33   :  { %567 = vmatpush1.bf16.msra.mxu1 %v971_v53 }
  0x34   :  { %640 = vmatpush1.bf16.msra.mxu0 %v972_v54  ;;  %568 = vmatprep.subr.bf16.mxu1 %v973_v55 }
  0x35   :  { %641 = vmatprep.subr.bf16.mxu0 %v975_v56 }
  0x37   :  { %569 = vmatpush1.bf16.msra.mxu1 %v977_v57 }
  0x38   :  { %642 = vmatpush1.bf16.msra.mxu0 %v978_v58  ;;  %570 = vmatprep.subr.bf16.mxu1 %v979_v59 }
  0x39   :  { %643 = vmatprep.subr.bf16.mxu0 %v981_v60 }
  0x3b   :  { %571 = vmatpush1.bf16.msra.mxu1 %v983_v0 }
  0x3c   :  { %644 = vmatpush1.bf16.msra.mxu0 %v984_v1  ;;  %572 = vmatprep.subr.bf16.mxu1 %v985_v3 }
  0x3d   :  { %645 = vmatprep.subr.bf16.mxu0 %v987_v4 }
  0x3f   :  { %573 = vmatpush1.bf16.msra.mxu1 %v989_v6 }
  0x40   :  { %646 = vmatpush1.bf16.msra.mxu0 %v990_v7 }
  0x42   :  { %575 = vmatmul.mubr.bf16.vlgmr.msra.gmra.mrb[0].mxu1 %v991_v9 }
  0x43   :  { %648 = vmatmul.mubr.bf16.vlgmr.msra.gmra.mrb[0].mxu0 %v994_v10  ;;  %584 = vmatprep.mubr.bf16.mxu1 %v997_v12 }
  0x44   :  { %657 = vmatprep.mubr.bf16.mxu0 %v999_v13 }
  0x4a   :  { %585 = vmatmul.mubr.bf16.gmra.mrb[4].mxu1 %v1001_v15 }
  0x4b   :  { %658 = vmatmul.mubr.bf16.gmra.mrb[4].mxu0 %v1002_v16  ;;  %594 = vmatprep.mubr.bf16.mxu1 %v1003_v17 }
  0x4c   :  { %667 = vmatprep.mubr.bf16.mxu0 %v1005_v18 }
  0x52   :  { %595 = vmatmul.mubr.bf16.gmra.mrb[8].mxu1 %v1007_v19 }
  0x53   :  { %668 = vmatmul.mubr.bf16.gmra.mrb[8].mxu0 %v1008_v20  ;;  %604 = vmatprep.mubr.bf16.mxu1 %v1009_v21 }
  0x54   :  { %677 = vmatprep.mubr.bf16.mxu0 %v1011_v22 }
  0x5a   :  { %605 = vmatmul.mubr.bf16.gmra.mrb[12].mxu1 %v1013_v23 }
  0x5b   :  { %678 = vmatmul.mubr.bf16.gmra.mrb[12].mxu0 %v1014_v24 }
  0x95   :  { %v115_v27 = vpop.permute.xlu1 %114 }
  0x96   :  { %v105_v25 = vpop.permute.xlu0 %104 }
  0x99   :  { %v120_v47 = vpop.permute.xlu1 %119 }
  0x9a   :  { %v110_v26 = vpop.permute.xlu0 %109 }
  0x9d   :  { %v130_v6 = vpop.permute.xlu1 %129 }
  0x9e   :  { %v125_v7 = vpop.permute.xlu0 %124 }
 0x115   :  { %v576_v28 = vpop.f32.mrb[0].mxu1 }
 0x116   :  { %v649_v29 = vpop.f32.mrb[0].mxu0  ;;  %v577_v30 = vadd.f32 %v576_v28, %v105_v25  ;;  %v578_v31 = vpop.f32.mrb[1].mxu1 }
 0x117   :  { %v651_v32 = vpop.f32.mrb[1].mxu0  ;;  %v579_v33 = vadd.f32 %v578_v31, %v105_v25  ;;  %v580_v34 = vpop.f32.mrb[2].mxu1 }
 0x118   :  { %v653_v35 = vpop.f32.mrb[2].mxu0  ;;  %v650_v36 = vadd.f32 %v649_v29, %v577_v30  ;;  %v581_v37 = vadd.f32 %v580_v34, %v110_v26  ;;  %v582_v38 = vpop.f32.mrb[3].mxu1 }
 0x119   :  { %v655_v39 = vpop.f32.mrb[3].mxu0  ;;  %v652_v40 = vadd.f32 %v651_v32, %v579_v33  ;;  %v583_v41 = vadd.f32 %v582_v38, %v110_v26  ;;  %v140_v29 = vpop.permute.xlu1 %139 }
 0x11a   :  { %v688_v42 = vmax.f32 %v650_v36, 0.0  ;;  %v654_v43 = vadd.f32 %v653_v35, %v581_v37  ;;  %v135_v30 = vpop.permute.xlu0 %134 }
 0x11b   :  { %v689_v44 = vmax.f32 %v652_v40, 0.0  ;;  %v656_v45 = vadd.f32 %v655_v39, %v583_v41 }
 0x11c   :  { %v690_v46 = vmax.f32 %v654_v43, 0.0 }
 0x11d   :  { %v852_v48 = vpack.c.bf16 %v689_v44, %v688_v42  ;;  %v691_v49 = vmax.f32 %v656_v45, 0.0  ;;  %v586_v50 = vpop.f32.mrb[4].mxu1 }
 0x11e   :  { %v659_v51 = vpop.f32.mrb[4].mxu0  ;;  %v587_v52 = vadd.f32 %v586_v50, %v115_v27  ;;  %v588_v53 = vpop.f32.mrb[5].mxu1 }
 0x11f   :  { %v661_v54 = vpop.f32.mrb[5].mxu0  ;;  %752 = vst [vmem:[%s1327_s3] sm:$0xff] %v852_v48  ;;  %v853_v55 = vpack.c.bf16 %v691_v49, %v690_v46  ;;  %v589_v56 = vadd.f32 %v588_v53, %v115_v27  ;;  %v590_v57 = vpop.f32.mrb[6].mxu1 }
 0x120   :  { %v663_v58 = vpop.f32.mrb[6].mxu0  ;;  %v660_v59 = vadd.f32 %v659_v51, %v587_v52  ;;  %v591_v60 = vadd.f32 %v590_v57, %v120_v47  ;;  %v592_v61 = vpop.f32.mrb[7].mxu1 }
 0x121   :  { %v665_v62 = vpop.f32.mrb[7].mxu0  ;;  %753 = vst [vmem:[%s1327_s3 + $0x8] sm:$0xff] %v853_v55  ;;  %v662_v63 = vadd.f32 %v661_v54, %v589_v56  ;;  %v593_v0 = vadd.f32 %v592_v61, %v120_v47 }
 0x122   :  { %v692_v1 = vmax.f32 %v660_v59, 0.0  ;;  %v664_v2 = vadd.f32 %v663_v58, %v591_v60 }
 0x123   :  { %v693_v3 = vmax.f32 %v662_v63, 0.0  ;;  %v666_v4 = vadd.f32 %v665_v62, %v593_v0 }
 0x124   :  { %v694_v5 = vmax.f32 %v664_v2, 0.0 }
 0x125   :  { %v854_v8 = vpack.c.bf16 %v693_v3, %v692_v1  ;;  %v695_v9 = vmax.f32 %v666_v4, 0.0  ;;  %v596_v10 = vpop.f32.mrb[8].mxu1 }
 0x126   :  { %v669_v11 = vpop.f32.mrb[8].mxu0  ;;  %v597_v12 = vadd.f32 %v596_v10, %v125_v7  ;;  %v598_v13 = vpop.f32.mrb[9].mxu1 }
 0x127   :  { %v671_v14 = vpop.f32.mrb[9].mxu0  ;;  %754 = vst [vmem:[%s1327_s3 + $0x10] sm:$0xff] %v854_v8  ;;  %v855_v15 = vpack.c.bf16 %v695_v9, %v694_v5  ;;  %v599_v16 = vadd.f32 %v598_v13, %v125_v7  ;;  %v600_v17 = vpop.f32.mrb[10].mxu1 }
 0x128   :  { %v673_v18 = vpop.f32.mrb[10].mxu0  ;;  %v670_v19 = vadd.f32 %v669_v11, %v597_v12  ;;  %v601_v20 = vadd.f32 %v600_v17, %v130_v6  ;;  %v602_v21 = vpop.f32.mrb[11].mxu1 }
 0x129   :  { %v675_v22 = vpop.f32.mrb[11].mxu0  ;;  %755 = vst [vmem:[%s1327_s3 + $0x18] sm:$0xff] %v855_v15  ;;  %v672_v23 = vadd.f32 %v671_v14, %v599_v16  ;;  %v603_v24 = vadd.f32 %v602_v21, %v130_v6 }
 0x12a   :  { %v696_v25 = vmax.f32 %v670_v19, 0.0  ;;  %v674_v26 = vadd.f32 %v673_v18, %v601_v20 }
 0x12b   :  { %v697_v27 = vmax.f32 %v672_v23, 0.0  ;;  %v676_v28 = vadd.f32 %v675_v22, %v603_v24 }
 0x12c   :  { %v698_v31 = vmax.f32 %v674_v26, 0.0 }
 0x12d   :  { %v856_v32 = vpack.c.bf16 %v697_v27, %v696_v25  ;;  %v699_v33 = vmax.f32 %v676_v28, 0.0  ;;  %v606_v34 = vpop.f32.mrb[12].mxu1 }
 0x12e   :  { %v679_v35 = vpop.f32.mrb[12].mxu0  ;;  %v607_v36 = vadd.f32 %v606_v34, %v135_v30  ;;  %v608_v37 = vpop.f32.mrb[13].mxu1 }
 0x12f   :  { %v681_v38 = vpop.f32.mrb[13].mxu0  ;;  %756 = vst [vmem:[%s1327_s3 + $0x20] sm:$0xff] %v856_v32  ;;  %v857_v39 = vpack.c.bf16 %v699_v33, %v698_v31  ;;  %v609_v40 = vadd.f32 %v608_v37, %v135_v30  ;;  %v610_v41 = vpop.f32.mrb[14].mxu1 }
 0x130   :  { %v683_v42 = vpop.f32.mrb[14].mxu0  ;;  %v680_v43 = vadd.f32 %v679_v35, %v607_v36  ;;  %v611_v44 = vadd.f32 %v610_v41, %v140_v29  ;;  %v612_v45 = vpop.f32.mrb[15].mxu1 }
 0x131   :  { %v685_v46 = vpop.f32.mrb[15].mxu0  ;;  %757 = vst [vmem:[%s1327_s3 + $0x28] sm:$0xff] %v857_v39  ;;  %v682_v47 = vadd.f32 %v681_v38, %v609_v40  ;;  %v613_v48 = vadd.f32 %v612_v45, %v140_v29 }
 0x132   :  { %v700_v49 = vmax.f32 %v680_v43, 0.0  ;;  %v684_v50 = vadd.f32 %v683_v42, %v611_v44 }
 0x133   :  { %v701_v51 = vmax.f32 %v682_v47, 0.0  ;;  %v686_v52 = vadd.f32 %v685_v46, %v613_v48 }
 0x134   :  { %v702_v53 = vmax.f32 %v684_v50, 0.0 }
 0x135   :  { %v858_v54 = vpack.c.bf16 %v701_v51, %v700_v49  ;;  %v703_v55 = vmax.f32 %v686_v52, 0.0 }
 0x137   :  { %758 = vst [vmem:[%s1327_s3 + $0x30] sm:$0xff] %v858_v54  ;;  %v859_v56 = vpack.c.bf16 %v703_v55, %v702_v53 }
 0x139   :  { %759 = vst [vmem:[%s1327_s3 + $0x38] sm:$0xff] %v859_v56 }

// kernel: vae_forward.10
= control target key start
LH: loop header
LB: loop body
LE: loop exit
PB: predicated region body
PF: predicated region fallthrough
CT: control target
= control target key end

     0   :  { %v1456_v11 = vmov 0   ;;  %s1945_s1 = inlined_call_operand.vmem [shape: bf16[256,896], index: 1, kind: input, shape index: {}]   ;;  %s1946_s0 = inlined_call_operand.vmem [shape: bf16[32,256], index: 0, kind: input, shape index: {}]   ;;  %s1947_s2 = inlined_call_operand.vmem [shape: f32[32,1], index: 2, kind: input, shape index: {}]   ;;  %s1948_s3 = inlined_call_operand.vmem [shape: bf16[32,896], index: 3, kind: output, shape index: {}]  }
   0x1   :  { %v1290_v0 = vld [vmem:[%s1945_s1 + $0x4] ss:$28 sps:$4 sm:$0xff]   ;;  %v1293_v2 = vld [vmem:[%s1945_s1 + $0x3c] ss:$28 sps:$4 sm:$0xff]   ;;  %v1296_v4 = vld [vmem:[%s1945_s1 + $0x74] ss:$28 sps:$4 sm:$0xff]   ;;  %1288 = vset.pattern.permute.xlu0 %v1456_v11  ;;  %1289 = vset.pattern.permute.xlu1 %v1456_v11 }
   0x2   :  { %v1292_v1 = vld [vmem:[%s1945_s1] ss:$28 sps:$4 sm:$0xff]   ;;  %767 = vmatprep.subr.bf16.mxu0 %v1290_v0  ;;  %v1295_v3 = vld [vmem:[%s1945_s1 + $0x38] ss:$28 sps:$4 sm:$0xff]   ;;  %v1298_v5 = vld [vmem:[%s1945_s1 + $0x70] ss:$28 sps:$4 sm:$0xff]  }
   0x3   :  { %768 = vmatpush1.bf16.msra.mxu0 %v1292_v1  ;;  %v1299_v6 = vld [vmem:[%s1945_s1 + $0xac] ss:$28 sps:$4 sm:$0xff]   ;;  %v1302_v10 = vld [vmem:[%s1945_s1 + $0xe4] ss:$28 sps:$4 sm:$0xff]   ;;  %v1323_v15 = vld [vmem:[%s1945_s1 + $0x7c] ss:$28 sps:$4 sm:$0xff]  }
   0x4   :  { %769 = vmatprep.subr.bf16.mxu0 %v1293_v2  ;;  %v1311_v7 = vld [vmem:[%s1945_s1 + $0xc] ss:$28 sps:$4 sm:$0xff]   ;;  %v1317_v12 = vld [vmem:[%s1945_s1 + $0x44] ss:$28 sps:$4 sm:$0xff]   ;;  %v1305_v16 = vld [vmem:[%s1945_s1 + $0x11c] ss:$28 sps:$4 sm:$0xff]  }
   0x5   :  { %v1313_v8 = vld [vmem:[%s1945_s1 + $0x8] ss:$28 sps:$4 sm:$0xff]   ;;  %820 = vmatprep.subr.bf16.mxu1 %v1311_v7  ;;  %v1319_v13 = vld [vmem:[%s1945_s1 + $0x40] ss:$28 sps:$4 sm:$0xff]   ;;  %v1325_v17 = vld [vmem:[%s1945_s1 + $0x78] ss:$28 sps:$4 sm:$0xff]  }
   0x6   :  { %v1301_v9 = vld [vmem:[%s1945_s1 + $0xa8] ss:$28 sps:$4 sm:$0xff]   ;;  %821 = vmatpush1.bf16.msra.mxu1 %v1313_v8  ;;  %v1304_v14 = vld [vmem:[%s1945_s1 + $0xe0] ss:$28 sps:$4 sm:$0xff]   ;;  %v1329_v18 = vld [vmem:[%s1945_s1 + $0xb4] ss:$28 sps:$4 sm:$0xff]  }
   0x7   :  { %770 = vmatpush1.bf16.msra.mxu0 %v1295_v3  ;;  %822 = vmatprep.subr.bf16.mxu1 %v1317_v12  ;;  %v1307_v19 = vld [vmem:[%s1945_s1 + $0x118] ss:$28 sps:$4 sm:$0xff]   ;;  %v1331_v21 = vld [vmem:[%s1945_s1 + $0xb0] ss:$28 sps:$4 sm:$0xff]   ;;  %v1337_v25 = vld [vmem:[%s1945_s1 + $0xe8] ss:$28 sps:$4 sm:$0xff]  }
   0x8   :  { %771 = vmatprep.subr.bf16.mxu0 %v1296_v4  ;;  %v1308_v20 = vld [vmem:[%s1945_s1 + $0x154] ss:$28 sps:$4 sm:$0xff]   ;;  %v1335_v22 = vld [vmem:[%s1945_s1 + $0xec] ss:$28 sps:$4 sm:$0xff]   ;;  %v1341_v26 = vld [vmem:[%s1945_s1 + $0x124] ss:$28 sps:$4 sm:$0xff]  }
   0x9   :  { %v1310_v23 = vld [vmem:[%s1945_s1 + $0x150] ss:$28 sps:$4 sm:$0xff]   ;;  %v1316_v27 = vld [vmem:[%s1945_s1 + $0x188] ss:$28 sps:$4 sm:$0xff]   ;;  %v1343_v29 = vld [vmem:[%s1945_s1 + $0x120] ss:$28 sps:$4 sm:$0xff]  }
   0xa   :  { %823 = vmatpush1.bf16.msra.mxu1 %v1319_v13  ;;  %v1314_v24 = vld [vmem:[%s1945_s1 + $0x18c] ss:$28 sps:$4 sm:$0xff]   ;;  %v1320_v28 = vld [vmem:[%s1945_s1 + $0x1c4] ss:$28 sps:$4 sm:$0xff]   ;;  %v1347_v30 = vld [vmem:[%s1945_s1 + $0x15c] ss:$28 sps:$4 sm:$0xff]  }
   0xb   :  { %772 = vmatpush1.bf16.msra.mxu0 %v1298_v5  ;;  %824 = vmatprep.subr.bf16.mxu1 %v1323_v15  ;;  %v1322_v31 = vld [vmem:[%s1945_s1 + $0x1c0] ss:$28 sps:$4 sm:$0xff]   ;;  %v1349_v33 = vld [vmem:[%s1945_s1 + $0x158] ss:$28 sps:$4 sm:$0xff]   ;;  %v1585_v36 = vld [vmem:[%s1946_s0 + $0x4] ss:$8 sps:$4 sm:$0xff]  }
   0xc   :  { %773 = vmatprep.subr.bf16.mxu0 %v1299_v6  ;;  %v1326_v32 = vld [vmem:[%s1945_s1 + $0x1fc] ss:$28 sps:$4 sm:$0xff]   ;;  %v1353_v34 = vld [vmem:[%s1945_s1 + $0x194] ss:$28 sps:$4 sm:$0xff]   ;;  %799 = vmatprep.mubr.bf16.mxu0 %v1585_v36  ;;  %v1359_v39 = vld [vmem:[%s1945_s1 + $0x1cc] ss:$28 sps:$4 sm:$0xff]  }
   0xd   :  { %v1328_v35 = vld [vmem:[%s1945_s1 + $0x1f8] ss:$28 sps:$4 sm:$0xff]   ;;  %v1355_v38 = vld [vmem:[%s1945_s1 + $0x190] ss:$28 sps:$4 sm:$0xff]   ;;  %852 = vmatprep.mubr.bf16.mxu1 %v1585_v36  ;;  %v1361_v42 = vld [vmem:[%s1945_s1 + $0x1c8] ss:$28 sps:$4 sm:$0xff]  }
   0xe   :  { %825 = vmatpush1.bf16.msra.mxu1 %v1325_v17  ;;  %v1332_v37 = vld [vmem:[%s1945_s1 + $0x234] ss:$28 sps:$4 sm:$0xff]   ;;  %v1338_v41 = vld [vmem:[%s1945_s1 + $0x26c] ss:$28 sps:$4 sm:$0xff]   ;;  %v1365_v43 = vld [vmem:[%s1945_s1 + $0x204] ss:$28 sps:$4 sm:$0xff]  }
   0xf   :  { %774 = vmatpush1.bf16.msra.mxu0 %v1301_v9  ;;  %826 = vmatprep.subr.bf16.mxu1 %v1329_v18  ;;  %v1334_v40 = vld [vmem:[%s1945_s1 + $0x230] ss:$28 sps:$4 sm:$0xff]   ;;  %v1340_v44 = vld [vmem:[%s1945_s1 + $0x268] ss:$28 sps:$4 sm:$0xff]   ;;  %v1369_v46 = vld [vmem:[%s1945_s1 + $0x200] ss:$28 sps:$4 sm:$0xff]  }
  0x10   :  { %775 = vmatprep.subr.bf16.mxu0 %v1302_v10  ;;  %v1344_v45 = vld [vmem:[%s1945_s1 + $0x2a4] ss:$28 sps:$4 sm:$0xff]   ;;  %v1374_v47 = vld [vmem:[%s1945_s1 + $0x23c] ss:$28 sps:$4 sm:$0xff]   ;;  %v1380_v51 = vld [vmem:[%s1945_s1 + $0x274] ss:$28 sps:$4 sm:$0xff]  }
  0x11   :  { %v1346_v48 = vld [vmem:[%s1945_s1 + $0x2a0] ss:$28 sps:$4 sm:$0xff]   ;;  %v1376_v50 = vld [vmem:[%s1945_s1 + $0x238] ss:$28 sps:$4 sm:$0xff]   ;;  %v1382_v54 = vld [vmem:[%s1945_s1 + $0x270] ss:$28 sps:$4 sm:$0xff]  }
  0x12   :  { %827 = vmatpush1.bf16.msra.mxu1 %v1331_v21  ;;  %v1350_v49 = vld [vmem:[%s1945_s1 + $0x2dc] ss:$28 sps:$4 sm:$0xff]   ;;  %v1356_v53 = vld [vmem:[%s1945_s1 + $0x314] ss:$28 sps:$4 sm:$0xff]   ;;  %v1386_v55 = vld [vmem:[%s1945_s1 + $0x2ac] ss:$28 sps:$4 sm:$0xff]  }
  0x13   :  { %776 = vmatpush1.bf16.msra.mxu0 %v1304_v14  ;;  %828 = vmatprep.subr.bf16.mxu1 %v1335_v22  ;;  %v1352_v52 = vld [vmem:[%s1945_s1 + $0x2d8] ss:$28 sps:$4 sm:$0xff]   ;;  %v1358_v56 = vld [vmem:[%s1945_s1 + $0x310] ss:$28 sps:$4 sm:$0xff]   ;;  %v1388_v58 = vld [vmem:[%s1945_s1 + $0x2a8] ss:$28 sps:$4 sm:$0xff]  }
  0x14   :  { %777 = vmatprep.subr.bf16.mxu0 %v1305_v16  ;;  %v1362_v57 = vld [vmem:[%s1945_s1 + $0x34c] ss:$28 sps:$4 sm:$0xff]   ;;  %v1392_v59 = vld [vmem:[%s1945_s1 + $0x2e4] ss:$28 sps:$4 sm:$0xff]   ;;  %v1373_v62 = vld [vmem:[%s1945_s1 + $0x14] ss:$28 sps:$4 sm:$0xff]  }
  0x15   :  { %v1364_v60 = vld [vmem:[%s1945_s1 + $0x348] ss:$28 sps:$4 sm:$0xff]   ;;  %v1394_v63 = vld [vmem:[%s1945_s1 + $0x2e0] ss:$28 sps:$4 sm:$0xff]   ;;  %v1371_v1 = vld [vmem:[%s1945_s1 + $0x10] ss:$28 sps:$4 sm:$0xff]  }
  0x16   :  { %829 = vmatpush1.bf16.msra.mxu1 %v1337_v25  ;;  %v1664_v61 = vld [vmem:[%s1946_s0] ss:$8 sps:$4 sm:$0xff]   ;;  %v1398_v0 = vld [vmem:[%s1945_s1 + $0x31c] ss:$28 sps:$4 sm:$0xff]   ;;  %v1404_v4 = vld [vmem:[%s1945_s1 + $0x354] ss:$28 sps:$4 sm:$0xff]  }
  0x17   :  { %778 = vmatpush1.bf16.msra.mxu0 %v1307_v19  ;;  %830 = vmatprep.subr.bf16.mxu1 %v1341_v26  ;;  %v1379_v2 = vld [vmem:[%s1945_s1 + $0x4c] ss:$28 sps:$4 sm:$0xff]   ;;  %v1400_v3 = vld [vmem:[%s1945_s1 + $0x318] ss:$28 sps:$4 sm:$0xff]   ;;  %v1385_v6 = vld [vmem:[%s1945_s1 + $0x84] ss:$28 sps:$4 sm:$0xff]  }
  0x18   :  { %779 = vmatprep.subr.bf16.mxu0 %v1308_v20  ;;  %v1377_v5 = vld [vmem:[%s1945_s1 + $0x48] ss:$28 sps:$4 sm:$0xff]   ;;  %v1406_v7 = vld [vmem:[%s1945_s1 + $0x350] ss:$28 sps:$4 sm:$0xff]   ;;  %v1410_v8 = vld [vmem:[%s1945_s1 + $0x1d8] ss:$28 sps:$4 sm:$0xff]  }
  0x19   :  { %v1383_v9 = vld [vmem:[%s1945_s1 + $0x80] ss:$28 sps:$4 sm:$0xff]   ;;  %v1411_v11 = vld [vmem:[%s1945_s1 + $0x18] ss:$28 sps:$4 sm:$0xff]   ;;  %v1415_v12 = vld [vmem:[%s1945_s1 + $0x210] ss:$28 sps:$4 sm:$0xff]  }
  0x1a   :  { %831 = vmatpush1.bf16.msra.mxu1 %v1343_v29  ;;  %v1391_v10 = vld [vmem:[%s1945_s1 + $0xbc] ss:$28 sps:$4 sm:$0xff]   ;;  %v1397_v15 = vld [vmem:[%s1945_s1 + $0xf4] ss:$28 sps:$4 sm:$0xff]   ;;  %v1420_v17 = vld [vmem:[%s1945_s1 + $0x248] ss:$28 sps:$4 sm:$0xff]  }
  0x1b   :  { %780 = vmatpush1.bf16.msra.mxu0 %v1310_v23  ;;  %832 = vmatprep.subr.bf16.mxu1 %v1347_v30  ;;  %v1715_v13 = vld [vmem:[%s1946_s0 + $0x14] ss:$8 sps:$4 sm:$0xff]   ;;  %v1416_v16 = vld [vmem:[%s1945_s1 + $0x50] ss:$28 sps:$4 sm:$0xff]   ;;  %v1421_v21 = vld [vmem:[%s1945_s1 + $0x88] ss:$28 sps:$4 sm:$0xff]  }
  0x1c   :  { %781 = vmatprep.subr.bf16.mxu0 %v1314_v24  ;;  %v1389_v14 = vld [vmem:[%s1945_s1 + $0xb8] ss:$28 sps:$4 sm:$0xff]   ;;  %v1395_v19 = vld [vmem:[%s1945_s1 + $0xf0] ss:$28 sps:$4 sm:$0xff]   ;;  %v1425_v22 = vld [vmem:[%s1945_s1 + $0x280] ss:$28 sps:$4 sm:$0xff]  }
  0x1d   :  { %v1734_v18 = vld [vmem:[%s1946_s0 + $0x10] ss:$8 sps:$4 sm:$0xff]   ;;  %v1403_v20 = vld [vmem:[%s1945_s1 + $0x12c] ss:$28 sps:$4 sm:$0xff]   ;;  %v147_v23 = vld [vmem:[%s1947_s2] sm:$0xff] }
  0x1e   :  { %833 = vmatpush1.bf16.msra.mxu1 %v1349_v33  ;;  %v1401_v24 = vld [vmem:[%s1945_s1 + $0x128] ss:$28 sps:$4 sm:$0xff]   ;;  %153 = vperm.xlu0 %1288, %v147_v23   ;;  %v149_v25 = vld [vmem:[%s1947_s2 + $0x10] sm:$0xff]  ;;  %v1407_v30 = vld [vmem:[%s1945_s1 + $0x160] ss:$28 sps:$4 sm:$0xff]  }
  0x1f   :  { %782 = vmatpush1.bf16.msra.mxu0 %v1316_v27  ;;  %834 = vmatprep.subr.bf16.mxu1 %v1353_v34  ;;  %v1409_v26 = vld [vmem:[%s1945_s1 + $0x164] ss:$28 sps:$4 sm:$0xff]   ;;  %v148_v27 = vld [vmem:[%s1947_s2 + $0x8] sm:$0xff]  ;;  %v1430_v29 = vld [vmem:[%s1945_s1 + $0x2b8] ss:$28 sps:$4 sm:$0xff]  }
  0x20   :  { %783 = vmatprep.subr.bf16.mxu0 %v1320_v28  ;;  %v1426_v28 = vld [vmem:[%s1945_s1 + $0xc0] ss:$28 sps:$4 sm:$0xff]   ;;  %163 = vperm.xlu1 %1289, %v149_v25   ;;  %v1431_v33 = vld [vmem:[%s1945_s1 + $0xf8] ss:$28 sps:$4 sm:$0xff]   ;;  %v1435_v34 = vld [vmem:[%s1945_s1 + $0x2f0] ss:$28 sps:$4 sm:$0xff]  }
  0x22   :  { %835 = vmatpush1.bf16.msra.mxu1 %v1355_v38  ;;  %158 = vperm.xlu0 %1288, %v148_v27   ;;  %v1443_v38 = vld [vmem:[%s1945_s1 + $0x328] ss:$28 sps:$4 sm:$0xff]  }
  0x23   :  { %784 = vmatpush1.bf16.msra.mxu0 %v1322_v31  ;;  %836 = vmatprep.subr.bf16.mxu1 %v1359_v39  ;;  %v150_v31 = vld [vmem:[%s1947_s2 + $0x18] sm:$0xff]  ;;  %v1417_v39 = vld [vmem:[%s1945_s1 + $0x1d0] ss:$28 sps:$4 sm:$0xff]  }
  0x24   :  { %785 = vmatprep.subr.bf16.mxu0 %v1326_v32  ;;  %v1414_v32 = vld [vmem:[%s1945_s1 + $0x19c] ss:$28 sps:$4 sm:$0xff]   ;;  %168 = vperm.xlu1 %1289, %v150_v31  }
  0x26   :  { %837 = vmatpush1.bf16.msra.mxu1 %v1361_v42  ;;  %v1448_v42 = vld [vmem:[%s1945_s1 + $0x360] ss:$28 sps:$4 sm:$0xff]  }
  0x27   :  { %786 = vmatpush1.bf16.msra.mxu0 %v1328_v35  ;;  %838 = vmatprep.subr.bf16.mxu1 %v1365_v43  ;;  %v1412_v35 = vld [vmem:[%s1945_s1 + $0x198] ss:$28 sps:$4 sm:$0xff]   ;;  %v1422_v43 = vld [vmem:[%s1945_s1 + $0x208] ss:$28 sps:$4 sm:$0xff]  }
  0x28   :  { %787 = vmatprep.subr.bf16.mxu0 %v1332_v37  ;;  %v1436_v37 = vld [vmem:[%s1945_s1 + $0x130] ss:$28 sps:$4 sm:$0xff]  }
  0x2a   :  { %839 = vmatpush1.bf16.msra.mxu1 %v1369_v46  ;;  %v1427_v46 = vld [vmem:[%s1945_s1 + $0x240] ss:$28 sps:$4 sm:$0xff]  }
  0x2b   :  { %788 = vmatpush1.bf16.msra.mxu0 %v1334_v40  ;;  %840 = vmatprep.subr.bf16.mxu1 %v1374_v47  ;;  %v1424_v40 = vld [vmem:[%s1945_s1 + $0x20c] ss:$28 sps:$4 sm:$0xff]   ;;  %v1434_v47 = vld [vmem:[%s1945_s1 + $0x27c] ss:$28 sps:$4 sm:$0xff]  }
  0x2c   :  { %789 = vmatprep.subr.bf16.mxu0 %v1338_v41  ;;  %v1444_v41 = vld [vmem:[%s1945_s1 + $0x168] ss:$28 sps:$4 sm:$0xff]  }
  0x2e   :  { %841 = vmatpush1.bf16.msra.mxu1 %v1376_v50  ;;  %v1437_v50 = vld [vmem:[%s1945_s1 + $0x2b0] ss:$28 sps:$4 sm:$0xff]  }
  0x2f   :  { %790 = vmatpush1.bf16.msra.mxu0 %v1340_v44  ;;  %842 = vmatprep.subr.bf16.mxu1 %v1380_v51  ;;  %v1429_v44 = vld [vmem:[%s1945_s1 + $0x244] ss:$28 sps:$4 sm:$0xff]   ;;  %v1447_v51 = vld [vmem:[%s1945_s1 + $0x2ec] ss:$28 sps:$4 sm:$0xff]  }
  0x30   :  { %791 = vmatprep.subr.bf16.mxu0 %v1344_v45  ;;  %v1449_v45 = vld [vmem:[%s1945_s1 + $0x1a0] ss:$28 sps:$4 sm:$0xff]  }
  0x32   :  { %843 = vmatpush1.bf16.msra.mxu1 %v1382_v54  ;;  %v1450_v54 = vld [vmem:[%s1945_s1 + $0x320] ss:$28 sps:$4 sm:$0xff]  }
  0x33   :  { %792 = vmatpush1.bf16.msra.mxu0 %v1346_v48  ;;  %844 = vmatprep.subr.bf16.mxu1 %v1386_v55  ;;  %v1432_v48 = vld [vmem:[%s1945_s1 + $0x278] ss:$28 sps:$4 sm:$0xff]  }
  0x34   :  { %793 = vmatprep.subr.bf16.mxu0 %v1350_v49  ;;  %v1439_v49 = vld [vmem:[%s1945_s1 + $0x2b4] ss:$28 sps:$4 sm:$0xff]   ;;  %v1455_v55 = vld [vmem:[%s1945_s1 + $0x35c] ss:$28 sps:$4 sm:$0xff]  }
  0x36   :  { %845 = vmatpush1.bf16.msra.mxu1 %v1388_v58 }
  0x37   :  { %794 = vmatpush1.bf16.msra.mxu0 %v1352_v52  ;;  %846 = vmatprep.subr.bf16.mxu1 %v1392_v59  ;;  %v1445_v52 = vld [vmem:[%s1945_s1 + $0x2e8] ss:$28 sps:$4 sm:$0xff]  }
  0x38   :  { %795 = vmatprep.subr.bf16.mxu0 %v1356_v53  ;;  %v1452_v53 = vld [vmem:[%s1945_s1 + $0x324] ss:$28 sps:$4 sm:$0xff]  }
  0x3a   :  { %847 = vmatpush1.bf16.msra.mxu1 %v1394_v63 }
  0x3b   :  { %796 = vmatpush1.bf16.msra.mxu0 %v1358_v56  ;;  %848 = vmatprep.subr.bf16.mxu1 %v1398_v0  ;;  %v1453_v56 = vld [vmem:[%s1945_s1 + $0x358] ss:$28 sps:$4 sm:$0xff]  }
  0x3c   :  { %797 = vmatprep.subr.bf16.mxu0 %v1362_v57 }
  0x3e   :  { %849 = vmatpush1.bf16.msra.mxu1 %v1400_v3 }
  0x3f   :  { %798 = vmatpush1.bf16.msra.mxu0 %v1364_v60  ;;  %850 = vmatprep.subr.bf16.mxu1 %v1404_v4 }
  0x40   :  { %873 = vmatprep.subr.bf16.mxu0 %v1373_v62 }
  0x42   :  { %800 = vmatmul.mubr.bf16.vlgmr.msra.gmra.mrb[0].mxu0 %v1664_v61  ;;  %851 = vmatpush1.bf16.msra.mxu1 %v1406_v7 }
  0x43   :  { %874 = vmatpush1.bf16.msra.mxu0 %v1371_v1  ;;  %1259 = vmatprep.subr.bf16.mxu1 %v1410_v8 }
  0x44   :  { %875 = vmatprep.subr.bf16.mxu0 %v1379_v2  ;;  %809 = vmatprep.mubr.bf16.mxu0 %v1715_v13 }
  0x45   :  { %853 = vmatmul.mubr.bf16.vlgmr.msra.gmra.mrb[0].mxu1 %v1664_v61 }
  0x46   :  { %1260 = vmatpush3.bf16.msra.mxu1 %v1411_v11  ;;  %862 = vmatprep.mubr.bf16.mxu1 %v1715_v13 }
  0x47   :  { %876 = vmatpush1.bf16.msra.mxu0 %v1377_v5  ;;  %1261 = vmatprep.subr.bf16.mxu1 %v1415_v12 }
  0x48   :  { %877 = vmatprep.subr.bf16.mxu0 %v1385_v6 }
  0x4a   :  { %810 = vmatmul.mubr.bf16.gmra.mrb[4].mxu0 %v1734_v18  ;;  %1262 = vmatpush3.bf16.msra.mxu1 %v1416_v16 }
  0x4b   :  { %878 = vmatpush1.bf16.msra.mxu0 %v1383_v9  ;;  %905 = vmatprep.mubr.bf16.mxu0 %v1585_v36 }
  0x4c   :  { %879 = vmatprep.subr.bf16.mxu0 %v1391_v10  ;;  %1263 = vmatprep.subr.bf16.mxu1 %v1420_v17 }
  0x4d   :  { %863 = vmatmul.mubr.bf16.gmra.mrb[4].mxu1 %v1734_v18 }
  0x4e   :  { %1264 = vmatpush3.bf16.msra.mxu1 %v1421_v21  ;;  %958 = vmatprep.mubr.bf16.mxu1 %v1585_v36  ;;  %v1419_v36 = vld [vmem:[%s1945_s1 + $0x1d4] ss:$28 sps:$4 sm:$0xff]  }
  0x4f   :  { %880 = vmatpush1.bf16.msra.mxu0 %v1389_v14  ;;  %1265 = vmatprep.subr.bf16.mxu1 %v1425_v22 }
  0x50   :  { %881 = vmatprep.subr.bf16.mxu0 %v1397_v15 }
  0x52   :  { %1266 = vmatpush3.bf16.msra.mxu1 %v1426_v28 }
  0x53   :  { %882 = vmatpush1.bf16.msra.mxu0 %v1395_v19  ;;  %1267 = vmatprep.subr.bf16.mxu1 %v1430_v29 }
  0x54   :  { %883 = vmatprep.subr.bf16.mxu0 %v1403_v20 }
  0x56   :  { %1268 = vmatpush3.bf16.msra.mxu1 %v1431_v33 }
  0x57   :  { %884 = vmatpush1.bf16.msra.mxu0 %v1401_v24  ;;  %1269 = vmatprep.subr.bf16.mxu1 %v1435_v34 }
  0x58   :  { %885 = vmatprep.subr.bf16.mxu0 %v1409_v26 }
  0x5a   :  { %1270 = vmatpush3.bf16.msra.mxu1 %v1436_v37 }
  0x5b   :  { %886 = vmatpush1.bf16.msra.mxu0 %v1407_v30  ;;  %1271 = vmatprep.subr.bf16.mxu1 %v1443_v38 }
  0x5c   :  { %887 = vmatprep.subr.bf16.mxu0 %v1414_v32 }
  0x5e   :  { %1272 = vmatpush3.bf16.msra.mxu1 %v1444_v41 }
  0x5f   :  { %888 = vmatpush1.bf16.msra.mxu0 %v1412_v35  ;;  %1273 = vmatprep.subr.bf16.mxu1 %v1448_v42 }
  0x60   :  { %889 = vmatprep.subr.bf16.mxu0 %v1419_v36 }
  0x62   :  { %1274 = vmatpush3.bf16.msra.mxu1 %v1449_v45 }
  0x63   :  { %890 = vmatpush1.bf16.msra.mxu0 %v1417_v39 }
  0x64   :  { %891 = vmatprep.subr.bf16.mxu0 %v1424_v40 }
  0x65   :  { %959 = vmatmul.mubr.bf16.vlgmr.msra.gmra.mrb[8].mxu1 %v1664_v61 }
  0x66   :  { %966 = vmatprep.mubr.bf16.mxu1 %v1715_v13 }
  0x67   :  { %892 = vmatpush1.bf16.msra.mxu0 %v1422_v43 }
  0x68   :  { %893 = vmatprep.subr.bf16.mxu0 %v1429_v44 }
  0x6b   :  { %894 = vmatpush1.bf16.msra.mxu0 %v1427_v46 }
  0x6c   :  { %895 = vmatprep.subr.bf16.mxu0 %v1434_v47 }
  0x6d   :  { %967 = vmatmul.mubr.bf16.gmra.mrb[12].mxu1 %v1734_v18 }
  0x6f   :  { %896 = vmatpush1.bf16.msra.mxu0 %v1432_v48 }
  0x70   :  { %897 = vmatprep.subr.bf16.mxu0 %v1439_v49 }
  0x73   :  { %898 = vmatpush1.bf16.msra.mxu0 %v1437_v50 }
  0x74   :  { %899 = vmatprep.subr.bf16.mxu0 %v1447_v51 }
  0x77   :  { %900 = vmatpush1.bf16.msra.mxu0 %v1445_v52 }
  0x78   :  { %901 = vmatprep.subr.bf16.mxu0 %v1452_v53 }
  0x7b   :  { %902 = vmatpush1.bf16.msra.mxu0 %v1450_v54 }
  0x7c   :  { %903 = vmatprep.subr.bf16.mxu0 %v1455_v55 }
  0x7f   :  { %904 = vmatpush1.bf16.msra.mxu0 %v1453_v56 }
  0x82   :  { %906 = vmatmul.mubr.bf16.vlgmr.msra.gmra.mrb[8].mxu0 %v1664_v61 }
  0x83   :  { %915 = vmatprep.mubr.bf16.mxu0 %v1715_v13 }
  0x8a   :  { %916 = vmatmul.mubr.bf16.gmra.mrb[12].mxu0 %v1734_v18 }
  0x9d   :  { %v1861_v57 = vpop.permute.xlu0 %153 }
  0x9f   :  { %v1875_v10 = vpop.permute.xlu1 %163 }
  0xa1   :  { %v1863_v59 = vpop.permute.xlu0 %158 }
  0xa3   :  { %v1882_v26 = vpop.permute.xlu1 %168 }
 0x115   :  { %v801_v58 = vpop.f32.mrb[0].mxu0 }
 0x116   :  { %v802_v60 = vadd.f32 %v801_v58, %v1861_v57  ;;  %v803_v62 = vpop.f32.mrb[1].mxu0 }
 0x117   :  { %v804_v63 = vadd.f32 %v803_v62, %v1861_v57  ;;  %v805_v0 = vpop.f32.mrb[2].mxu0 }
 0x118   :  { %v975_v1 = vmax.f32 %v802_v60, 0.0  ;;  %v806_v2 = vadd.f32 %v805_v0, %v1863_v59  ;;  %v807_v3 = vpop.f32.mrb[3].mxu0  ;;  %v854_v9 = vpop.f32.mrb[0].mxu1 }
 0x119   :  { %v976_v61 = vmax.f32 %v804_v63, 0.0  ;;  %v808_v4 = vadd.f32 %v807_v3, %v1863_v59  ;;  %v855_v11 = vadd.f32 %v854_v9, %v1861_v57  ;;  %v856_v12 = vpop.f32.mrb[1].mxu1 }
 0x11a   :  { %v982_v5 = vmax.f32 %v806_v2, 0.0  ;;  %v857_v13 = vadd.f32 %v856_v12, %v1861_v57  ;;  %v858_v14 = vpop.f32.mrb[2].mxu1 }
 0x11b   :  { %v1243_v6 = vpack.c.bf16 %v976_v61, %v975_v1  ;;  %v983_v7 = vmax.f32 %v808_v4, 0.0  ;;  %v977_v15 = vmax.f32 %v855_v11, 0.0  ;;  %v859_v16 = vadd.f32 %v858_v14, %v1863_v59  ;;  %v860_v17 = vpop.f32.mrb[3].mxu1 }
 0x11c   :  { %v978_v18 = vmax.f32 %v857_v13, 0.0  ;;  %v861_v19 = vadd.f32 %v860_v17, %v1863_v59 }
 0x11d   :  { %1091 = vst [vmem:[%s1948_s3] sm:$0xff] %v1243_v6  ;;  %v1247_v8 = vpack.c.bf16 %v983_v7, %v982_v5  ;;  %v811_v20 = vpop.f32.mrb[4].mxu0  ;;  %v984_v21 = vmax.f32 %v859_v16, 0.0 }
 0x11e   :  { %v812_v22 = vadd.f32 %v811_v20, %v1875_v10  ;;  %v813_v23 = vpop.f32.mrb[5].mxu0  ;;  %v1244_v24 = vpack.c.bf16 %v978_v18, %v977_v15  ;;  %v985_v25 = vmax.f32 %v861_v19, 0.0 }
 0x11f   :  { %1095 = vst [vmem:[%s1948_s3 + $0x1c] sm:$0xff] %v1247_v8  ;;  %v814_v27 = vadd.f32 %v813_v23, %v1875_v10  ;;  %v815_v28 = vpop.f32.mrb[6].mxu0 }
 0x120   :  { %v989_v29 = vmax.f32 %v812_v22, 0.0  ;;  %v816_v30 = vadd.f32 %v815_v28, %v1882_v26  ;;  %v817_v31 = vpop.f32.mrb[7].mxu0  ;;  %1092 = vst [vmem:[%s1948_s3 + $0x8] sm:$0xff] %v1244_v24  ;;  %v1248_v32 = vpack.c.bf16 %v985_v25, %v984_v21  ;;  %v864_v33 = vpop.f32.mrb[4].mxu1 }
 0x121   :  { %v990_v34 = vmax.f32 %v814_v27, 0.0  ;;  %v818_v35 = vadd.f32 %v817_v31, %v1882_v26  ;;  %v865_v36 = vadd.f32 %v864_v33, %v1875_v10  ;;  %v866_v37 = vpop.f32.mrb[5].mxu1 }
 0x122   :  { %v996_v38 = vmax.f32 %v816_v30, 0.0  ;;  %1096 = vst [vmem:[%s1948_s3 + $0x24] sm:$0xff] %v1248_v32  ;;  %v867_v39 = vadd.f32 %v866_v37, %v1875_v10  ;;  %v868_v40 = vpop.f32.mrb[6].mxu1 }
 0x123   :  { %v1251_v41 = vpack.c.bf16 %v990_v34, %v989_v29  ;;  %v997_v42 = vmax.f32 %v818_v35, 0.0  ;;  %v991_v43 = vmax.f32 %v865_v36, 0.0  ;;  %v869_v44 = vadd.f32 %v868_v40, %v1882_v26  ;;  %v870_v45 = vpop.f32.mrb[7].mxu1 }
 0x124   :  { %v992_v46 = vmax.f32 %v867_v39, 0.0  ;;  %v871_v47 = vadd.f32 %v870_v45, %v1882_v26 }
 0x125   :  { %1099 = vst [vmem:[%s1948_s3 + $0x38] sm:$0xff] %v1251_v41  ;;  %v1255_v48 = vpack.c.bf16 %v997_v42, %v996_v38  ;;  %v998_v49 = vmax.f32 %v869_v44, 0.0 }
 0x126   :  { %v1252_v50 = vpack.c.bf16 %v992_v46, %v991_v43  ;;  %v999_v51 = vmax.f32 %v871_v47, 0.0 }
 0x127   :  { %1103 = vst [vmem:[%s1948_s3 + $0x54] sm:$0xff] %v1255_v48 }
 0x128   :  { %1100 = vst [vmem:[%s1948_s3 + $0x40] sm:$0xff] %v1252_v50  ;;  %v1256_v52 = vpack.c.bf16 %v999_v51, %v998_v49 }
 0x12a   :  { %1104 = vst [vmem:[%s1948_s3 + $0x5c] sm:$0xff] %v1256_v52 }
 0x138   :  { %v1275_v53 = vpop.f32.mrb[8].mxu1 }
 0x139   :  { %v1276_v54 = vpop.f32.mrb[9].mxu1 }
 0x13a   :  { %v1277_v55 = vadd.f32 %v1276_v54, %v1275_v53  ;;  %v1278_v56 = vpop.f32.mrb[10].mxu1 }
 0x13b   :  { %v1279_v58 = vpop.f32.mrb[11].mxu1 }
 0x13c   :  { %v961_v60 = vadd.f32 %v1277_v55, %v1861_v57  ;;  %v1280_v62 = vadd.f32 %v1279_v58, %v1278_v56 }
 0x13e   :  { %v981_v63 = vmax.f32 %v961_v60, 0.0  ;;  %v964_v0 = vadd.f32 %v1280_v62, %v1863_v59 }
 0x140   :  { %v1246_v1 = vpack.c.bf16 %v981_v63, %v981_v63  ;;  %v988_v2 = vmax.f32 %v964_v0, 0.0  ;;  %v1281_v3 = vpop.f32.mrb[12].mxu1 }
 0x141   :  { %v1282_v61 = vpop.f32.mrb[13].mxu1 }
 0x142   :  { %1094 = vst [vmem:[%s1948_s3 + $0x18] sm:$0xf] %v1246_v1  ;;  %v1250_v4 = vpack.c.bf16 %v988_v2, %v988_v2  ;;  %v1283_v5 = vadd.f32 %v1282_v61, %v1281_v3  ;;  %v1284_v6 = vpop.f32.mrb[14].mxu1 }
 0x143   :  { %v1285_v7 = vpop.f32.mrb[15].mxu1 }
 0x144   :  { %1098 = vst [vmem:[%s1948_s3 + $0x34] sm:$0xf] %v1250_v4  ;;  %v969_v8 = vadd.f32 %v1283_v5, %v1875_v10  ;;  %v1286_v9 = vadd.f32 %v1285_v7, %v1284_v6 }
 0x146   :  { %v995_v11 = vmax.f32 %v969_v8, 0.0  ;;  %v972_v12 = vadd.f32 %v1286_v9, %v1882_v26 }
 0x148   :  { %v1254_v13 = vpack.c.bf16 %v995_v11, %v995_v11  ;;  %v1002_v14 = vmax.f32 %v972_v12, 0.0 }
 0x14a   :  { %1102 = vst [vmem:[%s1948_s3 + $0x50] sm:$0xf] %v1254_v13  ;;  %v1258_v15 = vpack.c.bf16 %v1002_v14, %v1002_v14 }
 0x14c   :  { %1106 = vst [vmem:[%s1948_s3 + $0x6c] sm:$0xf] %v1258_v15 }
 0x155   :  { %v907_v16 = vpop.f32.mrb[8].mxu0 }
 0x156   :  { %v908_v17 = vadd.f32 %v907_v16, %v1861_v57  ;;  %v909_v18 = vpop.f32.mrb[9].mxu0 }
 0x157   :  { %v910_v19 = vadd.f32 %v909_v18, %v1861_v57  ;;  %v911_v20 = vpop.f32.mrb[10].mxu0 }
 0x158   :  { %v979_v21 = vmax.f32 %v908_v17, 0.0  ;;  %v912_v22 = vadd.f32 %v911_v20, %v1863_v59  ;;  %v913_v23 = vpop.f32.mrb[11].mxu0 }
 0x159   :  { %v980_v24 = vmax.f32 %v910_v19, 0.0  ;;  %v914_v25 = vadd.f32 %v913_v23, %v1863_v59 }
 0x15a   :  { %v986_v27 = vmax.f32 %v912_v22, 0.0 }
 0x15b   :  { %v1245_v28 = vpack.c.bf16 %v980_v24, %v979_v21  ;;  %v987_v29 = vmax.f32 %v914_v25, 0.0 }
 0x15d   :  { %1093 = vst [vmem:[%s1948_s3 + $0x10] sm:$0xff] %v1245_v28  ;;  %v1249_v30 = vpack.c.bf16 %v987_v29, %v986_v27  ;;  %v917_v31 = vpop.f32.mrb[12].mxu0 }
 0x15e   :  { %v918_v32 = vadd.f32 %v917_v31, %v1875_v10  ;;  %v919_v57 = vpop.f32.mrb[13].mxu0 }
 0x15f   :  { %1097 = vst [vmem:[%s1948_s3 + $0x2c] sm:$0xff] %v1249_v30  ;;  %v920_v33 = vadd.f32 %v919_v57, %v1875_v10  ;;  %v921_v34 = vpop.f32.mrb[14].mxu0 }
 0x160   :  { %v993_v59 = vmax.f32 %v918_v32, 0.0  ;;  %v922_v35 = vadd.f32 %v921_v34, %v1882_v26  ;;  %v923_v36 = vpop.f32.mrb[15].mxu0 }
 0x161   :  { %v994_v37 = vmax.f32 %v920_v33, 0.0  ;;  %v924_v38 = vadd.f32 %v923_v36, %v1882_v26 }
 0x162   :  { %v1000_v39 = vmax.f32 %v922_v35, 0.0 }
 0x163   :  { %v1253_v40 = vpack.c.bf16 %v994_v37, %v993_v59  ;;  %v1001_v41 = vmax.f32 %v924_v38, 0.0 }
 0x165   :  { %1101 = vst [vmem:[%s1948_s3 + $0x48] sm:$0xff] %v1253_v40  ;;  %v1257_v42 = vpack.c.bf16 %v1001_v41, %v1000_v39 }
 0x167   :  { %1105 = vst [vmem:[%s1948_s3 + $0x64] sm:$0xff] %v1257_v42 }

// kernel: vae_forward.11
= control target key start
LH: loop header
LB: loop body
LE: loop exit
PB: predicated region body
PF: predicated region fallthrough
CT: control target
= control target key end

     0   :  { %v2606_v1 = vmov 0   ;;  %s3566_s1 = inlined_call_operand.vmem [shape: bf16[128,3584], index: 1, kind: input, shape index: {}]   ;;  %s3567_s0 = inlined_call_operand.vmem [shape: bf16[16,128], index: 0, kind: input, shape index: {}]   ;;  %s3568_s2 = inlined_call_operand.vmem [shape: f32[16,1], index: 2, kind: input, shape index: {}]   ;;  %s3569_s3 = inlined_call_operand.vmem [shape: f32[16,3584], index: 3, kind: output, shape index: {}]  }
   0x1   :  { %v2268_v0 = vld [vmem:[%s3566_s1 + $0x4] ss:$112 sps:$4 sm:$0xff]   ;;  %1411 = vmatprep.mubr.bf16.mxu0 %v2606_v1  ;;  %1454 = vmatprep.mubr.bf16.mxu1 %v2606_v1  ;;  %v2270_v2 = vld [vmem:[%s3566_s1 + $0xc] ss:$112 sps:$4 sm:$0xff]   ;;  %v2272_v3 = vld [vmem:[%s3566_s1] ss:$112 sps:$4 sm:$0xff]  }
   0x2   :  { %2267 = vset.pattern.permute.xlu0 %v2606_v1  ;;  %1379 = vmatprep.subr.bf16.mxu0 %v2268_v0  ;;  %v2273_v4 = vld [vmem:[%s3566_s1 + $0x8] ss:$112 sps:$4 sm:$0xff]   ;;  %v2274_v5 = vld [vmem:[%s3566_s1 + $0xe4] ss:$112 sps:$4 sm:$0xff]   ;;  %v2276_v6 = vld [vmem:[%s3566_s1 + $0xec] ss:$112 sps:$4 sm:$0xff]  }
   0x3   :  { %1422 = vmatprep.subr.bf16.mxu1 %v2270_v2  ;;  %1380 = vmatpush1.bf16.msra.mxu0 %v2272_v3  ;;  %v2278_v7 = vld [vmem:[%s3566_s1 + $0xe0] ss:$112 sps:$4 sm:$0xff]   ;;  %v2279_v8 = vld [vmem:[%s3566_s1 + $0xe8] ss:$112 sps:$4 sm:$0xff]   ;;  %v2280_v9 = vld [vmem:[%s3566_s1 + $0x1c4] ss:$112 sps:$4 sm:$0xff]  }
   0x4   :  { %1423 = vmatpush1.bf16.msra.mxu1 %v2273_v4  ;;  %1381 = vmatprep.subr.bf16.mxu0 %v2274_v5  ;;  %v2282_v10 = vld [vmem:[%s3566_s1 + $0x1cc] ss:$112 sps:$4 sm:$0xff]   ;;  %v2284_v11 = vld [vmem:[%s3566_s1 + $0x1c0] ss:$112 sps:$4 sm:$0xff]   ;;  %v2285_v12 = vld [vmem:[%s3566_s1 + $0x1c8] ss:$112 sps:$4 sm:$0xff]  }
   0x5   :  { %1424 = vmatprep.subr.bf16.mxu1 %v2276_v6  ;;  %v2286_v13 = vld [vmem:[%s3566_s1 + $0x2a4] ss:$112 sps:$4 sm:$0xff]   ;;  %v2288_v14 = vld [vmem:[%s3566_s1 + $0x2ac] ss:$112 sps:$4 sm:$0xff]   ;;  %v2290_v15 = vld [vmem:[%s3566_s1 + $0x2a0] ss:$112 sps:$4 sm:$0xff]  }
   0x6   :  { %v2291_v16 = vld [vmem:[%s3566_s1 + $0x2a8] ss:$112 sps:$4 sm:$0xff]   ;;  %v2292_v17 = vld [vmem:[%s3566_s1 + $0x384] ss:$112 sps:$4 sm:$0xff]   ;;  %v2294_v18 = vld [vmem:[%s3566_s1 + $0x38c] ss:$112 sps:$4 sm:$0xff]  }
   0x7   :  { %1382 = vmatpush1.bf16.msra.mxu0 %v2278_v7  ;;  %v2296_v19 = vld [vmem:[%s3566_s1 + $0x380] ss:$112 sps:$4 sm:$0xff]   ;;  %v2297_v20 = vld [vmem:[%s3566_s1 + $0x388] ss:$112 sps:$4 sm:$0xff]   ;;  %v2298_v21 = vld [vmem:[%s3566_s1 + $0x464] ss:$112 sps:$4 sm:$0xff]  }
   0x8   :  { %1425 = vmatpush1.bf16.msra.mxu1 %v2279_v8  ;;  %1383 = vmatprep.subr.bf16.mxu0 %v2280_v9  ;;  %v2300_v22 = vld [vmem:[%s3566_s1 + $0x46c] ss:$112 sps:$4 sm:$0xff]   ;;  %v2302_v23 = vld [vmem:[%s3566_s1 + $0x460] ss:$112 sps:$4 sm:$0xff]   ;;  %v2303_v24 = vld [vmem:[%s3566_s1 + $0x468] ss:$112 sps:$4 sm:$0xff]  }
   0x9   :  { %1426 = vmatprep.subr.bf16.mxu1 %v2282_v10  ;;  %v2304_v25 = vld [vmem:[%s3566_s1 + $0x544] ss:$112 sps:$4 sm:$0xff]   ;;  %v2306_v26 = vld [vmem:[%s3566_s1 + $0x54c] ss:$112 sps:$4 sm:$0xff]   ;;  %v2308_v27 = vld [vmem:[%s3566_s1 + $0x540] ss:$112 sps:$4 sm:$0xff]  }
   0xa   :  { %v2309_v28 = vld [vmem:[%s3566_s1 + $0x548] ss:$112 sps:$4 sm:$0xff]   ;;  %v2310_v29 = vld [vmem:[%s3566_s1 + $0x624] ss:$112 sps:$4 sm:$0xff]   ;;  %v2312_v30 = vld [vmem:[%s3566_s1 + $0x62c] ss:$112 sps:$4 sm:$0xff]  }
   0xb   :  { %1384 = vmatpush1.bf16.msra.mxu0 %v2284_v11  ;;  %v2314_v31 = vld [vmem:[%s3566_s1 + $0x620] ss:$112 sps:$4 sm:$0xff]   ;;  %v2315_v32 = vld [vmem:[%s3566_s1 + $0x628] ss:$112 sps:$4 sm:$0xff]   ;;  %v2319_v33 = vld [vmem:[%s3566_s1 + $0x14] ss:$112 sps:$4 sm:$0xff]  }
   0xc   :  { %1427 = vmatpush1.bf16.msra.mxu1 %v2285_v12  ;;  %1385 = vmatprep.subr.bf16.mxu0 %v2286_v13  ;;  %v2322_v34 = vld [vmem:[%s3566_s1 + $0x1c] ss:$112 sps:$4 sm:$0xff]   ;;  %v2735_v35 = vld [vmem:[%s3567_s0] sm:$0xff]   ;;  %v2320_v37 = vld [vmem:[%s3566_s1 + $0x18] ss:$112 sps:$4 sm:$0xff]  }
   0xd   :  { %1428 = vmatprep.subr.bf16.mxu1 %v2288_v14  ;;  %v2317_v36 = vld [vmem:[%s3566_s1 + $0x10] ss:$112 sps:$4 sm:$0xff]   ;;  %v2325_v38 = vld [vmem:[%s3566_s1 + $0xf4] ss:$112 sps:$4 sm:$0xff]   ;;  %v2328_v39 = vld [vmem:[%s3566_s1 + $0xfc] ss:$112 sps:$4 sm:$0xff]  }
   0xe   :  { %v2323_v40 = vld [vmem:[%s3566_s1 + $0xf0] ss:$112 sps:$4 sm:$0xff]   ;;  %v2326_v41 = vld [vmem:[%s3566_s1 + $0xf8] ss:$112 sps:$4 sm:$0xff]   ;;  %v2331_v42 = vld [vmem:[%s3566_s1 + $0x1d4] ss:$112 sps:$4 sm:$0xff]  }
   0xf   :  { %1386 = vmatpush1.bf16.msra.mxu0 %v2290_v15  ;;  %v2334_v43 = vld [vmem:[%s3566_s1 + $0x1dc] ss:$112 sps:$4 sm:$0xff]   ;;  %v2329_v44 = vld [vmem:[%s3566_s1 + $0x1d0] ss:$112 sps:$4 sm:$0xff]   ;;  %v2332_v45 = vld [vmem:[%s3566_s1 + $0x1d8] ss:$112 sps:$4 sm:$0xff]  }
  0x10   :  { %1429 = vmatpush1.bf16.msra.mxu1 %v2291_v16  ;;  %1387 = vmatprep.subr.bf16.mxu0 %v2292_v17  ;;  %v2337_v46 = vld [vmem:[%s3566_s1 + $0x2b4] ss:$112 sps:$4 sm:$0xff]   ;;  %v2340_v47 = vld [vmem:[%s3566_s1 + $0x2bc] ss:$112 sps:$4 sm:$0xff]   ;;  %v2335_v48 = vld [vmem:[%s3566_s1 + $0x2b0] ss:$112 sps:$4 sm:$0xff]  }
  0x11   :  { %1430 = vmatprep.subr.bf16.mxu1 %v2294_v18  ;;  %v2338_v49 = vld [vmem:[%s3566_s1 + $0x2b8] ss:$112 sps:$4 sm:$0xff]   ;;  %v2343_v50 = vld [vmem:[%s3566_s1 + $0x394] ss:$112 sps:$4 sm:$0xff]   ;;  %v2346_v51 = vld [vmem:[%s3566_s1 + $0x39c] ss:$112 sps:$4 sm:$0xff]  }
  0x12   :  { %v2341_v52 = vld [vmem:[%s3566_s1 + $0x390] ss:$112 sps:$4 sm:$0xff]   ;;  %v2344_v53 = vld [vmem:[%s3566_s1 + $0x398] ss:$112 sps:$4 sm:$0xff]   ;;  %v2349_v54 = vld [vmem:[%s3566_s1 + $0x474] ss:$112 sps:$4 sm:$0xff]  }
  0x13   :  { %1388 = vmatpush1.bf16.msra.mxu0 %v2296_v19  ;;  %v2352_v55 = vld [vmem:[%s3566_s1 + $0x47c] ss:$112 sps:$4 sm:$0xff]   ;;  %v2347_v56 = vld [vmem:[%s3566_s1 + $0x470] ss:$112 sps:$4 sm:$0xff]   ;;  %v2350_v57 = vld [vmem:[%s3566_s1 + $0x478] ss:$112 sps:$4 sm:$0xff]  }
  0x14   :  { %1431 = vmatpush1.bf16.msra.mxu1 %v2297_v20  ;;  %1389 = vmatprep.subr.bf16.mxu0 %v2298_v21  ;;  %v2355_v58 = vld [vmem:[%s3566_s1 + $0x554] ss:$112 sps:$4 sm:$0xff]   ;;  %v2358_v59 = vld [vmem:[%s3566_s1 + $0x55c] ss:$112 sps:$4 sm:$0xff]   ;;  %v2353_v60 = vld [vmem:[%s3566_s1 + $0x550] ss:$112 sps:$4 sm:$0xff]  }
  0x15   :  { %1432 = vmatprep.subr.bf16.mxu1 %v2300_v22  ;;  %v2356_v61 = vld [vmem:[%s3566_s1 + $0x558] ss:$112 sps:$4 sm:$0xff]   ;;  %v2361_v62 = vld [vmem:[%s3566_s1 + $0x634] ss:$112 sps:$4 sm:$0xff]   ;;  %v2364_v63 = vld [vmem:[%s3566_s1 + $0x63c] ss:$112 sps:$4 sm:$0xff]  }
  0x16   :  { %v2359_v0 = vld [vmem:[%s3566_s1 + $0x630] ss:$112 sps:$4 sm:$0xff]   ;;  %v2362_v2 = vld [vmem:[%s3566_s1 + $0x638] ss:$112 sps:$4 sm:$0xff]   ;;  %v2367_v3 = vld [vmem:[%s3566_s1 + $0x24] ss:$112 sps:$4 sm:$0xff]  }
  0x17   :  { %1390 = vmatpush1.bf16.msra.mxu0 %v2302_v23  ;;  %v2370_v4 = vld [vmem:[%s3566_s1 + $0x2c] ss:$112 sps:$4 sm:$0xff]   ;;  %v2365_v5 = vld [vmem:[%s3566_s1 + $0x20] ss:$112 sps:$4 sm:$0xff]   ;;  %v2368_v6 = vld [vmem:[%s3566_s1 + $0x28] ss:$112 sps:$4 sm:$0xff]  }
  0x18   :  { %1433 = vmatpush1.bf16.msra.mxu1 %v2303_v24  ;;  %1391 = vmatprep.subr.bf16.mxu0 %v2304_v25  ;;  %v2373_v7 = vld [vmem:[%s3566_s1 + $0x104] ss:$112 sps:$4 sm:$0xff]   ;;  %v2376_v8 = vld [vmem:[%s3566_s1 + $0x10c] ss:$112 sps:$4 sm:$0xff]   ;;  %v2371_v9 = vld [vmem:[%s3566_s1 + $0x100] ss:$112 sps:$4 sm:$0xff]  }
  0x19   :  { %1434 = vmatprep.subr.bf16.mxu1 %v2306_v26  ;;  %v2374_v10 = vld [vmem:[%s3566_s1 + $0x108] ss:$112 sps:$4 sm:$0xff]   ;;  %v2379_v11 = vld [vmem:[%s3566_s1 + $0x1e4] ss:$112 sps:$4 sm:$0xff]   ;;  %v2382_v12 = vld [vmem:[%s3566_s1 + $0x1ec] ss:$112 sps:$4 sm:$0xff]  }
  0x1a   :  { %v2377_v13 = vld [vmem:[%s3566_s1 + $0x1e0] ss:$112 sps:$4 sm:$0xff]   ;;  %v2380_v14 = vld [vmem:[%s3566_s1 + $0x1e8] ss:$112 sps:$4 sm:$0xff]   ;;  %v2385_v15 = vld [vmem:[%s3566_s1 + $0x2c4] ss:$112 sps:$4 sm:$0xff]  }
  0x1b   :  { %1392 = vmatpush1.bf16.msra.mxu0 %v2308_v27  ;;  %v2388_v16 = vld [vmem:[%s3566_s1 + $0x2cc] ss:$112 sps:$4 sm:$0xff]   ;;  %v2383_v17 = vld [vmem:[%s3566_s1 + $0x2c0] ss:$112 sps:$4 sm:$0xff]   ;;  %v2386_v18 = vld [vmem:[%s3566_s1 + $0x2c8] ss:$112 sps:$4 sm:$0xff]  }
  0x1c   :  { %1435 = vmatpush1.bf16.msra.mxu1 %v2309_v28  ;;  %1393 = vmatprep.subr.bf16.mxu0 %v2310_v29  ;;  %v2391_v19 = vld [vmem:[%s3566_s1 + $0x3a4] ss:$112 sps:$4 sm:$0xff]   ;;  %v2394_v20 = vld [vmem:[%s3566_s1 + $0x3ac] ss:$112 sps:$4 sm:$0xff]   ;;  %v2389_v22 = vld [vmem:[%s3566_s1 + $0x3a0] ss:$112 sps:$4 sm:$0xff]  }
  0x1d   :  { %1436 = vmatprep.subr.bf16.mxu1 %v2312_v30  ;;  %v241_v21 = vld [vmem:[%s3568_s2] sm:$0xff]  ;;  %v2392_v23 = vld [vmem:[%s3566_s1 + $0x3a8] ss:$112 sps:$4 sm:$0xff]   ;;  %v2400_v25 = vld [vmem:[%s3566_s1 + $0x48c] ss:$112 sps:$4 sm:$0xff]  }
  0x1e   :  { %245 = vperm.xlu0 %2267, %v241_v21   ;;  %v2397_v24 = vld [vmem:[%s3566_s1 + $0x484] ss:$112 sps:$4 sm:$0xff]   ;;  %v242_v26 = vld [vmem:[%s3568_s2 + $0x8] sm:$0xff]  ;;  %v2395_v27 = vld [vmem:[%s3566_s1 + $0x480] ss:$112 sps:$4 sm:$0xff]  }
  0x1f   :  { %1394 = vmatpush1.bf16.msra.mxu0 %v2314_v31  ;;  %v2398_v28 = vld [vmem:[%s3566_s1 + $0x488] ss:$112 sps:$4 sm:$0xff]   ;;  %v2403_v29 = vld [vmem:[%s3566_s1 + $0x564] ss:$112 sps:$4 sm:$0xff]   ;;  %v2406_v30 = vld [vmem:[%s3566_s1 + $0x56c] ss:$112 sps:$4 sm:$0xff]  }
  0x20   :  { %1437 = vmatpush1.bf16.msra.mxu1 %v2315_v32  ;;  %1465 = vmatprep.subr.bf16.mxu0 %v2319_v33  ;;  %v2401_v31 = vld [vmem:[%s3566_s1 + $0x560] ss:$112 sps:$4 sm:$0xff]   ;;  %v2404_v32 = vld [vmem:[%s3566_s1 + $0x568] ss:$112 sps:$4 sm:$0xff]   ;;  %v2409_v33 = vld [vmem:[%s3566_s1 + $0x644] ss:$112 sps:$4 sm:$0xff]  }
  0x21   :  { %1508 = vmatprep.subr.bf16.mxu1 %v2322_v34  ;;  %v2412_v34 = vld [vmem:[%s3566_s1 + $0x64c] ss:$112 sps:$4 sm:$0xff]   ;;  %v2479_v21 = vld [vmem:[%s3566_s1 + $0x2e0] ss:$112 sps:$4 sm:$0xff]  }
  0x22   :  { %1412 = vmatmul.mubr.bf16.vlgmr.msra.gmra.mrb[0].mxu0 %v2735_v35  ;;  %250 = vperm.xlu0 %2267, %v242_v26   ;;  %v2488_v26 = vld [vmem:[%s3566_s1 + $0x3c8] ss:$112 sps:$4 sm:$0xff]  }
  0x23   :  { %1455 = vmatmul.mubr.bf16.vlgmr.msra.gmra.mrb[0].mxu1 %v2735_v35  ;;  %1466 = vmatpush1.bf16.msra.mxu0 %v2317_v36  ;;  %v2407_v36 = vld [vmem:[%s3566_s1 + $0x640] ss:$112 sps:$4 sm:$0xff]  }
  0x24   :  { %1509 = vmatpush1.bf16.msra.mxu1 %v2320_v37  ;;  %1467 = vmatprep.subr.bf16.mxu0 %v2325_v38  ;;  %v2410_v37 = vld [vmem:[%s3566_s1 + $0x648] ss:$112 sps:$4 sm:$0xff]   ;;  %v2415_v38 = vld [vmem:[%s3566_s1 + $0x34] ss:$112 sps:$4 sm:$0xff]  }
  0x25   :  { %1510 = vmatprep.subr.bf16.mxu1 %v2328_v39  ;;  %1497 = vmatprep.mubr.bf16.mxu0 %v2606_v1  ;;  %v2418_v39 = vld [vmem:[%s3566_s1 + $0x3c] ss:$112 sps:$4 sm:$0xff]  }
  0x26   :  { %1540 = vmatprep.mubr.bf16.mxu1 %v2606_v1 }
  0x27   :  { %1468 = vmatpush1.bf16.msra.mxu0 %v2323_v40  ;;  %v2413_v40 = vld [vmem:[%s3566_s1 + $0x30] ss:$112 sps:$4 sm:$0xff]  }
  0x28   :  { %1511 = vmatpush1.bf16.msra.mxu1 %v2326_v41  ;;  %1469 = vmatprep.subr.bf16.mxu0 %v2331_v42  ;;  %v2416_v41 = vld [vmem:[%s3566_s1 + $0x38] ss:$112 sps:$4 sm:$0xff]   ;;  %v2421_v42 = vld [vmem:[%s3566_s1 + $0x114] ss:$112 sps:$4 sm:$0xff]  }
  0x29   :  { %1512 = vmatprep.subr.bf16.mxu1 %v2334_v43  ;;  %v2424_v43 = vld [vmem:[%s3566_s1 + $0x11c] ss:$112 sps:$4 sm:$0xff]  }
  0x2b   :  { %1470 = vmatpush1.bf16.msra.mxu0 %v2329_v44  ;;  %v2419_v44 = vld [vmem:[%s3566_s1 + $0x110] ss:$112 sps:$4 sm:$0xff]  }
  0x2c   :  { %1513 = vmatpush1.bf16.msra.mxu1 %v2332_v45  ;;  %1471 = vmatprep.subr.bf16.mxu0 %v2337_v46  ;;  %v2422_v45 = vld [vmem:[%s3566_s1 + $0x118] ss:$112 sps:$4 sm:$0xff]   ;;  %v2427_v46 = vld [vmem:[%s3566_s1 + $0x1f4] ss:$112 sps:$4 sm:$0xff]  }
  0x2d   :  { %1514 = vmatprep.subr.bf16.mxu1 %v2340_v47  ;;  %v2430_v47 = vld [vmem:[%s3566_s1 + $0x1fc] ss:$112 sps:$4 sm:$0xff]  }
  0x2f   :  { %1472 = vmatpush1.bf16.msra.mxu0 %v2335_v48  ;;  %v2425_v48 = vld [vmem:[%s3566_s1 + $0x1f0] ss:$112 sps:$4 sm:$0xff]  }
  0x30   :  { %1515 = vmatpush1.bf16.msra.mxu1 %v2338_v49  ;;  %1473 = vmatprep.subr.bf16.mxu0 %v2343_v50  ;;  %v2428_v49 = vld [vmem:[%s3566_s1 + $0x1f8] ss:$112 sps:$4 sm:$0xff]   ;;  %v2433_v50 = vld [vmem:[%s3566_s1 + $0x2d4] ss:$112 sps:$4 sm:$0xff]  }
  0x31   :  { %1516 = vmatprep.subr.bf16.mxu1 %v2346_v51  ;;  %v2436_v51 = vld [vmem:[%s3566_s1 + $0x2dc] ss:$112 sps:$4 sm:$0xff]  }
  0x33   :  { %1474 = vmatpush1.bf16.msra.mxu0 %v2341_v52  ;;  %v2431_v52 = vld [vmem:[%s3566_s1 + $0x2d0] ss:$112 sps:$4 sm:$0xff]  }
  0x34   :  { %1517 = vmatpush1.bf16.msra.mxu1 %v2344_v53  ;;  %1475 = vmatprep.subr.bf16.mxu0 %v2349_v54  ;;  %v2434_v53 = vld [vmem:[%s3566_s1 + $0x2d8] ss:$112 sps:$4 sm:$0xff]   ;;  %v2439_v54 = vld [vmem:[%s3566_s1 + $0x3b4] ss:$112 sps:$4 sm:$0xff]  }
  0x35   :  { %1518 = vmatprep.subr.bf16.mxu1 %v2352_v55  ;;  %v2442_v55 = vld [vmem:[%s3566_s1 + $0x3bc] ss:$112 sps:$4 sm:$0xff]  }
  0x37   :  { %1476 = vmatpush1.bf16.msra.mxu0 %v2347_v56  ;;  %v2437_v56 = vld [vmem:[%s3566_s1 + $0x3b0] ss:$112 sps:$4 sm:$0xff]  }
  0x38   :  { %1519 = vmatpush1.bf16.msra.mxu1 %v2350_v57  ;;  %1477 = vmatprep.subr.bf16.mxu0 %v2355_v58  ;;  %v2440_v57 = vld [vmem:[%s3566_s1 + $0x3b8] ss:$112 sps:$4 sm:$0xff]   ;;  %v2445_v58 = vld [vmem:[%s3566_s1 + $0x494] ss:$112 sps:$4 sm:$0xff]  }
  0x39   :  { %1520 = vmatprep.subr.bf16.mxu1 %v2358_v59  ;;  %v2448_v59 = vld [vmem:[%s3566_s1 + $0x49c] ss:$112 sps:$4 sm:$0xff]  }
  0x3b   :  { %1478 = vmatpush1.bf16.msra.mxu0 %v2353_v60  ;;  %v2443_v60 = vld [vmem:[%s3566_s1 + $0x490] ss:$112 sps:$4 sm:$0xff]  }
  0x3c   :  { %1521 = vmatpush1.bf16.msra.mxu1 %v2356_v61  ;;  %1479 = vmatprep.subr.bf16.mxu0 %v2361_v62  ;;  %v2446_v61 = vld [vmem:[%s3566_s1 + $0x498] ss:$112 sps:$4 sm:$0xff]   ;;  %v2451_v62 = vld [vmem:[%s3566_s1 + $0x574] ss:$112 sps:$4 sm:$0xff]  }
  0x3d   :  { %1522 = vmatprep.subr.bf16.mxu1 %v2364_v63  ;;  %v2454_v63 = vld [vmem:[%s3566_s1 + $0x57c] ss:$112 sps:$4 sm:$0xff]  }
  0x3f   :  { %1480 = vmatpush1.bf16.msra.mxu0 %v2359_v0  ;;  %v2449_v0 = vld [vmem:[%s3566_s1 + $0x570] ss:$112 sps:$4 sm:$0xff]  }
  0x40   :  { %1523 = vmatpush1.bf16.msra.mxu1 %v2362_v2  ;;  %1551 = vmatprep.subr.bf16.mxu0 %v2367_v3  ;;  %v2452_v2 = vld [vmem:[%s3566_s1 + $0x578] ss:$112 sps:$4 sm:$0xff]   ;;  %v2457_v3 = vld [vmem:[%s3566_s1 + $0x654] ss:$112 sps:$4 sm:$0xff]  }
  0x41   :  { %1594 = vmatprep.subr.bf16.mxu1 %v2370_v4  ;;  %v2460_v4 = vld [vmem:[%s3566_s1 + $0x65c] ss:$112 sps:$4 sm:$0xff]  }
  0x42   :  { %1498 = vmatmul.mubr.bf16.vlgmr.msra.gmra.mrb[4].mxu0 %v2735_v35 }
  0x43   :  { %1541 = vmatmul.mubr.bf16.vlgmr.msra.gmra.mrb[4].mxu1 %v2735_v35  ;;  %1552 = vmatpush1.bf16.msra.mxu0 %v2365_v5  ;;  %v2455_v5 = vld [vmem:[%s3566_s1 + $0x650] ss:$112 sps:$4 sm:$0xff]  }
  0x44   :  { %1595 = vmatpush1.bf16.msra.mxu1 %v2368_v6  ;;  %1553 = vmatprep.subr.bf16.mxu0 %v2373_v7  ;;  %v2458_v6 = vld [vmem:[%s3566_s1 + $0x658] ss:$112 sps:$4 sm:$0xff]   ;;  %v2463_v7 = vld [vmem:[%s3566_s1 + $0x44] ss:$112 sps:$4 sm:$0xff]  }
  0x45   :  { %1596 = vmatprep.subr.bf16.mxu1 %v2376_v8  ;;  %1583 = vmatprep.mubr.bf16.mxu0 %v2606_v1  ;;  %v2466_v8 = vld [vmem:[%s3566_s1 + $0x4c] ss:$112 sps:$4 sm:$0xff]  }
  0x46   :  { %1626 = vmatprep.mubr.bf16.mxu1 %v2606_v1 }
  0x47   :  { %1554 = vmatpush1.bf16.msra.mxu0 %v2371_v9  ;;  %v2461_v9 = vld [vmem:[%s3566_s1 + $0x40] ss:$112 sps:$4 sm:$0xff]  }
  0x48   :  { %1597 = vmatpush1.bf16.msra.mxu1 %v2374_v10  ;;  %1555 = vmatprep.subr.bf16.mxu0 %v2379_v11  ;;  %v2464_v10 = vld [vmem:[%s3566_s1 + $0x48] ss:$112 sps:$4 sm:$0xff]   ;;  %v2469_v11 = vld [vmem:[%s3566_s1 + $0x124] ss:$112 sps:$4 sm:$0xff]  }
  0x49   :  { %1598 = vmatprep.subr.bf16.mxu1 %v2382_v12  ;;  %v2472_v12 = vld [vmem:[%s3566_s1 + $0x12c] ss:$112 sps:$4 sm:$0xff]  }
  0x4b   :  { %1556 = vmatpush1.bf16.msra.mxu0 %v2377_v13  ;;  %v2467_v13 = vld [vmem:[%s3566_s1 + $0x120] ss:$112 sps:$4 sm:$0xff]  }
  0x4c   :  { %1599 = vmatpush1.bf16.msra.mxu1 %v2380_v14  ;;  %1557 = vmatprep.subr.bf16.mxu0 %v2385_v15  ;;  %v2470_v14 = vld [vmem:[%s3566_s1 + $0x128] ss:$112 sps:$4 sm:$0xff]   ;;  %v2475_v15 = vld [vmem:[%s3566_s1 + $0x204] ss:$112 sps:$4 sm:$0xff]  }
  0x4d   :  { %1600 = vmatprep.subr.bf16.mxu1 %v2388_v16  ;;  %v2478_v16 = vld [vmem:[%s3566_s1 + $0x20c] ss:$112 sps:$4 sm:$0xff]  }
  0x4f   :  { %1558 = vmatpush1.bf16.msra.mxu0 %v2383_v17  ;;  %v2473_v17 = vld [vmem:[%s3566_s1 + $0x200] ss:$112 sps:$4 sm:$0xff]  }
  0x50   :  { %1601 = vmatpush1.bf16.msra.mxu1 %v2386_v18  ;;  %1559 = vmatprep.subr.bf16.mxu0 %v2391_v19  ;;  %v2476_v18 = vld [vmem:[%s3566_s1 + $0x208] ss:$112 sps:$4 sm:$0xff]   ;;  %v2481_v19 = vld [vmem:[%s3566_s1 + $0x2e4] ss:$112 sps:$4 sm:$0xff]  }
  0x51   :  { %1602 = vmatprep.subr.bf16.mxu1 %v2394_v20  ;;  %v2484_v20 = vld [vmem:[%s3566_s1 + $0x2ec] ss:$112 sps:$4 sm:$0xff]  }
  0x53   :  { %1560 = vmatpush1.bf16.msra.mxu0 %v2389_v22  ;;  %v2482_v22 = vld [vmem:[%s3566_s1 + $0x2e8] ss:$112 sps:$4 sm:$0xff]  }
  0x54   :  { %1603 = vmatpush1.bf16.msra.mxu1 %v2392_v23  ;;  %1561 = vmatprep.subr.bf16.mxu0 %v2397_v24  ;;  %v2487_v23 = vld [vmem:[%s3566_s1 + $0x3c4] ss:$112 sps:$4 sm:$0xff]   ;;  %v2490_v24 = vld [vmem:[%s3566_s1 + $0x3cc] ss:$112 sps:$4 sm:$0xff]  }
  0x55   :  { %1604 = vmatprep.subr.bf16.mxu1 %v2400_v25  ;;  %v2485_v25 = vld [vmem:[%s3566_s1 + $0x3c0] ss:$112 sps:$4 sm:$0xff]  }
  0x57   :  { %1562 = vmatpush1.bf16.msra.mxu0 %v2395_v27  ;;  %v2493_v27 = vld [vmem:[%s3566_s1 + $0x4a4] ss:$112 sps:$4 sm:$0xff]  }
  0x58   :  { %1605 = vmatpush1.bf16.msra.mxu1 %v2398_v28  ;;  %1563 = vmatprep.subr.bf16.mxu0 %v2403_v29  ;;  %v2496_v28 = vld [vmem:[%s3566_s1 + $0x4ac] ss:$112 sps:$4 sm:$0xff]   ;;  %v2491_v29 = vld [vmem:[%s3566_s1 + $0x4a0] ss:$112 sps:$4 sm:$0xff]  }
  0x59   :  { %1606 = vmatprep.subr.bf16.mxu1 %v2406_v30  ;;  %v2494_v30 = vld [vmem:[%s3566_s1 + $0x4a8] ss:$112 sps:$4 sm:$0xff]  }
  0x5b   :  { %1564 = vmatpush1.bf16.msra.mxu0 %v2401_v31  ;;  %v2499_v31 = vld [vmem:[%s3566_s1 + $0x584] ss:$112 sps:$4 sm:$0xff]  }
  0x5c   :  { %1607 = vmatpush1.bf16.msra.mxu1 %v2404_v32  ;;  %1565 = vmatprep.subr.bf16.mxu0 %v2409_v33  ;;  %v2502_v32 = vld [vmem:[%s3566_s1 + $0x58c] ss:$112 sps:$4 sm:$0xff]   ;;  %v2497_v33 = vld [vmem:[%s3566_s1 + $0x580] ss:$112 sps:$4 sm:$0xff]  }
  0x5d   :  { %1608 = vmatprep.subr.bf16.mxu1 %v2412_v34  ;;  %v2500_v34 = vld [vmem:[%s3566_s1 + $0x588] ss:$112 sps:$4 sm:$0xff]  }
  0x5f   :  { %1566 = vmatpush1.bf16.msra.mxu0 %v2407_v36  ;;  %v2505_v36 = vld [vmem:[%s3566_s1 + $0x664] ss:$112 sps:$4 sm:$0xff]  }
  0x60   :  { %1609 = vmatpush1.bf16.msra.mxu1 %v2410_v37  ;;  %1637 = vmatprep.subr.bf16.mxu0 %v2415_v38  ;;  %v2508_v37 = vld [vmem:[%s3566_s1 + $0x66c] ss:$112 sps:$4 sm:$0xff]   ;;  %v2503_v38 = vld [vmem:[%s3566_s1 + $0x660] ss:$112 sps:$4 sm:$0xff]  }
  0x61   :  { %1680 = vmatprep.subr.bf16.mxu1 %v2418_v39  ;;  %v2506_v39 = vld [vmem:[%s3566_s1 + $0x668] ss:$112 sps:$4 sm:$0xff]  }
  0x62   :  { %1584 = vmatmul.mubr.bf16.vlgmr.msra.gmra.mrb[8].mxu0 %v2735_v35 }
  0x63   :  { %1627 = vmatmul.mubr.bf16.vlgmr.msra.gmra.mrb[8].mxu1 %v2735_v35  ;;  %1638 = vmatpush1.bf16.msra.mxu0 %v2413_v40  ;;  %v2511_v40 = vld [vmem:[%s3566_s1 + $0x54] ss:$112 sps:$4 sm:$0xff]  }
  0x64   :  { %1681 = vmatpush1.bf16.msra.mxu1 %v2416_v41  ;;  %1639 = vmatprep.subr.bf16.mxu0 %v2421_v42  ;;  %v2514_v41 = vld [vmem:[%s3566_s1 + $0x5c] ss:$112 sps:$4 sm:$0xff]   ;;  %v2509_v42 = vld [vmem:[%s3566_s1 + $0x50] ss:$112 sps:$4 sm:$0xff]  }
  0x65   :  { %1682 = vmatprep.subr.bf16.mxu1 %v2424_v43  ;;  %1669 = vmatprep.mubr.bf16.mxu0 %v2606_v1  ;;  %v2512_v43 = vld [vmem:[%s3566_s1 + $0x58] ss:$112 sps:$4 sm:$0xff]  }
  0x66   :  { %1712 = vmatprep.mubr.bf16.mxu1 %v2606_v1 }
  0x67   :  { %1640 = vmatpush1.bf16.msra.mxu0 %v2419_v44  ;;  %v2517_v44 = vld [vmem:[%s3566_s1 + $0x134] ss:$112 sps:$4 sm:$0xff]  }
  0x68   :  { %1683 = vmatpush1.bf16.msra.mxu1 %v2422_v45  ;;  %1641 = vmatprep.subr.bf16.mxu0 %v2427_v46  ;;  %v2520_v45 = vld [vmem:[%s3566_s1 + $0x13c] ss:$112 sps:$4 sm:$0xff]   ;;  %v2515_v46 = vld [vmem:[%s3566_s1 + $0x130] ss:$112 sps:$4 sm:$0xff]  }
  0x69   :  { %1684 = vmatprep.subr.bf16.mxu1 %v2430_v47  ;;  %v2518_v47 = vld [vmem:[%s3566_s1 + $0x138] ss:$112 sps:$4 sm:$0xff]  }
  0x6b   :  { %1642 = vmatpush1.bf16.msra.mxu0 %v2425_v48  ;;  %v2523_v48 = vld [vmem:[%s3566_s1 + $0x214] ss:$112 sps:$4 sm:$0xff]  }
  0x6c   :  { %1685 = vmatpush1.bf16.msra.mxu1 %v2428_v49  ;;  %1643 = vmatprep.subr.bf16.mxu0 %v2433_v50  ;;  %v2521_v49 = vld [vmem:[%s3566_s1 + $0x210] ss:$112 sps:$4 sm:$0xff]   ;;  %v2524_v50 = vld [vmem:[%s3566_s1 + $0x218] ss:$112 sps:$4 sm:$0xff]  }
  0x6d   :  { %1686 = vmatprep.subr.bf16.mxu1 %v2436_v51  ;;  %v2529_v51 = vld [vmem:[%s3566_s1 + $0x2f4] ss:$112 sps:$4 sm:$0xff]  }
  0x6f   :  { %1644 = vmatpush1.bf16.msra.mxu0 %v2431_v52  ;;  %v2532_v52 = vld [vmem:[%s3566_s1 + $0x2fc] ss:$112 sps:$4 sm:$0xff]  }
  0x70   :  { %1687 = vmatpush1.bf16.msra.mxu1 %v2434_v53  ;;  %1645 = vmatprep.subr.bf16.mxu0 %v2439_v54  ;;  %v2527_v53 = vld [vmem:[%s3566_s1 + $0x2f0] ss:$112 sps:$4 sm:$0xff]   ;;  %v2530_v54 = vld [vmem:[%s3566_s1 + $0x2f8] ss:$112 sps:$4 sm:$0xff]  }
  0x71   :  { %1688 = vmatprep.subr.bf16.mxu1 %v2442_v55  ;;  %v2535_v55 = vld [vmem:[%s3566_s1 + $0x3d4] ss:$112 sps:$4 sm:$0xff]  }
  0x73   :  { %1646 = vmatpush1.bf16.msra.mxu0 %v2437_v56  ;;  %v2538_v56 = vld [vmem:[%s3566_s1 + $0x3dc] ss:$112 sps:$4 sm:$0xff]  }
  0x74   :  { %1689 = vmatpush1.bf16.msra.mxu1 %v2440_v57  ;;  %1647 = vmatprep.subr.bf16.mxu0 %v2445_v58  ;;  %v2533_v57 = vld [vmem:[%s3566_s1 + $0x3d0] ss:$112 sps:$4 sm:$0xff]   ;;  %v2536_v58 = vld [vmem:[%s3566_s1 + $0x3d8] ss:$112 sps:$4 sm:$0xff]  }
  0x75   :  { %1690 = vmatprep.subr.bf16.mxu1 %v2448_v59  ;;  %v2541_v59 = vld [vmem:[%s3566_s1 + $0x4b4] ss:$112 sps:$4 sm:$0xff]  }
  0x77   :  { %1648 = vmatpush1.bf16.msra.mxu0 %v2443_v60  ;;  %v2544_v60 = vld [vmem:[%s3566_s1 + $0x4bc] ss:$112 sps:$4 sm:$0xff]  }
  0x78   :  { %1691 = vmatpush1.bf16.msra.mxu1 %v2446_v61  ;;  %1649 = vmatprep.subr.bf16.mxu0 %v2451_v62  ;;  %v2539_v61 = vld [vmem:[%s3566_s1 + $0x4b0] ss:$112 sps:$4 sm:$0xff]   ;;  %v2542_v62 = vld [vmem:[%s3566_s1 + $0x4b8] ss:$112 sps:$4 sm:$0xff]  }
  0x79   :  { %1692 = vmatprep.subr.bf16.mxu1 %v2454_v63  ;;  %v2547_v63 = vld [vmem:[%s3566_s1 + $0x594] ss:$112 sps:$4 sm:$0xff]  }
  0x7b   :  { %1650 = vmatpush1.bf16.msra.mxu0 %v2449_v0  ;;  %v2550_v0 = vld [vmem:[%s3566_s1 + $0x59c] ss:$112 sps:$4 sm:$0xff]  }
  0x7c   :  { %1693 = vmatpush1.bf16.msra.mxu1 %v2452_v2  ;;  %1651 = vmatprep.subr.bf16.mxu0 %v2457_v3  ;;  %v2545_v2 = vld [vmem:[%s3566_s1 + $0x590] ss:$112 sps:$4 sm:$0xff]   ;;  %v2548_v3 = vld [vmem:[%s3566_s1 + $0x598] ss:$112 sps:$4 sm:$0xff]  }
  0x7d   :  { %1694 = vmatprep.subr.bf16.mxu1 %v2460_v4  ;;  %v2553_v4 = vld [vmem:[%s3566_s1 + $0x674] ss:$112 sps:$4 sm:$0xff]  }
  0x7f   :  { %1652 = vmatpush1.bf16.msra.mxu0 %v2455_v5  ;;  %v2556_v5 = vld [vmem:[%s3566_s1 + $0x67c] ss:$112 sps:$4 sm:$0xff]  }
  0x80   :  { %1695 = vmatpush1.bf16.msra.mxu1 %v2458_v6  ;;  %1723 = vmatprep.subr.bf16.mxu0 %v2463_v7  ;;  %v2551_v6 = vld [vmem:[%s3566_s1 + $0x670] ss:$112 sps:$4 sm:$0xff]   ;;  %v2554_v7 = vld [vmem:[%s3566_s1 + $0x678] ss:$112 sps:$4 sm:$0xff]  }
  0x81   :  { %1766 = vmatprep.subr.bf16.mxu1 %v2466_v8  ;;  %v2559_v8 = vld [vmem:[%s3566_s1 + $0x64] ss:$112 sps:$4 sm:$0xff]  }
  0x82   :  { %1670 = vmatmul.mubr.bf16.vlgmr.msra.gmra.mrb[12].mxu0 %v2735_v35 }
  0x83   :  { %1713 = vmatmul.mubr.bf16.vlgmr.msra.gmra.mrb[12].mxu1 %v2735_v35  ;;  %1724 = vmatpush1.bf16.msra.mxu0 %v2461_v9  ;;  %v2562_v9 = vld [vmem:[%s3566_s1 + $0x6c] ss:$112 sps:$4 sm:$0xff]  }
  0x84   :  { %1767 = vmatpush1.bf16.msra.mxu1 %v2464_v10  ;;  %1725 = vmatprep.subr.bf16.mxu0 %v2469_v11  ;;  %v2557_v10 = vld [vmem:[%s3566_s1 + $0x60] ss:$112 sps:$4 sm:$0xff]   ;;  %v2560_v11 = vld [vmem:[%s3566_s1 + $0x68] ss:$112 sps:$4 sm:$0xff]  }
  0x85   :  { %1768 = vmatprep.subr.bf16.mxu1 %v2472_v12  ;;  %1755 = vmatprep.mubr.bf16.mxu0 %v2606_v1  ;;  %v2565_v12 = vld [vmem:[%s3566_s1 + $0x144] ss:$112 sps:$4 sm:$0xff]  }
  0x86   :  { %1798 = vmatprep.mubr.bf16.mxu1 %v2606_v1 }
  0x87   :  { %1726 = vmatpush1.bf16.msra.mxu0 %v2467_v13  ;;  %v2568_v13 = vld [vmem:[%s3566_s1 + $0x14c] ss:$112 sps:$4 sm:$0xff]  }
  0x88   :  { %1769 = vmatpush1.bf16.msra.mxu1 %v2470_v14  ;;  %1727 = vmatprep.subr.bf16.mxu0 %v2475_v15  ;;  %v2605_v14 = vld [vmem:[%s3567_s0] sm:$0xff]  }
  0x89   :  { %1770 = vmatprep.subr.bf16.mxu1 %v2478_v16  ;;  %v2563_v15 = vld [vmem:[%s3566_s1 + $0x140] ss:$112 sps:$4 sm:$0xff]   ;;  %v2566_v16 = vld [vmem:[%s3566_s1 + $0x148] ss:$112 sps:$4 sm:$0xff]  }
  0x8b   :  { %1728 = vmatpush1.bf16.msra.mxu0 %v2473_v17  ;;  %v2571_v17 = vld [vmem:[%s3566_s1 + $0x224] ss:$112 sps:$4 sm:$0xff]  }
  0x8c   :  { %1771 = vmatpush1.bf16.msra.mxu1 %v2476_v18  ;;  %1729 = vmatprep.subr.bf16.mxu0 %v2481_v19  ;;  %v2574_v18 = vld [vmem:[%s3566_s1 + $0x22c] ss:$112 sps:$4 sm:$0xff]   ;;  %v2569_v19 = vld [vmem:[%s3566_s1 + $0x220] ss:$112 sps:$4 sm:$0xff]  }
  0x8d   :  { %1772 = vmatprep.subr.bf16.mxu1 %v2484_v20  ;;  %v2572_v20 = vld [vmem:[%s3566_s1 + $0x228] ss:$112 sps:$4 sm:$0xff]  }
  0x8f   :  { %1730 = vmatpush1.bf16.msra.mxu0 %v2479_v21  ;;  %v2577_v21 = vld [vmem:[%s3566_s1 + $0x304] ss:$112 sps:$4 sm:$0xff]  }
  0x90   :  { %1773 = vmatpush1.bf16.msra.mxu1 %v2482_v22  ;;  %1731 = vmatprep.subr.bf16.mxu0 %v2487_v23  ;;  %v2575_v22 = vld [vmem:[%s3566_s1 + $0x300] ss:$112 sps:$4 sm:$0xff]   ;;  %v2578_v23 = vld [vmem:[%s3566_s1 + $0x308] ss:$112 sps:$4 sm:$0xff]  }
  0x91   :  { %1774 = vmatprep.subr.bf16.mxu1 %v2490_v24  ;;  %v2583_v24 = vld [vmem:[%s3566_s1 + $0x3e4] ss:$112 sps:$4 sm:$0xff]  }
  0x93   :  { %1732 = vmatpush1.bf16.msra.mxu0 %v2485_v25  ;;  %v2586_v25 = vld [vmem:[%s3566_s1 + $0x3ec] ss:$112 sps:$4 sm:$0xff]  }
  0x94   :  { %1775 = vmatpush1.bf16.msra.mxu1 %v2488_v26  ;;  %1733 = vmatprep.subr.bf16.mxu0 %v2493_v27  ;;  %v2581_v26 = vld [vmem:[%s3566_s1 + $0x3e0] ss:$112 sps:$4 sm:$0xff]   ;;  %v2584_v27 = vld [vmem:[%s3566_s1 + $0x3e8] ss:$112 sps:$4 sm:$0xff]  }
  0x95   :  { %1776 = vmatprep.subr.bf16.mxu1 %v2496_v28  ;;  %v2589_v28 = vld [vmem:[%s3566_s1 + $0x4c4] ss:$112 sps:$4 sm:$0xff]  }
  0x97   :  { %1734 = vmatpush1.bf16.msra.mxu0 %v2491_v29  ;;  %v2592_v29 = vld [vmem:[%s3566_s1 + $0x4cc] ss:$112 sps:$4 sm:$0xff]  }
  0x98   :  { %1777 = vmatpush1.bf16.msra.mxu1 %v2494_v30  ;;  %1735 = vmatprep.subr.bf16.mxu0 %v2499_v31  ;;  %v2587_v30 = vld [vmem:[%s3566_s1 + $0x4c0] ss:$112 sps:$4 sm:$0xff]   ;;  %v2590_v31 = vld [vmem:[%s3566_s1 + $0x4c8] ss:$112 sps:$4 sm:$0xff]  }
  0x99   :  { %1778 = vmatprep.subr.bf16.mxu1 %v2502_v32  ;;  %v2595_v32 = vld [vmem:[%s3566_s1 + $0x5a4] ss:$112 sps:$4 sm:$0xff]  }
  0x9b   :  { %1736 = vmatpush1.bf16.msra.mxu0 %v2497_v33  ;;  %v2598_v33 = vld [vmem:[%s3566_s1 + $0x5ac] ss:$112 sps:$4 sm:$0xff]  }
  0x9c   :  { %1779 = vmatpush1.bf16.msra.mxu1 %v2500_v34  ;;  %1737 = vmatprep.subr.bf16.mxu0 %v2505_v36  ;;  %v2593_v34 = vld [vmem:[%s3566_s1 + $0x5a0] ss:$112 sps:$4 sm:$0xff]   ;;  %v2596_v36 = vld [vmem:[%s3566_s1 + $0x5a8] ss:$112 sps:$4 sm:$0xff]  }
  0x9d   :  { %1780 = vmatprep.subr.bf16.mxu1 %v2508_v37  ;;  %v2601_v37 = vld [vmem:[%s3566_s1 + $0x684] ss:$112 sps:$4 sm:$0xff]  }
  0x9f   :  { %1738 = vmatpush1.bf16.msra.mxu0 %v2503_v38  ;;  %v2604_v38 = vld [vmem:[%s3566_s1 + $0x68c] ss:$112 sps:$4 sm:$0xff]  }
  0xa0   :  { %1781 = vmatpush1.bf16.msra.mxu1 %v2506_v39  ;;  %1809 = vmatprep.subr.bf16.mxu0 %v2511_v40  ;;  %v2599_v39 = vld [vmem:[%s3566_s1 + $0x680] ss:$112 sps:$4 sm:$0xff]   ;;  %v2602_v40 = vld [vmem:[%s3566_s1 + $0x688] ss:$112 sps:$4 sm:$0xff]  }
  0xa1   :  { %1852 = vmatprep.subr.bf16.mxu1 %v2514_v41  ;;  %v3338_v41 = vpop.permute.xlu0 %245 }
  0xa2   :  { %1756 = vmatmul.mubr.bf16.vlgmr.msra.gmra.mrb[16].mxu0 %v2735_v35 }
  0xa3   :  { %1799 = vmatmul.mubr.bf16.vlgmr.msra.gmra.mrb[16].mxu1 %v2735_v35  ;;  %1810 = vmatpush1.bf16.msra.mxu0 %v2509_v42  ;;  %v2526_v35 = vld [vmem:[%s3566_s1 + $0x21c] ss:$112 sps:$4 sm:$0xff]  }
  0xa4   :  { %1853 = vmatpush1.bf16.msra.mxu1 %v2512_v43  ;;  %1811 = vmatprep.subr.bf16.mxu0 %v2517_v44 }
  0xa5   :  { %1854 = vmatprep.subr.bf16.mxu1 %v2520_v45  ;;  %1841 = vmatprep.mubr.bf16.mxu0 %v2606_v1  ;;  %v3340_v42 = vpop.permute.xlu0 %250 }
  0xa6   :  { %1884 = vmatprep.mubr.bf16.mxu1 %v2606_v1 }
  0xa7   :  { %1812 = vmatpush1.bf16.msra.mxu0 %v2515_v46 }
  0xa8   :  { %1855 = vmatpush1.bf16.msra.mxu1 %v2518_v47  ;;  %1813 = vmatprep.subr.bf16.mxu0 %v2523_v48 }
  0xa9   :  { %1856 = vmatprep.subr.bf16.mxu1 %v2526_v35 }
  0xab   :  { %1814 = vmatpush1.bf16.msra.mxu0 %v2521_v49 }
  0xac   :  { %1857 = vmatpush1.bf16.msra.mxu1 %v2524_v50  ;;  %1815 = vmatprep.subr.bf16.mxu0 %v2529_v51 }
  0xad   :  { %1858 = vmatprep.subr.bf16.mxu1 %v2532_v52 }
  0xaf   :  { %1816 = vmatpush1.bf16.msra.mxu0 %v2527_v53 }
  0xb0   :  { %1859 = vmatpush1.bf16.msra.mxu1 %v2530_v54  ;;  %1817 = vmatprep.subr.bf16.mxu0 %v2535_v55 }
  0xb1   :  { %1860 = vmatprep.subr.bf16.mxu1 %v2538_v56 }
  0xb3   :  { %1818 = vmatpush1.bf16.msra.mxu0 %v2533_v57 }
  0xb4   :  { %1861 = vmatpush1.bf16.msra.mxu1 %v2536_v58  ;;  %1819 = vmatprep.subr.bf16.mxu0 %v2541_v59 }
  0xb5   :  { %1862 = vmatprep.subr.bf16.mxu1 %v2544_v60 }
  0xb7   :  { %1820 = vmatpush1.bf16.msra.mxu0 %v2539_v61 }
  0xb8   :  { %1863 = vmatpush1.bf16.msra.mxu1 %v2542_v62  ;;  %1821 = vmatprep.subr.bf16.mxu0 %v2547_v63 }
  0xb9   :  { %1864 = vmatprep.subr.bf16.mxu1 %v2550_v0 }
  0xbb   :  { %1822 = vmatpush1.bf16.msra.mxu0 %v2545_v2 }
  0xbc   :  { %1865 = vmatpush1.bf16.msra.mxu1 %v2548_v3  ;;  %1823 = vmatprep.subr.bf16.mxu0 %v2553_v4 }
  0xbd   :  { %1866 = vmatprep.subr.bf16.mxu1 %v2556_v5 }
  0xbf   :  { %1824 = vmatpush1.bf16.msra.mxu0 %v2551_v6 }
  0xc0   :  { %1867 = vmatpush1.bf16.msra.mxu1 %v2554_v7  ;;  %1895 = vmatprep.subr.bf16.mxu0 %v2559_v8 }
  0xc1   :  { %1938 = vmatprep.subr.bf16.mxu1 %v2562_v9 }
  0xc2   :  { %1842 = vmatmul.mubr.bf16.vlgmr.msra.gmra.mrb[20].mxu0 %v2605_v14 }
  0xc3   :  { %1885 = vmatmul.mubr.bf16.vlgmr.msra.gmra.mrb[20].mxu1 %v2605_v14  ;;  %1896 = vmatpush1.bf16.msra.mxu0 %v2557_v10 }
  0xc4   :  { %1939 = vmatpush1.bf16.msra.mxu1 %v2560_v11  ;;  %1897 = vmatprep.subr.bf16.mxu0 %v2565_v12 }
  0xc5   :  { %1940 = vmatprep.subr.bf16.mxu1 %v2568_v13  ;;  %1927 = vmatprep.mubr.bf16.mxu0 %v2606_v1 }
  0xc6   :  { %1970 = vmatprep.mubr.bf16.mxu1 %v2606_v1  ;;  %v2580_v1 = vld [vmem:[%s3566_s1 + $0x30c] ss:$112 sps:$4 sm:$0xff]  }
  0xc7   :  { %1898 = vmatpush1.bf16.msra.mxu0 %v2563_v15 }
  0xc8   :  { %1941 = vmatpush1.bf16.msra.mxu1 %v2566_v16  ;;  %1899 = vmatprep.subr.bf16.mxu0 %v2571_v17 }
  0xc9   :  { %1942 = vmatprep.subr.bf16.mxu1 %v2574_v18 }
  0xcb   :  { %1900 = vmatpush1.bf16.msra.mxu0 %v2569_v19 }
  0xcc   :  { %1943 = vmatpush1.bf16.msra.mxu1 %v2572_v20  ;;  %1901 = vmatprep.subr.bf16.mxu0 %v2577_v21 }
  0xcd   :  { %1944 = vmatprep.subr.bf16.mxu1 %v2580_v1 }
  0xcf   :  { %1902 = vmatpush1.bf16.msra.mxu0 %v2575_v22 }
  0xd0   :  { %1945 = vmatpush1.bf16.msra.mxu1 %v2578_v23  ;;  %1903 = vmatprep.subr.bf16.mxu0 %v2583_v24 }
  0xd1   :  { %1946 = vmatprep.subr.bf16.mxu1 %v2586_v25 }
  0xd3   :  { %1904 = vmatpush1.bf16.msra.mxu0 %v2581_v26 }
  0xd4   :  { %1947 = vmatpush1.bf16.msra.mxu1 %v2584_v27  ;;  %1905 = vmatprep.subr.bf16.mxu0 %v2589_v28 }
  0xd5   :  { %1948 = vmatprep.subr.bf16.mxu1 %v2592_v29 }
  0xd7   :  { %1906 = vmatpush1.bf16.msra.mxu0 %v2587_v30 }
  0xd8   :  { %1949 = vmatpush1.bf16.msra.mxu1 %v2590_v31  ;;  %1907 = vmatprep.subr.bf16.mxu0 %v2595_v32 }
  0xd9   :  { %1950 = vmatprep.subr.bf16.mxu1 %v2598_v33 }
  0xdb   :  { %1908 = vmatpush1.bf16.msra.mxu0 %v2593_v34 }
  0xdc   :  { %1951 = vmatpush1.bf16.msra.mxu1 %v2596_v36  ;;  %1909 = vmatprep.subr.bf16.mxu0 %v2601_v37 }
  0xdd   :  { %1952 = vmatprep.subr.bf16.mxu1 %v2604_v38 }
  0xdf   :  { %1910 = vmatpush1.bf16.msra.mxu0 %v2599_v39 }
  0xe0   :  { %1953 = vmatpush1.bf16.msra.mxu1 %v2602_v40 }
  0xe2   :  { %1928 = vmatmul.mubr.bf16.vlgmr.msra.gmra.mrb[24].mxu0 %v2605_v14 }
  0xe3   :  { %1971 = vmatmul.mubr.bf16.vlgmr.msra.gmra.mrb[24].mxu1 %v2605_v14 }
  0xf5   :  { %v1413_v43 = vpop.f32.mrb[0].mxu0 }
  0xf6   :  { %v1456_v44 = vpop.f32.mrb[0].mxu1  ;;  %v1414_v45 = vadd.f32 %v1413_v43, %v3338_v41  ;;  %v1415_v47 = vpop.f32.mrb[1].mxu0 }
  0xf7   :  { %v1457_v46 = vadd.f32 %v1456_v44, %v3338_v41  ;;  %v1458_v48 = vpop.f32.mrb[1].mxu1  ;;  %v1416_v35 = vadd.f32 %v1415_v47, %v3338_v41  ;;  %v1417_v50 = vpop.f32.mrb[2].mxu0 }
  0xf8   :  { %v1459_v49 = vadd.f32 %v1458_v48, %v3338_v41  ;;  %v1460_v51 = vpop.f32.mrb[2].mxu1  ;;  %1981 = vst [vmem:[%s3569_s3] sm:$0xff] %v1414_v45  ;;  %v1418_v52 = vadd.f32 %v1417_v50, %v3340_v42  ;;  %v1419_v54 = vpop.f32.mrb[3].mxu0 }
  0xf9   :  { %1983 = vst [vmem:[%s3569_s3 + $0x10] sm:$0xff] %v1457_v46  ;;  %v1461_v53 = vadd.f32 %v1460_v51, %v3340_v42  ;;  %v1462_v55 = vpop.f32.mrb[3].mxu1  ;;  %1982 = vst [vmem:[%s3569_s3 + $0x8] sm:$0xff] %v1416_v35  ;;  %v1420_v56 = vadd.f32 %v1419_v54, %v3340_v42 }
  0xfa   :  { %1984 = vst [vmem:[%s3569_s3 + $0x18] sm:$0xff] %v1459_v49  ;;  %v1463_v57 = vadd.f32 %v1462_v55, %v3340_v42  ;;  %2009 = vst [vmem:[%s3569_s3 + $0xe0] sm:$0xff] %v1418_v52 }
  0xfb   :  { %2011 = vst [vmem:[%s3569_s3 + $0xf0] sm:$0xff] %v1461_v53  ;;  %2010 = vst [vmem:[%s3569_s3 + $0xe8] sm:$0xff] %v1420_v56 }
  0xfc   :  { %2012 = vst [vmem:[%s3569_s3 + $0xf8] sm:$0xff] %v1463_v57 }
 0x115   :  { %v1499_v58 = vpop.f32.mrb[4].mxu0 }
 0x116   :  { %v1542_v59 = vpop.f32.mrb[4].mxu1  ;;  %v1500_v60 = vadd.f32 %v1499_v58, %v3338_v41  ;;  %v1501_v62 = vpop.f32.mrb[5].mxu0 }
 0x117   :  { %v1543_v61 = vadd.f32 %v1542_v59, %v3338_v41  ;;  %v1544_v63 = vpop.f32.mrb[5].mxu1  ;;  %v1502_v0 = vadd.f32 %v1501_v62, %v3338_v41  ;;  %v1503_v3 = vpop.f32.mrb[6].mxu0 }
 0x118   :  { %v1545_v2 = vadd.f32 %v1544_v63, %v3338_v41  ;;  %v1546_v4 = vpop.f32.mrb[6].mxu1  ;;  %1985 = vst [vmem:[%s3569_s3 + $0x20] sm:$0xff] %v1500_v60  ;;  %v1504_v5 = vadd.f32 %v1503_v3, %v3340_v42  ;;  %v1505_v7 = vpop.f32.mrb[7].mxu0 }
 0x119   :  { %1987 = vst [vmem:[%s3569_s3 + $0x30] sm:$0xff] %v1543_v61  ;;  %v1547_v6 = vadd.f32 %v1546_v4, %v3340_v42  ;;  %v1548_v8 = vpop.f32.mrb[7].mxu1  ;;  %1986 = vst [vmem:[%s3569_s3 + $0x28] sm:$0xff] %v1502_v0  ;;  %v1506_v9 = vadd.f32 %v1505_v7, %v3340_v42 }
 0x11a   :  { %1988 = vst [vmem:[%s3569_s3 + $0x38] sm:$0xff] %v1545_v2  ;;  %v1549_v10 = vadd.f32 %v1548_v8, %v3340_v42  ;;  %2013 = vst [vmem:[%s3569_s3 + $0x100] sm:$0xff] %v1504_v5 }
 0x11b   :  { %2015 = vst [vmem:[%s3569_s3 + $0x110] sm:$0xff] %v1547_v6  ;;  %2014 = vst [vmem:[%s3569_s3 + $0x108] sm:$0xff] %v1506_v9 }
 0x11c   :  { %2016 = vst [vmem:[%s3569_s3 + $0x118] sm:$0xff] %v1549_v10 }
 0x135   :  { %v1585_v11 = vpop.f32.mrb[8].mxu0 }
 0x136   :  { %v1628_v12 = vpop.f32.mrb[8].mxu1  ;;  %v1586_v13 = vadd.f32 %v1585_v11, %v3338_v41  ;;  %v1587_v15 = vpop.f32.mrb[9].mxu0 }
 0x137   :  { %v1629_v14 = vadd.f32 %v1628_v12, %v3338_v41  ;;  %v1630_v16 = vpop.f32.mrb[9].mxu1  ;;  %v1588_v17 = vadd.f32 %v1587_v15, %v3338_v41  ;;  %v1589_v19 = vpop.f32.mrb[10].mxu0 }
 0x138   :  { %v1631_v18 = vadd.f32 %v1630_v16, %v3338_v41  ;;  %v1632_v20 = vpop.f32.mrb[10].mxu1  ;;  %1989 = vst [vmem:[%s3569_s3 + $0x40] sm:$0xff] %v1586_v13  ;;  %v1590_v21 = vadd.f32 %v1589_v19, %v3340_v42  ;;  %v1591_v22 = vpop.f32.mrb[11].mxu0 }
 0x139   :  { %1991 = vst [vmem:[%s3569_s3 + $0x50] sm:$0xff] %v1629_v14  ;;  %v1633_v1 = vadd.f32 %v1632_v20, %v3340_v42  ;;  %v1634_v23 = vpop.f32.mrb[11].mxu1  ;;  %1990 = vst [vmem:[%s3569_s3 + $0x48] sm:$0xff] %v1588_v17  ;;  %v1592_v24 = vadd.f32 %v1591_v22, %v3340_v42 }
 0x13a   :  { %1992 = vst [vmem:[%s3569_s3 + $0x58] sm:$0xff] %v1631_v18  ;;  %v1635_v25 = vadd.f32 %v1634_v23, %v3340_v42  ;;  %2017 = vst [vmem:[%s3569_s3 + $0x120] sm:$0xff] %v1590_v21 }
 0x13b   :  { %2019 = vst [vmem:[%s3569_s3 + $0x130] sm:$0xff] %v1633_v1  ;;  %2018 = vst [vmem:[%s3569_s3 + $0x128] sm:$0xff] %v1592_v24 }
 0x13c   :  { %2020 = vst [vmem:[%s3569_s3 + $0x138] sm:$0xff] %v1635_v25 }
 0x155   :  { %v1671_v26 = vpop.f32.mrb[12].mxu0 }
 0x156   :  { %v1714_v27 = vpop.f32.mrb[12].mxu1  ;;  %v1672_v28 = vadd.f32 %v1671_v26, %v3338_v41  ;;  %v1673_v30 = vpop.f32.mrb[13].mxu0 }
 0x157   :  { %v1715_v29 = vadd.f32 %v1714_v27, %v3338_v41  ;;  %v1716_v31 = vpop.f32.mrb[13].mxu1  ;;  %v1674_v32 = vadd.f32 %v1673_v30, %v3338_v41  ;;  %v1675_v34 = vpop.f32.mrb[14].mxu0 }
 0x158   :  { %v1717_v33 = vadd.f32 %v1716_v31, %v3338_v41  ;;  %v1718_v36 = vpop.f32.mrb[14].mxu1  ;;  %1993 = vst [vmem:[%s3569_s3 + $0x60] sm:$0xff] %v1672_v28  ;;  %v1676_v37 = vadd.f32 %v1675_v34, %v3340_v42  ;;  %v1677_v39 = vpop.f32.mrb[15].mxu0 }
 0x159   :  { %1995 = vst [vmem:[%s3569_s3 + $0x70] sm:$0xff] %v1715_v29  ;;  %v1719_v38 = vadd.f32 %v1718_v36, %v3340_v42  ;;  %v1720_v40 = vpop.f32.mrb[15].mxu1  ;;  %1994 = vst [vmem:[%s3569_s3 + $0x68] sm:$0xff] %v1674_v32  ;;  %v1678_v43 = vadd.f32 %v1677_v39, %v3340_v42 }
 0x15a   :  { %1996 = vst [vmem:[%s3569_s3 + $0x78] sm:$0xff] %v1717_v33  ;;  %v1721_v44 = vadd.f32 %v1720_v40, %v3340_v42  ;;  %2021 = vst [vmem:[%s3569_s3 + $0x140] sm:$0xff] %v1676_v37 }
 0x15b   :  { %2023 = vst [vmem:[%s3569_s3 + $0x150] sm:$0xff] %v1719_v38  ;;  %2022 = vst [vmem:[%s3569_s3 + $0x148] sm:$0xff] %v1678_v43 }
 0x15c   :  { %2024 = vst [vmem:[%s3569_s3 + $0x158] sm:$0xff] %v1721_v44 }
 0x175   :  { %v1757_v45 = vpop.f32.mrb[16].mxu0 }
 0x176   :  { %v1800_v46 = vpop.f32.mrb[16].mxu1  ;;  %v1758_v47 = vadd.f32 %v1757_v45, %v3338_v41  ;;  %v1759_v35 = vpop.f32.mrb[17].mxu0 }
 0x177   :  { %v1801_v48 = vadd.f32 %v1800_v46, %v3338_v41  ;;  %v1802_v49 = vpop.f32.mrb[17].mxu1  ;;  %v1760_v50 = vadd.f32 %v1759_v35, %v3338_v41  ;;  %v1761_v52 = vpop.f32.mrb[18].mxu0 }
 0x178   :  { %v1803_v51 = vadd.f32 %v1802_v49, %v3338_v41  ;;  %v1804_v53 = vpop.f32.mrb[18].mxu1  ;;  %1997 = vst [vmem:[%s3569_s3 + $0x80] sm:$0xff] %v1758_v47  ;;  %v1762_v54 = vadd.f32 %v1761_v52, %v3340_v42  ;;  %v1763_v56 = vpop.f32.mrb[19].mxu0 }
 0x179   :  { %1999 = vst [vmem:[%s3569_s3 + $0x90] sm:$0xff] %v1801_v48  ;;  %v1805_v55 = vadd.f32 %v1804_v53, %v3340_v42  ;;  %v1806_v57 = vpop.f32.mrb[19].mxu1  ;;  %1998 = vst [vmem:[%s3569_s3 + $0x88] sm:$0xff] %v1760_v50  ;;  %v1764_v58 = vadd.f32 %v1763_v56, %v3340_v42 }
 0x17a   :  { %2000 = vst [vmem:[%s3569_s3 + $0x98] sm:$0xff] %v1803_v51  ;;  %v1807_v59 = vadd.f32 %v1806_v57, %v3340_v42  ;;  %2025 = vst [vmem:[%s3569_s3 + $0x160] sm:$0xff] %v1762_v54 }
 0x17b   :  { %2027 = vst [vmem:[%s3569_s3 + $0x170] sm:$0xff] %v1805_v55  ;;  %2026 = vst [vmem:[%s3569_s3 + $0x168] sm:$0xff] %v1764_v58 }
 0x17c   :  { %2028 = vst [vmem:[%s3569_s3 + $0x178] sm:$0xff] %v1807_v59 }
 0x195   :  { %v1843_v60 = vpop.f32.mrb[20].mxu0 }
 0x196   :  { %v1886_v61 = vpop.f32.mrb[20].mxu1  ;;  %v1844_v62 = vadd.f32 %v1843_v60, %v3338_v41  ;;  %v1845_v0 = vpop.f32.mrb[21].mxu0 }
 0x197   :  { %v1887_v63 = vadd.f32 %v1886_v61, %v3338_v41  ;;  %v1888_v2 = vpop.f32.mrb[21].mxu1  ;;  %v1846_v3 = vadd.f32 %v1845_v0, %v3338_v41  ;;  %v1847_v5 = vpop.f32.mrb[22].mxu0 }
 0x198   :  { %v1889_v4 = vadd.f32 %v1888_v2, %v3338_v41  ;;  %v1890_v6 = vpop.f32.mrb[22].mxu1  ;;  %2001 = vst [vmem:[%s3569_s3 + $0xa0] sm:$0xff] %v1844_v62  ;;  %v1848_v7 = vadd.f32 %v1847_v5, %v3340_v42  ;;  %v1849_v9 = vpop.f32.mrb[23].mxu0 }
 0x199   :  { %2003 = vst [vmem:[%s3569_s3 + $0xb0] sm:$0xff] %v1887_v63  ;;  %v1891_v8 = vadd.f32 %v1890_v6, %v3340_v42  ;;  %v1892_v10 = vpop.f32.mrb[23].mxu1  ;;  %2002 = vst [vmem:[%s3569_s3 + $0xa8] sm:$0xff] %v1846_v3  ;;  %v1850_v11 = vadd.f32 %v1849_v9, %v3340_v42 }
 0x19a   :  { %2004 = vst [vmem:[%s3569_s3 + $0xb8] sm:$0xff] %v1889_v4  ;;  %v1893_v12 = vadd.f32 %v1892_v10, %v3340_v42  ;;  %2029 = vst [vmem:[%s3569_s3 + $0x180] sm:$0xff] %v1848_v7 }
 0x19b   :  { %2031 = vst [vmem:[%s3569_s3 + $0x190] sm:$0xff] %v1891_v8  ;;  %2030 = vst [vmem:[%s3569_s3 + $0x188] sm:$0xff] %v1850_v11 }
 0x19c   :  { %2032 = vst [vmem:[%s3569_s3 + $0x198] sm:$0xff] %v1893_v12 }
 0x1b5   :  { %v1929_v13 = vpop.f32.mrb[24].mxu0 }
 0x1b6   :  { %v1972_v14 = vpop.f32.mrb[24].mxu1  ;;  %v1930_v15 = vadd.f32 %v1929_v13, %v3338_v41  ;;  %v1931_v17 = vpop.f32.mrb[25].mxu0 }
 0x1b7   :  { %v1973_v16 = vadd.f32 %v1972_v14, %v3338_v41  ;;  %v1974_v18 = vpop.f32.mrb[25].mxu1  ;;  %v1932_v19 = vadd.f32 %v1931_v17, %v3338_v41  ;;  %v1933_v21 = vpop.f32.mrb[26].mxu0 }
 0x1b8   :  { %v1975_v20 = vadd.f32 %v1974_v18, %v3338_v41  ;;  %v1976_v1 = vpop.f32.mrb[26].mxu1  ;;  %2005 = vst [vmem:[%s3569_s3 + $0xc0] sm:$0xff] %v1930_v15  ;;  %v1934_v22 = vadd.f32 %v1933_v21, %v3340_v42  ;;  %v1935_v24 = vpop.f32.mrb[27].mxu0 }
 0x1b9   :  { %2007 = vst [vmem:[%s3569_s3 + $0xd0] sm:$0xff] %v1973_v16  ;;  %v1977_v23 = vadd.f32 %v1976_v1, %v3340_v42  ;;  %v1978_v25 = vpop.f32.mrb[27].mxu1  ;;  %2006 = vst [vmem:[%s3569_s3 + $0xc8] sm:$0xff] %v1932_v19  ;;  %v1936_v41 = vadd.f32 %v1935_v24, %v3340_v42 }
 0x1ba   :  { %2008 = vst [vmem:[%s3569_s3 + $0xd8] sm:$0xff] %v1975_v20  ;;  %v1979_v26 = vadd.f32 %v1978_v25, %v3340_v42  ;;  %2033 = vst [vmem:[%s3569_s3 + $0x1a0] sm:$0xff] %v1934_v22 }
 0x1bb   :  { %2035 = vst [vmem:[%s3569_s3 + $0x1b0] sm:$0xff] %v1977_v23  ;;  %2034 = vst [vmem:[%s3569_s3 + $0x1a8] sm:$0xff] %v1936_v41 }
 0x1bc   :  { %2036 = vst [vmem:[%s3569_s3 + $0x1b8] sm:$0xff] %v1979_v26 }

</bundles_post_ra>
